<compile_context>
chip_gen: v5e
topology: v5e:2x2
jax: 0.10.0
libtpu: 0.0.40
codegen_flags: <defaults>
</compile_context>

<pallas_src>
import functools

import jax
import jax.numpy as jnp
from jax.experimental import pallas as pl
from jax.experimental.pallas import tpu as pltpu

LATENT_DIM = 12
HIDDEN = 12
T_STEPS = 10

# Batch-tile size (lanes). Multiple of 128; 512 amortizes the ~0.35us grid-step
# overhead while keeping live intermediates (~0.5 MiB) tiny on every chip
# generation (v5e 16 MiB scoped VMEM, v6e 32 MiB, v7x 32/64 MiB).
B_TILE_DEFAULT = 512


def _round_up(x, m):
    return (x + m - 1) // m * m


def _decoder_kernel(z_ref, w_ref, aux_ref, out_ref):
    """One batch tile. Layout: lanes = batch, sublanes = features/time.

    z_ref  : (12, Bt)        latent vectors, transposed (lane-dense on batch)
    w_ref  : (96, 36)        [W_x | W_h] fused-direction gate weights
    aux_ref: (96, 4)         col0 = gate bias, col1 = fwd conv w (rows 0:12),
                             col2 = bwd conv w (rows 12:24), col3[0] = conv bias
    out_ref: (10, Bt)        output, rows = timesteps, lanes = batch
    """
    H = HIDDEN
    H2 = 2 * HIDDEN          # 24  (fwd|bwd hidden concat)
    T = T_STEPS
    bt = out_ref.shape[1]

    z = z_ref[...].astype(jnp.float32)              # (12, Bt)
    w = w_ref[...]
    w_x = w[:, :LATENT_DIM]                         # (96, 12)
    w_h = w[:, LATENT_DIM:]                         # (96, 24) block-diagonal
    aux = aux_ref[...]
    bias = aux[:, 0:1]                              # (96, 1)
    cw_f = aux[:H2, 1:2]                            # (24, 1) fwd conv w (rows 12:24 zero)
    cw_b = aux[:H2, 2:3]                            # (24, 1) bwd conv w (rows 0:12 zero)
    conv_b = aux[0:1, 3:4]                          # (1, 1)

    # Input contribution to the gates: the input is the same latent vector at
    # every timestep (x.repeat([1,10,1])), so compute it once (MXU).
    gx = jnp.dot(w_x, z, preferred_element_type=jnp.float32) + bias   # (96, Bt)

    # Initialize output with the conv bias; per-step contributions accumulate.
    out_ref[...] = jnp.broadcast_to(conv_b, (T, bt))

    h = jnp.zeros((H2, bt), jnp.float32)            # rows 0:12 fwd, 12:24 bwd
    c = jnp.zeros((H2, bt), jnp.float32)

    # T = 10, tiny: statically unrolled serial recurrence.
    for s in range(T):
        # Recurrent term (kept on the MXU: M=96, K=24, N=Bt).
        g = gx + jnp.dot(w_h, h, preferred_element_type=jnp.float32)  # (96, Bt)

        # Gate rows ordered [i | f | o | g]: one sigmoid over a contiguous,
        # sublane-aligned 72-row slice, one tanh over the last 24 rows.
        sg = jax.nn.sigmoid(g[: 6 * H, :])          # (72, Bt)
        i_g = sg[:H2, :]                            # (24, Bt)
        f_g = sg[H2:2 * H2, :]
        o_g = sg[2 * H2:, :]
        g_g = jnp.tanh(g[6 * H:, :])                # (24, Bt)

        c = f_g * c + i_g * g_g
        h = o_g * jnp.tanh(c)

        # Fused pointwise Conv1d(24 -> 1): reduce h against zero-padded conv
        # weight columns (VPU mul + XLU sublane reduction), write lane-dense
        # rows straight into the output block.
        # Forward direction produces timestep s; backward direction (constant
        # input) produces timestep T-1-s.
        yf = jnp.sum(h * cw_f, axis=0, keepdims=True)   # (1, Bt)
        yb = jnp.sum(h * cw_b, axis=0, keepdims=True)   # (1, Bt)
        out_ref[s:s + 1, :] += yf
        out_ref[T - 1 - s:T - s, :] += yb


def _pack_params(params):
    """Pack PyTorch-layout LSTM/conv params into two kernel arrays.

    Fused-direction gate row order: [i_f, i_b, f_f, f_b, o_f, o_b, g_f, g_b]
    (PyTorch per-direction gate order is i, f, g, o).
    """
    H = HIDDEN
    wih = {"f": params["w_ih_f"], "b": params["w_ih_b"]}      # (48, 12)
    whh = {"f": params["w_hh_f"], "b": params["w_hh_b"]}      # (48, 12)
    bias = {"f": params["b_ih_f"] + params["b_hh_f"],
            "b": params["b_ih_b"] + params["b_hh_b"]}         # (48,)

    # (pytorch_gate_index, direction): i=0, f=1, g=2, o=3
    order = [(0, "f"), (0, "b"), (1, "f"), (1, "b"),
             (3, "f"), (3, "b"), (2, "f"), (2, "b")]

    wx_blocks, wh_blocks, b_blocks = [], [], []
    for g, d in order:
        rows = slice(g * H, (g + 1) * H)
        wx_blocks.append(wih[d][rows, :])                     # (12, 12)
        rec = whh[d][rows, :]                                 # (12, 12)
        zero = jnp.zeros_like(rec)
        if d == "f":
            wh_blocks.append(jnp.concatenate([rec, zero], axis=1))   # acts on h_f
        else:
            wh_blocks.append(jnp.concatenate([zero, rec], axis=1))   # acts on h_b
        b_blocks.append(bias[d][rows])

    w_x = jnp.concatenate(wx_blocks, axis=0)                  # (96, 12)
    w_h = jnp.concatenate(wh_blocks, axis=0)                  # (96, 24)
    w_packed = jnp.concatenate([w_x, w_h], axis=1).astype(jnp.float32)  # (96, 36)

    b_vec = jnp.concatenate(b_blocks, axis=0)                 # (96,)
    cw = params["conv_w"].reshape(2 * H)                      # (24,)
    cb = params["conv_b"].reshape(())

    aux = jnp.zeros((8 * H, 4), jnp.float32)
    aux = aux.at[:, 0].set(b_vec)
    aux = aux.at[:H, 1].set(cw[:H])                           # fwd conv weights
    aux = aux.at[H:2 * H, 2].set(cw[H:])                      # bwd conv weights
    aux = aux.at[0, 3].set(cb)                                # conv bias
    return w_packed, aux


@jax.jit
def decoder_forward(z, params):
    """z: (B, 12) float32 -> (B, 10, 1) float32 (matches PyTorch Decoder)."""
    B = z.shape[0]
    w_packed, aux = _pack_params(params)

    if B <= B_TILE_DEFAULT:
        b_tile = _round_up(max(B, 1), 128)
        b_pad = b_tile
    else:
        b_tile = B_TILE_DEFAULT
        b_pad = _round_up(B, b_tile)
    grid = (b_pad // b_tile,)

    # Transpose + zero-pad batch onto the lane axis.
    z_t = jnp.zeros((LATENT_DIM, b_pad), jnp.float32)
    z_t = z_t.at[:, :B].set(z.astype(jnp.float32).T)

    out_tb = pl.pallas_call(
        _decoder_kernel,
        out_shape=jax.ShapeDtypeStruct((T_STEPS, b_pad), jnp.float32),
        grid=grid,
        in_specs=[
            pl.BlockSpec((LATENT_DIM, b_tile), lambda i: (0, i)),
            pl.BlockSpec((8 * HIDDEN, LATENT_DIM + 2 * HIDDEN), lambda i: (0, 0)),
            pl.BlockSpec((8 * HIDDEN, 4), lambda i: (0, 0)),
        ],
        out_specs=pl.BlockSpec((T_STEPS, b_tile), lambda i: (0, i)),
        compiler_params=pltpu.CompilerParams(
            dimension_semantics=("parallel",)),
    )(z_t, w_packed, aux)

    # (T, B_pad) -> (B, 10, 1)
    return out_tb[:, :B].T[:, :, None]


def decoder_reference(z, params):
    """Pure-JAX reference replicating torch.nn.LSTM(bidirectional) + Conv1d(24,1,1)."""
    H, T = HIDDEN, T_STEPS

    def run(wih, whh, bih, bhh, xs):
        h = jnp.zeros((z.shape[0], H), jnp.float32)
        c = jnp.zeros_like(h)
        hs = []
        for t in range(xs.shape[1]):
            g = xs[:, t] @ wih.T + bih + h @ whh.T + bhh
            i = jax.nn.sigmoid(g[:, :H])
            f = jax.nn.sigmoid(g[:, H:2 * H])
            gg = jnp.tanh(g[:, 2 * H:3 * H])
            o = jax.nn.sigmoid(g[:, 3 * H:])
            c = f * c + i * gg
            h = o * jnp.tanh(c)
            hs.append(h)
        return jnp.stack(hs, axis=1)

    x = jnp.repeat(z[:, None, :], T, axis=1)                  # (B, 10, 12)
    hf = run(params["w_ih_f"], params["w_hh_f"], params["b_ih_f"], params["b_hh_f"], x)
    hb = run(params["w_ih_b"], params["w_hh_b"], params["b_ih_b"], params["b_hh_b"],
             x[:, ::-1])[:, ::-1]
    out = jnp.concatenate([hf, hb], axis=-1)                  # (B, 10, 24)
    y = jnp.einsum("btc,c->bt", out, params["conv_w"].reshape(-1)) + params["conv_b"][0]
    return y[:, :, None]


def init_params(key):
    """Deterministic parameter init matching the PyTorch module's shapes."""
    k = 1.0 / jnp.sqrt(jnp.float32(HIDDEN))
    keys = jax.random.split(key, 10)
    u = lambda kk, shape: jax.random.uniform(kk, shape, jnp.float32, -k, k)
    return {
        # forward-direction LSTM weights (PyTorch gate order i, f, g, o)
        "w_ih_f": u(keys[0], (4 * HIDDEN, LATENT_DIM)),
        "w_hh_f": u(keys[1], (4 * HIDDEN, HIDDEN)),
        "b_ih_f": u(keys[2], (4 * HIDDEN,)),
        "b_hh_f": u(keys[3], (4 * HIDDEN,)),
        # backward-direction LSTM weights
        "w_ih_b": u(keys[4], (4 * HIDDEN, LATENT_DIM)),
        "w_hh_b": u(keys[5], (4 * HIDDEN, HIDDEN)),
        "b_ih_b": u(keys[6], (4 * HIDDEN,)),
        "b_hh_b": u(keys[7], (4 * HIDDEN,)),
        # Conv1d(24, 1, kernel_size=1): weight (1, 24, 1), bias (1,)
        "conv_w": u(keys[8], (1, 2 * HIDDEN, 1)),
        "conv_b": u(keys[9], (1,)),
    }


if __name__ == "__main__":
    key = jax.random.PRNGKey(0)
    pkey, xkey = jax.random.split(key)
    params = init_params(pkey)

    # Small batch (single tile) and a larger batch exercising the 2-tile grid.
    for B in (2, 700):
        zB = jax.random.normal(jax.random.fold_in(xkey, B), (B, LATENT_DIM), jnp.float32)
        out = jax.block_until_ready(decoder_forward(zB, params))
        assert out.shape == (B, T_STEPS, 1), out.shape
        ref = decoder_reference(zB, params)
        err = float(jnp.max(jnp.abs(out - ref)))
        assert err < 1e-5, err

    print("KERNEL_OK")
</pallas_src>

<mosaic_0001>
module attributes {stable_mosaic.version = 11 : i64} {
  func.func @_decoder_kernel(%arg0: i32, %arg1: memref<12x128xf32, #tpu.memory_space<vmem>>, %arg2: memref<96x36xf32, #tpu.memory_space<vmem>>, %arg3: memref<96x4xf32, #tpu.memory_space<vmem>>, %arg4: memref<10x128xf32, #tpu.memory_space<vmem>>) attributes {dimension_semantics = [#tpu.dimension_semantics<parallel>], iteration_bounds = array<i64: 1>, scalar_prefetch = 0 : i64, scratch_operands = 0 : i64, tpu.core_type = #tpu.core_type<tc>, window_params = [{transform_indices = @transform_0, window_bounds = array<i64: 12, 128>}, {pipeline_mode = #tpu.pipeline_mode<synchronous>, transform_indices = @transform_1, window_bounds = array<i64: 96, 36>}, {pipeline_mode = #tpu.pipeline_mode<synchronous>, transform_indices = @transform_2, window_bounds = array<i64: 96, 4>}, {transform_indices = @transform_3, window_bounds = array<i64: 10, 128>}]} {
    %c0 = arith.constant 0 : index
    %c0_0 = arith.constant 0 : index
    %0 = vector.load %arg1[%c0, %c0_0] : memref<12x128xf32, #tpu.memory_space<vmem>>, vector<12x128xf32>
    %c0_1 = arith.constant 0 : index
    %c0_2 = arith.constant 0 : index
    %1 = vector.load %arg2[%c0_1, %c0_2] : memref<96x36xf32, #tpu.memory_space<vmem>>, vector<96x36xf32>
    %2 = vector.extract_strided_slice %1 {offsets = [0, 0], sizes = [96, 12], strides = [1, 1]} : vector<96x36xf32> to vector<96x12xf32>
    %3 = vector.extract_strided_slice %1 {offsets = [0, 12], sizes = [96, 24], strides = [1, 1]} : vector<96x36xf32> to vector<96x24xf32>
    %c0_3 = arith.constant 0 : index
    %c0_4 = arith.constant 0 : index
    %4 = vector.load %arg3[%c0_3, %c0_4] : memref<96x4xf32, #tpu.memory_space<vmem>>, vector<96x4xf32>
    %5 = vector.extract_strided_slice %4 {offsets = [0, 0], sizes = [96, 1], strides = [1, 1]} : vector<96x4xf32> to vector<96x1xf32>
    %6 = vector.extract_strided_slice %4 {offsets = [0, 1], sizes = [24, 1], strides = [1, 1]} : vector<96x4xf32> to vector<24x1xf32>
    %7 = vector.extract_strided_slice %4 {offsets = [0, 2], sizes = [24, 1], strides = [1, 1]} : vector<96x4xf32> to vector<24x1xf32>
    %8 = vector.extract_strided_slice %4 {offsets = [0, 3], sizes = [1, 1], strides = [1, 1]} : vector<96x4xf32> to vector<1x1xf32>
    %cst = arith.constant dense<0.000000e+00> : vector<96x128xf32>
    %9 = tpu.matmul %2, %0, %cst {dimension_numbers = #tpu.dot_dimension_numbers<[1], [0], [0], [1], [0, 0, 1, 1], [], []>} : vector<96x12xf32>, vector<12x128xf32>, vector<96x128xf32> -> vector<96x128xf32>
    %10 = vector.broadcast %5 : vector<96x1xf32> to vector<96x128xf32>
    %11 = arith.addf %9, %10 : vector<96x128xf32>
    %12 = vector.shape_cast %8 : vector<1x1xf32> to vector<1x1xf32>
    %13 = vector.broadcast %12 : vector<1x1xf32> to vector<10x128xf32>
    %c0_5 = arith.constant 0 : index
    %c0_6 = arith.constant 0 : index
    %14 = vector.load %arg4[%c0_5, %c0_6] : memref<10x128xf32, #tpu.memory_space<vmem>>, vector<10x128xf32>
    tpu.vector_store %arg4[%c0_5, %c0_6], %13 {strides = array<i32>} : memref<10x128xf32, #tpu.memory_space<vmem>>, vector<10x128xf32>,
    %cst_7 = arith.constant 0.000000e+00 : f32
    %15 = vector.broadcast %cst_7 : f32 to vector<24x128xf32>
    %cst_8 = arith.constant 0.000000e+00 : f32
    %16 = vector.broadcast %cst_8 : f32 to vector<24x128xf32>
    %cst_9 = arith.constant dense<0.000000e+00> : vector<96x128xf32>
    %17 = tpu.matmul %3, %15, %cst_9 {dimension_numbers = #tpu.dot_dimension_numbers<[1], [0], [0], [1], [0, 0, 1, 1], [], []>} : vector<96x24xf32>, vector<24x128xf32>, vector<96x128xf32> -> vector<96x128xf32>
    %18 = arith.addf %11, %17 : vector<96x128xf32>
    %19 = vector.extract_strided_slice %18 {offsets = [0, 0], sizes = [72, 128], strides = [1, 1]} : vector<96x128xf32> to vector<72x128xf32>
    %20 = arith.negf %19 : vector<72x128xf32>
    %21 = math.exp %20 : vector<72x128xf32>
    %cst_10 = arith.constant 1.000000e+00 : f32
    %22 = vector.broadcast %cst_10 : f32 to vector<72x128xf32>
    %23 = arith.addf %22, %21 : vector<72x128xf32>
    %24 = arith.divf %22, %23 : vector<72x128xf32>
    %25 = vector.extract_strided_slice %24 {offsets = [0, 0], sizes = [24, 128], strides = [1, 1]} : vector<72x128xf32> to vector<24x128xf32>
    %26 = vector.extract_strided_slice %24 {offsets = [24, 0], sizes = [24, 128], strides = [1, 1]} : vector<72x128xf32> to vector<24x128xf32>
    %27 = vector.extract_strided_slice %24 {offsets = [48, 0], sizes = [24, 128], strides = [1, 1]} : vector<72x128xf32> to vector<24x128xf32>
    %28 = vector.extract_strided_slice %18 {offsets = [72, 0], sizes = [24, 128], strides = [1, 1]} : vector<96x128xf32> to vector<24x128xf32>
    %29 = math.tanh %28 : vector<24x128xf32>
    %30 = arith.mulf %26, %16 : vector<24x128xf32>
    %31 = arith.mulf %25, %29 : vector<24x128xf32>
    %32 = arith.addf %30, %31 : vector<24x128xf32>
    %33 = math.tanh %32 : vector<24x128xf32>
    %34 = arith.mulf %27, %33 : vector<24x128xf32>
    %35 = vector.broadcast %6 : vector<24x1xf32> to vector<24x128xf32>
    %36 = arith.mulf %34, %35 : vector<24x128xf32>
    %cst_11 = arith.constant dense<0.000000e+00> : vector<128xf32>
    %37 = vector.multi_reduction <add>, %36, %cst_11 [0] : vector<24x128xf32> to vector<128xf32>
    %38 = vector.shape_cast %37 : vector<128xf32> to vector<1x128xf32>
    %39 = vector.broadcast %7 : vector<24x1xf32> to vector<24x128xf32>
    %40 = arith.mulf %34, %39 : vector<24x128xf32>
    %cst_12 = arith.constant dense<0.000000e+00> : vector<128xf32>
    %41 = vector.multi_reduction <add>, %40, %cst_12 [0] : vector<24x128xf32> to vector<128xf32>
    %42 = vector.shape_cast %41 : vector<128xf32> to vector<1x128xf32>
    %c0_13 = arith.constant 0 : index
    %c0_14 = arith.constant 0 : index
    %43 = vector.load %arg4[%c0_13, %c0_14] : memref<10x128xf32, #tpu.memory_space<vmem>>, vector<1x128xf32>
    %44 = arith.addf %43, %38 : vector<1x128xf32>
    %c0_15 = arith.constant 0 : index
    %c0_16 = arith.constant 0 : index
    %45 = vector.load %arg4[%c0_15, %c0_16] : memref<10x128xf32, #tpu.memory_space<vmem>>, vector<1x128xf32>
    tpu.vector_store %arg4[%c0_15, %c0_16], %44 {strides = array<i32>} : memref<10x128xf32, #tpu.memory_space<vmem>>, vector<1x128xf32>,
    %c9 = arith.constant 9 : index
    %c0_17 = arith.constant 0 : index
    %46 = vector.load %arg4[%c9, %c0_17] : memref<10x128xf32, #tpu.memory_space<vmem>>, vector<1x128xf32>
    %47 = arith.addf %46, %42 : vector<1x128xf32>
    %c9_18 = arith.constant 9 : index
    %c0_19 = arith.constant 0 : index
    %48 = vector.load %arg4[%c9_18, %c0_19] : memref<10x128xf32, #tpu.memory_space<vmem>>, vector<1x128xf32>
    tpu.vector_store %arg4[%c9_18, %c0_19], %47 {strides = array<i32>} : memref<10x128xf32, #tpu.memory_space<vmem>>, vector<1x128xf32>,
    %cst_20 = arith.constant dense<0.000000e+00> : vector<96x128xf32>
    %49 = tpu.matmul %3, %34, %cst_20 {dimension_numbers = #tpu.dot_dimension_numbers<[1], [0], [0], [1], [0, 0, 1, 1], [], []>} : vector<96x24xf32>, vector<24x128xf32>, vector<96x128xf32> -> vector<96x128xf32>
    %50 = arith.addf %11, %49 : vector<96x128xf32>
    %51 = vector.extract_strided_slice %50 {offsets = [0, 0], sizes = [72, 128], strides = [1, 1]} : vector<96x128xf32> to vector<72x128xf32>
    %52 = arith.negf %51 : vector<72x128xf32>
    %53 = math.exp %52 : vector<72x128xf32>
    %cst_21 = arith.constant 1.000000e+00 : f32
    %54 = vector.broadcast %cst_21 : f32 to vector<72x128xf32>
    %55 = arith.addf %54, %53 : vector<72x128xf32>
    %56 = arith.divf %54, %55 : vector<72x128xf32>
    %57 = vector.extract_strided_slice %56 {offsets = [0, 0], sizes = [24, 128], strides = [1, 1]} : vector<72x128xf32> to vector<24x128xf32>
    %58 = vector.extract_strided_slice %56 {offsets = [24, 0], sizes = [24, 128], strides = [1, 1]} : vector<72x128xf32> to vector<24x128xf32>
    %59 = vector.extract_strided_slice %56 {offsets = [48, 0], sizes = [24, 128], strides = [1, 1]} : vector<72x128xf32> to vector<24x128xf32>
    %60 = vector.extract_strided_slice %50 {offsets = [72, 0], sizes = [24, 128], strides = [1, 1]} : vector<96x128xf32> to vector<24x128xf32>
    %61 = math.tanh %60 : vector<24x128xf32>
    %62 = arith.mulf %58, %32 : vector<24x128xf32>
    %63 = arith.mulf %57, %61 : vector<24x128xf32>
    %64 = arith.addf %62, %63 : vector<24x128xf32>
    %65 = math.tanh %64 : vector<24x128xf32>
    %66 = arith.mulf %59, %65 : vector<24x128xf32>
    %67 = vector.broadcast %6 : vector<24x1xf32> to vector<24x128xf32>
    %68 = arith.mulf %66, %67 : vector<24x128xf32>
    %cst_22 = arith.constant dense<0.000000e+00> : vector<128xf32>
    %69 = vector.multi_reduction <add>, %68, %cst_22 [0] : vector<24x128xf32> to vector<128xf32>
    %70 = vector.shape_cast %69 : vector<128xf32> to vector<1x128xf32>
    %71 = vector.broadcast %7 : vector<24x1xf32> to vector<24x128xf32>
    %72 = arith.mulf %66, %71 : vector<24x128xf32>
    %cst_23 = arith.constant dense<0.000000e+00> : vector<128xf32>
    %73 = vector.multi_reduction <add>, %72, %cst_23 [0] : vector<24x128xf32> to vector<128xf32>
    %74 = vector.shape_cast %73 : vector<128xf32> to vector<1x128xf32>
    %c1 = arith.constant 1 : index
    %c0_24 = arith.constant 0 : index
    %75 = vector.load %arg4[%c1, %c0_24] : memref<10x128xf32, #tpu.memory_space<vmem>>, vector<1x128xf32>
    %76 = arith.addf %75, %70 : vector<1x128xf32>
    %c1_25 = arith.constant 1 : index
    %c0_26 = arith.constant 0 : index
    %77 = vector.load %arg4[%c1_25, %c0_26] : memref<10x128xf32, #tpu.memory_space<vmem>>, vector<1x128xf32>
    tpu.vector_store %arg4[%c1_25, %c0_26], %76 {strides = array<i32>} : memref<10x128xf32, #tpu.memory_space<vmem>>, vector<1x128xf32>,
    %c8 = arith.constant 8 : index
    %c0_27 = arith.constant 0 : index
    %78 = vector.load %arg4[%c8, %c0_27] : memref<10x128xf32, #tpu.memory_space<vmem>>, vector<1x128xf32>
    %79 = arith.addf %78, %74 : vector<1x128xf32>
    %c8_28 = arith.constant 8 : index
    %c0_29 = arith.constant 0 : index
    %80 = vector.load %arg4[%c8_28, %c0_29] : memref<10x128xf32, #tpu.memory_space<vmem>>, vector<1x128xf32>
    tpu.vector_store %arg4[%c8_28, %c0_29], %79 {strides = array<i32>} : memref<10x128xf32, #tpu.memory_space<vmem>>, vector<1x128xf32>,
    %cst_30 = arith.constant dense<0.000000e+00> : vector<96x128xf32>
    %81 = tpu.matmul %3, %66, %cst_30 {dimension_numbers = #tpu.dot_dimension_numbers<[1], [0], [0], [1], [0, 0, 1, 1], [], []>} : vector<96x24xf32>, vector<24x128xf32>, vector<96x128xf32> -> vector<96x128xf32>
    %82 = arith.addf %11, %81 : vector<96x128xf32>
    %83 = vector.extract_strided_slice %82 {offsets = [0, 0], sizes = [72, 128], strides = [1, 1]} : vector<96x128xf32> to vector<72x128xf32>
    %84 = arith.negf %83 : vector<72x128xf32>
    %85 = math.exp %84 : vector<72x128xf32>
    %cst_31 = arith.constant 1.000000e+00 : f32
    %86 = vector.broadcast %cst_31 : f32 to vector<72x128xf32>
    %87 = arith.addf %86, %85 : vector<72x128xf32>
    %88 = arith.divf %86, %87 : vector<72x128xf32>
    %89 = vector.extract_strided_slice %88 {offsets = [0, 0], sizes = [24, 128], strides = [1, 1]} : vector<72x128xf32> to vector<24x128xf32>
    %90 = vector.extract_strided_slice %88 {offsets = [24, 0], sizes = [24, 128], strides = [1, 1]} : vector<72x128xf32> to vector<24x128xf32>
    %91 = vector.extract_strided_slice %88 {offsets = [48, 0], sizes = [24, 128], strides = [1, 1]} : vector<72x128xf32> to vector<24x128xf32>
    %92 = vector.extract_strided_slice %82 {offsets = [72, 0], sizes = [24, 128], strides = [1, 1]} : vector<96x128xf32> to vector<24x128xf32>
    %93 = math.tanh %92 : vector<24x128xf32>
    %94 = arith.mulf %90, %64 : vector<24x128xf32>
    %95 = arith.mulf %89, %93 : vector<24x128xf32>
    %96 = arith.addf %94, %95 : vector<24x128xf32>
    %97 = math.tanh %96 : vector<24x128xf32>
    %98 = arith.mulf %91, %97 : vector<24x128xf32>
    %99 = vector.broadcast %6 : vector<24x1xf32> to vector<24x128xf32>
    %100 = arith.mulf %98, %99 : vector<24x128xf32>
    %cst_32 = arith.constant dense<0.000000e+00> : vector<128xf32>
    %101 = vector.multi_reduction <add>, %100, %cst_32 [0] : vector<24x128xf32> to vector<128xf32>
    %102 = vector.shape_cast %101 : vector<128xf32> to vector<1x128xf32>
    %103 = vector.broadcast %7 : vector<24x1xf32> to vector<24x128xf32>
    %104 = arith.mulf %98, %103 : vector<24x128xf32>
    %cst_33 = arith.constant dense<0.000000e+00> : vector<128xf32>
    %105 = vector.multi_reduction <add>, %104, %cst_33 [0] : vector<24x128xf32> to vector<128xf32>
    %106 = vector.shape_cast %105 : vector<128xf32> to vector<1x128xf32>
    %c2 = arith.constant 2 : index
    %c0_34 = arith.constant 0 : index
    %107 = vector.load %arg4[%c2, %c0_34] : memref<10x128xf32, #tpu.memory_space<vmem>>, vector<1x128xf32>
    %108 = arith.addf %107, %102 : vector<1x128xf32>
    %c2_35 = arith.constant 2 : index
    %c0_36 = arith.constant 0 : index
    %109 = vector.load %arg4[%c2_35, %c0_36] : memref<10x128xf32, #tpu.memory_space<vmem>>, vector<1x128xf32>
    tpu.vector_store %arg4[%c2_35, %c0_36], %108 {strides = array<i32>} : memref<10x128xf32, #tpu.memory_space<vmem>>, vector<1x128xf32>,
    %c7 = arith.constant 7 : index
    %c0_37 = arith.constant 0 : index
    %110 = vector.load %arg4[%c7, %c0_37] : memref<10x128xf32, #tpu.memory_space<vmem>>, vector<1x128xf32>
    %111 = arith.addf %110, %106 : vector<1x128xf32>
    %c7_38 = arith.constant 7 : index
    %c0_39 = arith.constant 0 : index
    %112 = vector.load %arg4[%c7_38, %c0_39] : memref<10x128xf32, #tpu.memory_space<vmem>>, vector<1x128xf32>
    tpu.vector_store %arg4[%c7_38, %c0_39], %111 {strides = array<i32>} : memref<10x128xf32, #tpu.memory_space<vmem>>, vector<1x128xf32>,
    %cst_40 = arith.constant dense<0.000000e+00> : vector<96x128xf32>
    %113 = tpu.matmul %3, %98, %cst_40 {dimension_numbers = #tpu.dot_dimension_numbers<[1], [0], [0], [1], [0, 0, 1, 1], [], []>} : vector<96x24xf32>, vector<24x128xf32>, vector<96x128xf32> -> vector<96x128xf32>
    %114 = arith.addf %11, %113 : vector<96x128xf32>
    %115 = vector.extract_strided_slice %114 {offsets = [0, 0], sizes = [72, 128], strides = [1, 1]} : vector<96x128xf32> to vector<72x128xf32>
    %116 = arith.negf %115 : vector<72x128xf32>
    %117 = math.exp %116 : vector<72x128xf32>
    %cst_41 = arith.constant 1.000000e+00 : f32
    %118 = vector.broadcast %cst_41 : f32 to vector<72x128xf32>
    %119 = arith.addf %118, %117 : vector<72x128xf32>
    %120 = arith.divf %118, %119 : vector<72x128xf32>
    %121 = vector.extract_strided_slice %120 {offsets = [0, 0], sizes = [24, 128], strides = [1, 1]} : vector<72x128xf32> to vector<24x128xf32>
    %122 = vector.extract_strided_slice %120 {offsets = [24, 0], sizes = [24, 128], strides = [1, 1]} : vector<72x128xf32> to vector<24x128xf32>
    %123 = vector.extract_strided_slice %120 {offsets = [48, 0], sizes = [24, 128], strides = [1, 1]} : vector<72x128xf32> to vector<24x128xf32>
    %124 = vector.extract_strided_slice %114 {offsets = [72, 0], sizes = [24, 128], strides = [1, 1]} : vector<96x128xf32> to vector<24x128xf32>
    %125 = math.tanh %124 : vector<24x128xf32>
    %126 = arith.mulf %122, %96 : vector<24x128xf32>
    %127 = arith.mulf %121, %125 : vector<24x128xf32>
    %128 = arith.addf %126, %127 : vector<24x128xf32>
    %129 = math.tanh %128 : vector<24x128xf32>
    %130 = arith.mulf %123, %129 : vector<24x128xf32>
    %131 = vector.broadcast %6 : vector<24x1xf32> to vector<24x128xf32>
    %132 = arith.mulf %130, %131 : vector<24x128xf32>
    %cst_42 = arith.constant dense<0.000000e+00> : vector<128xf32>
    %133 = vector.multi_reduction <add>, %132, %cst_42 [0] : vector<24x128xf32> to vector<128xf32>
    %134 = vector.shape_cast %133 : vector<128xf32> to vector<1x128xf32>
    %135 = vector.broadcast %7 : vector<24x1xf32> to vector<24x128xf32>
    %136 = arith.mulf %130, %135 : vector<24x128xf32>
    %cst_43 = arith.constant dense<0.000000e+00> : vector<128xf32>
    %137 = vector.multi_reduction <add>, %136, %cst_43 [0] : vector<24x128xf32> to vector<128xf32>
    %138 = vector.shape_cast %137 : vector<128xf32> to vector<1x128xf32>
    %c3 = arith.constant 3 : index
    %c0_44 = arith.constant 0 : index
    %139 = vector.load %arg4[%c3, %c0_44] : memref<10x128xf32, #tpu.memory_space<vmem>>, vector<1x128xf32>
    %140 = arith.addf %139, %134 : vector<1x128xf32>
    %c3_45 = arith.constant 3 : index
    %c0_46 = arith.constant 0 : index
    %141 = vector.load %arg4[%c3_45, %c0_46] : memref<10x128xf32, #tpu.memory_space<vmem>>, vector<1x128xf32>
    tpu.vector_store %arg4[%c3_45, %c0_46], %140 {strides = array<i32>} : memref<10x128xf32, #tpu.memory_space<vmem>>, vector<1x128xf32>,
    %c6 = arith.constant 6 : index
    %c0_47 = arith.constant 0 : index
    %142 = vector.load %arg4[%c6, %c0_47] : memref<10x128xf32, #tpu.memory_space<vmem>>, vector<1x128xf32>
    %143 = arith.addf %142, %138 : vector<1x128xf32>
    %c6_48 = arith.constant 6 : index
    %c0_49 = arith.constant 0 : index
    %144 = vector.load %arg4[%c6_48, %c0_49] : memref<10x128xf32, #tpu.memory_space<vmem>>, vector<1x128xf32>
    tpu.vector_store %arg4[%c6_48, %c0_49], %143 {strides = array<i32>} : memref<10x128xf32, #tpu.memory_space<vmem>>, vector<1x128xf32>,
    %cst_50 = arith.constant dense<0.000000e+00> : vector<96x128xf32>
    %145 = tpu.matmul %3, %130, %cst_50 {dimension_numbers = #tpu.dot_dimension_numbers<[1], [0], [0], [1], [0, 0, 1, 1], [], []>} : vector<96x24xf32>, vector<24x128xf32>, vector<96x128xf32> -> vector<96x128xf32>
    %146 = arith.addf %11, %145 : vector<96x128xf32>
    %147 = vector.extract_strided_slice %146 {offsets = [0, 0], sizes = [72, 128], strides = [1, 1]} : vector<96x128xf32> to vector<72x128xf32>
    %148 = arith.negf %147 : vector<72x128xf32>
    %149 = math.exp %148 : vector<72x128xf32>
    %cst_51 = arith.constant 1.000000e+00 : f32
    %150 = vector.broadcast %cst_51 : f32 to vector<72x128xf32>
    %151 = arith.addf %150, %149 : vector<72x128xf32>
    %152 = arith.divf %150, %151 : vector<72x128xf32>
    %153 = vector.extract_strided_slice %152 {offsets = [0, 0], sizes = [24, 128], strides = [1, 1]} : vector<72x128xf32> to vector<24x128xf32>
    %154 = vector.extract_strided_slice %152 {offsets = [24, 0], sizes = [24, 128], strides = [1, 1]} : vector<72x128xf32> to vector<24x128xf32>
    %155 = vector.extract_strided_slice %152 {offsets = [48, 0], sizes = [24, 128], strides = [1, 1]} : vector<72x128xf32> to vector<24x128xf32>
    %156 = vector.extract_strided_slice %146 {offsets = [72, 0], sizes = [24, 128], strides = [1, 1]} : vector<96x128xf32> to vector<24x128xf32>
    %157 = math.tanh %156 : vector<24x128xf32>
    %158 = arith.mulf %154, %128 : vector<24x128xf32>
    %159 = arith.mulf %153, %157 : vector<24x128xf32>
    %160 = arith.addf %158, %159 : vector<24x128xf32>
    %161 = math.tanh %160 : vector<24x128xf32>
    %162 = arith.mulf %155, %161 : vector<24x128xf32>
    %163 = vector.broadcast %6 : vector<24x1xf32> to vector<24x128xf32>
    %164 = arith.mulf %162, %163 : vector<24x128xf32>
    %cst_52 = arith.constant dense<0.000000e+00> : vector<128xf32>
    %165 = vector.multi_reduction <add>, %164, %cst_52 [0] : vector<24x128xf32> to vector<128xf32>
    %166 = vector.shape_cast %165 : vector<128xf32> to vector<1x128xf32>
    %167 = vector.broadcast %7 : vector<24x1xf32> to vector<24x128xf32>
    %168 = arith.mulf %162, %167 : vector<24x128xf32>
    %cst_53 = arith.constant dense<0.000000e+00> : vector<128xf32>
    %169 = vector.multi_reduction <add>, %168, %cst_53 [0] : vector<24x128xf32> to vector<128xf32>
    %170 = vector.shape_cast %169 : vector<128xf32> to vector<1x128xf32>
    %c4 = arith.constant 4 : index
    %c0_54 = arith.constant 0 : index
    %171 = vector.load %arg4[%c4, %c0_54] : memref<10x128xf32, #tpu.memory_space<vmem>>, vector<1x128xf32>
    %172 = arith.addf %171, %166 : vector<1x128xf32>
    %c4_55 = arith.constant 4 : index
    %c0_56 = arith.constant 0 : index
    %173 = vector.load %arg4[%c4_55, %c0_56] : memref<10x128xf32, #tpu.memory_space<vmem>>, vector<1x128xf32>
    tpu.vector_store %arg4[%c4_55, %c0_56], %172 {strides = array<i32>} : memref<10x128xf32, #tpu.memory_space<vmem>>, vector<1x128xf32>,
    %c5 = arith.constant 5 : index
    %c0_57 = arith.constant 0 : index
    %174 = vector.load %arg4[%c5, %c0_57] : memref<10x128xf32, #tpu.memory_space<vmem>>, vector<1x128xf32>
    %175 = arith.addf %174, %170 : vector<1x128xf32>
    %c5_58 = arith.constant 5 : index
    %c0_59 = arith.constant 0 : index
    %176 = vector.load %arg4[%c5_58, %c0_59] : memref<10x128xf32, #tpu.memory_space<vmem>>, vector<1x128xf32>
    tpu.vector_store %arg4[%c5_58, %c0_59], %175 {strides = array<i32>} : memref<10x128xf32, #tpu.memory_space<vmem>>, vector<1x128xf32>,
    %cst_60 = arith.constant dense<0.000000e+00> : vector<96x128xf32>
    %177 = tpu.matmul %3, %162, %cst_60 {dimension_numbers = #tpu.dot_dimension_numbers<[1], [0], [0], [1], [0, 0, 1, 1], [], []>} : vector<96x24xf32>, vector<24x128xf32>, vector<96x128xf32> -> vector<96x128xf32>
    %178 = arith.addf %11, %177 : vector<96x128xf32>
    %179 = vector.extract_strided_slice %178 {offsets = [0, 0], sizes = [72, 128], strides = [1, 1]} : vector<96x128xf32> to vector<72x128xf32>
    %180 = arith.negf %179 : vector<72x128xf32>
    %181 = math.exp %180 : vector<72x128xf32>
    %cst_61 = arith.constant 1.000000e+00 : f32
    %182 = vector.broadcast %cst_61 : f32 to vector<72x128xf32>
    %183 = arith.addf %182, %181 : vector<72x128xf32>
    %184 = arith.divf %182, %183 : vector<72x128xf32>
    %185 = vector.extract_strided_slice %184 {offsets = [0, 0], sizes = [24, 128], strides = [1, 1]} : vector<72x128xf32> to vector<24x128xf32>
    %186 = vector.extract_strided_slice %184 {offsets = [24, 0], sizes = [24, 128], strides = [1, 1]} : vector<72x128xf32> to vector<24x128xf32>
    %187 = vector.extract_strided_slice %184 {offsets = [48, 0], sizes = [24, 128], strides = [1, 1]} : vector<72x128xf32> to vector<24x128xf32>
    %188 = vector.extract_strided_slice %178 {offsets = [72, 0], sizes = [24, 128], strides = [1, 1]} : vector<96x128xf32> to vector<24x128xf32>
    %189 = math.tanh %188 : vector<24x128xf32>
    %190 = arith.mulf %186, %160 : vector<24x128xf32>
    %191 = arith.mulf %185, %189 : vector<24x128xf32>
    %192 = arith.addf %190, %191 : vector<24x128xf32>
    %193 = math.tanh %192 : vector<24x128xf32>
    %194 = arith.mulf %187, %193 : vector<24x128xf32>
    %195 = vector.broadcast %6 : vector<24x1xf32> to vector<24x128xf32>
    %196 = arith.mulf %194, %195 : vector<24x128xf32>
    %cst_62 = arith.constant dense<0.000000e+00> : vector<128xf32>
    %197 = vector.multi_reduction <add>, %196, %cst_62 [0] : vector<24x128xf32> to vector<128xf32>
    %198 = vector.shape_cast %197 : vector<128xf32> to vector<1x128xf32>
    %199 = vector.broadcast %7 : vector<24x1xf32> to vector<24x128xf32>
    %200 = arith.mulf %194, %199 : vector<24x128xf32>
    %cst_63 = arith.constant dense<0.000000e+00> : vector<128xf32>
    %201 = vector.multi_reduction <add>, %200, %cst_63 [0] : vector<24x128xf32> to vector<128xf32>
    %202 = vector.shape_cast %201 : vector<128xf32> to vector<1x128xf32>
    %c5_64 = arith.constant 5 : index
    %c0_65 = arith.constant 0 : index
    %203 = vector.load %arg4[%c5_64, %c0_65] : memref<10x128xf32, #tpu.memory_space<vmem>>, vector<1x128xf32>
    %204 = arith.addf %203, %198 : vector<1x128xf32>
    %c5_66 = arith.constant 5 : index
    %c0_67 = arith.constant 0 : index
    %205 = vector.load %arg4[%c5_66, %c0_67] : memref<10x128xf32, #tpu.memory_space<vmem>>, vector<1x128xf32>
    tpu.vector_store %arg4[%c5_66, %c0_67], %204 {strides = array<i32>} : memref<10x128xf32, #tpu.memory_space<vmem>>, vector<1x128xf32>,
    %c4_68 = arith.constant 4 : index
    %c0_69 = arith.constant 0 : index
    %206 = vector.load %arg4[%c4_68, %c0_69] : memref<10x128xf32, #tpu.memory_space<vmem>>, vector<1x128xf32>
    %207 = arith.addf %206, %202 : vector<1x128xf32>
    %c4_70 = arith.constant 4 : index
    %c0_71 = arith.constant 0 : index
    %208 = vector.load %arg4[%c4_70, %c0_71] : memref<10x128xf32, #tpu.memory_space<vmem>>, vector<1x128xf32>
    tpu.vector_store %arg4[%c4_70, %c0_71], %207 {strides = array<i32>} : memref<10x128xf32, #tpu.memory_space<vmem>>, vector<1x128xf32>,
    %cst_72 = arith.constant dense<0.000000e+00> : vector<96x128xf32>
    %209 = tpu.matmul %3, %194, %cst_72 {dimension_numbers = #tpu.dot_dimension_numbers<[1], [0], [0], [1], [0, 0, 1, 1], [], []>} : vector<96x24xf32>, vector<24x128xf32>, vector<96x128xf32> -> vector<96x128xf32>
    %210 = arith.addf %11, %209 : vector<96x128xf32>
    %211 = vector.extract_strided_slice %210 {offsets = [0, 0], sizes = [72, 128], strides = [1, 1]} : vector<96x128xf32> to vector<72x128xf32>
    %212 = arith.negf %211 : vector<72x128xf32>
    %213 = math.exp %212 : vector<72x128xf32>
    %cst_73 = arith.constant 1.000000e+00 : f32
    %214 = vector.broadcast %cst_73 : f32 to vector<72x128xf32>
    %215 = arith.addf %214, %213 : vector<72x128xf32>
    %216 = arith.divf %214, %215 : vector<72x128xf32>
    %217 = vector.extract_strided_slice %216 {offsets = [0, 0], sizes = [24, 128], strides = [1, 1]} : vector<72x128xf32> to vector<24x128xf32>
    %218 = vector.extract_strided_slice %216 {offsets = [24, 0], sizes = [24, 128], strides = [1, 1]} : vector<72x128xf32> to vector<24x128xf32>
    %219 = vector.extract_strided_slice %216 {offsets = [48, 0], sizes = [24, 128], strides = [1, 1]} : vector<72x128xf32> to vector<24x128xf32>
    %220 = vector.extract_strided_slice %210 {offsets = [72, 0], sizes = [24, 128], strides = [1, 1]} : vector<96x128xf32> to vector<24x128xf32>
    %221 = math.tanh %220 : vector<24x128xf32>
    %222 = arith.mulf %218, %192 : vector<24x128xf32>
    %223 = arith.mulf %217, %221 : vector<24x128xf32>
    %224 = arith.addf %222, %223 : vector<24x128xf32>
    %225 = math.tanh %224 : vector<24x128xf32>
    %226 = arith.mulf %219, %225 : vector<24x128xf32>
    %227 = vector.broadcast %6 : vector<24x1xf32> to vector<24x128xf32>
    %228 = arith.mulf %226, %227 : vector<24x128xf32>
    %cst_74 = arith.constant dense<0.000000e+00> : vector<128xf32>
    %229 = vector.multi_reduction <add>, %228, %cst_74 [0] : vector<24x128xf32> to vector<128xf32>
    %230 = vector.shape_cast %229 : vector<128xf32> to vector<1x128xf32>
    %231 = vector.broadcast %7 : vector<24x1xf32> to vector<24x128xf32>
    %232 = arith.mulf %226, %231 : vector<24x128xf32>
    %cst_75 = arith.constant dense<0.000000e+00> : vector<128xf32>
    %233 = vector.multi_reduction <add>, %232, %cst_75 [0] : vector<24x128xf32> to vector<128xf32>
    %234 = vector.shape_cast %233 : vector<128xf32> to vector<1x128xf32>
    %c6_76 = arith.constant 6 : index
    %c0_77 = arith.constant 0 : index
    %235 = vector.load %arg4[%c6_76, %c0_77] : memref<10x128xf32, #tpu.memory_space<vmem>>, vector<1x128xf32>
    %236 = arith.addf %235, %230 : vector<1x128xf32>
    %c6_78 = arith.constant 6 : index
    %c0_79 = arith.constant 0 : index
    %237 = vector.load %arg4[%c6_78, %c0_79] : memref<10x128xf32, #tpu.memory_space<vmem>>, vector<1x128xf32>
    tpu.vector_store %arg4[%c6_78, %c0_79], %236 {strides = array<i32>} : memref<10x128xf32, #tpu.memory_space<vmem>>, vector<1x128xf32>,
    %c3_80 = arith.constant 3 : index
    %c0_81 = arith.constant 0 : index
    %238 = vector.load %arg4[%c3_80, %c0_81] : memref<10x128xf32, #tpu.memory_space<vmem>>, vector<1x128xf32>
    %239 = arith.addf %238, %234 : vector<1x128xf32>
    %c3_82 = arith.constant 3 : index
    %c0_83 = arith.constant 0 : index
    %240 = vector.load %arg4[%c3_82, %c0_83] : memref<10x128xf32, #tpu.memory_space<vmem>>, vector<1x128xf32>
    tpu.vector_store %arg4[%c3_82, %c0_83], %239 {strides = array<i32>} : memref<10x128xf32, #tpu.memory_space<vmem>>, vector<1x128xf32>,
    %cst_84 = arith.constant dense<0.000000e+00> : vector<96x128xf32>
    %241 = tpu.matmul %3, %226, %cst_84 {dimension_numbers = #tpu.dot_dimension_numbers<[1], [0], [0], [1], [0, 0, 1, 1], [], []>} : vector<96x24xf32>, vector<24x128xf32>, vector<96x128xf32> -> vector<96x128xf32>
    %242 = arith.addf %11, %241 : vector<96x128xf32>
    %243 = vector.extract_strided_slice %242 {offsets = [0, 0], sizes = [72, 128], strides = [1, 1]} : vector<96x128xf32> to vector<72x128xf32>
    %244 = arith.negf %243 : vector<72x128xf32>
    %245 = math.exp %244 : vector<72x128xf32>
    %cst_85 = arith.constant 1.000000e+00 : f32
    %246 = vector.broadcast %cst_85 : f32 to vector<72x128xf32>
    %247 = arith.addf %246, %245 : vector<72x128xf32>
    %248 = arith.divf %246, %247 : vector<72x128xf32>
    %249 = vector.extract_strided_slice %248 {offsets = [0, 0], sizes = [24, 128], strides = [1, 1]} : vector<72x128xf32> to vector<24x128xf32>
    %250 = vector.extract_strided_slice %248 {offsets = [24, 0], sizes = [24, 128], strides = [1, 1]} : vector<72x128xf32> to vector<24x128xf32>
    %251 = vector.extract_strided_slice %248 {offsets = [48, 0], sizes = [24, 128], strides = [1, 1]} : vector<72x128xf32> to vector<24x128xf32>
    %252 = vector.extract_strided_slice %242 {offsets = [72, 0], sizes = [24, 128], strides = [1, 1]} : vector<96x128xf32> to vector<24x128xf32>
    %253 = math.tanh %252 : vector<24x128xf32>
    %254 = arith.mulf %250, %224 : vector<24x128xf32>
    %255 = arith.mulf %249, %253 : vector<24x128xf32>
    %256 = arith.addf %254, %255 : vector<24x128xf32>
    %257 = math.tanh %256 : vector<24x128xf32>
    %258 = arith.mulf %251, %257 : vector<24x128xf32>
    %259 = vector.broadcast %6 : vector<24x1xf32> to vector<24x128xf32>
    %260 = arith.mulf %258, %259 : vector<24x128xf32>
    %cst_86 = arith.constant dense<0.000000e+00> : vector<128xf32>
    %261 = vector.multi_reduction <add>, %260, %cst_86 [0] : vector<24x128xf32> to vector<128xf32>
    %262 = vector.shape_cast %261 : vector<128xf32> to vector<1x128xf32>
    %263 = vector.broadcast %7 : vector<24x1xf32> to vector<24x128xf32>
    %264 = arith.mulf %258, %263 : vector<24x128xf32>
    %cst_87 = arith.constant dense<0.000000e+00> : vector<128xf32>
    %265 = vector.multi_reduction <add>, %264, %cst_87 [0] : vector<24x128xf32> to vector<128xf32>
    %266 = vector.shape_cast %265 : vector<128xf32> to vector<1x128xf32>
    %c7_88 = arith.constant 7 : index
    %c0_89 = arith.constant 0 : index
    %267 = vector.load %arg4[%c7_88, %c0_89] : memref<10x128xf32, #tpu.memory_space<vmem>>, vector<1x128xf32>
    %268 = arith.addf %267, %262 : vector<1x128xf32>
    %c7_90 = arith.constant 7 : index
    %c0_91 = arith.constant 0 : index
    %269 = vector.load %arg4[%c7_90, %c0_91] : memref<10x128xf32, #tpu.memory_space<vmem>>, vector<1x128xf32>
    tpu.vector_store %arg4[%c7_90, %c0_91], %268 {strides = array<i32>} : memref<10x128xf32, #tpu.memory_space<vmem>>, vector<1x128xf32>,
    %c2_92 = arith.constant 2 : index
    %c0_93 = arith.constant 0 : index
    %270 = vector.load %arg4[%c2_92, %c0_93] : memref<10x128xf32, #tpu.memory_space<vmem>>, vector<1x128xf32>
    %271 = arith.addf %270, %266 : vector<1x128xf32>
    %c2_94 = arith.constant 2 : index
    %c0_95 = arith.constant 0 : index
    %272 = vector.load %arg4[%c2_94, %c0_95] : memref<10x128xf32, #tpu.memory_space<vmem>>, vector<1x128xf32>
    tpu.vector_store %arg4[%c2_94, %c0_95], %271 {strides = array<i32>} : memref<10x128xf32, #tpu.memory_space<vmem>>, vector<1x128xf32>,
    %cst_96 = arith.constant dense<0.000000e+00> : vector<96x128xf32>
    %273 = tpu.matmul %3, %258, %cst_96 {dimension_numbers = #tpu.dot_dimension_numbers<[1], [0], [0], [1], [0, 0, 1, 1], [], []>} : vector<96x24xf32>, vector<24x128xf32>, vector<96x128xf32> -> vector<96x128xf32>
    %274 = arith.addf %11, %273 : vector<96x128xf32>
    %275 = vector.extract_strided_slice %274 {offsets = [0, 0], sizes = [72, 128], strides = [1, 1]} : vector<96x128xf32> to vector<72x128xf32>
    %276 = arith.negf %275 : vector<72x128xf32>
    %277 = math.exp %276 : vector<72x128xf32>
    %cst_97 = arith.constant 1.000000e+00 : f32
    %278 = vector.broadcast %cst_97 : f32 to vector<72x128xf32>
    %279 = arith.addf %278, %277 : vector<72x128xf32>
    %280 = arith.divf %278, %279 : vector<72x128xf32>
    %281 = vector.extract_strided_slice %280 {offsets = [0, 0], sizes = [24, 128], strides = [1, 1]} : vector<72x128xf32> to vector<24x128xf32>
    %282 = vector.extract_strided_slice %280 {offsets = [24, 0], sizes = [24, 128], strides = [1, 1]} : vector<72x128xf32> to vector<24x128xf32>
    %283 = vector.extract_strided_slice %280 {offsets = [48, 0], sizes = [24, 128], strides = [1, 1]} : vector<72x128xf32> to vector<24x128xf32>
    %284 = vector.extract_strided_slice %274 {offsets = [72, 0], sizes = [24, 128], strides = [1, 1]} : vector<96x128xf32> to vector<24x128xf32>
    %285 = math.tanh %284 : vector<24x128xf32>
    %286 = arith.mulf %282, %256 : vector<24x128xf32>
    %287 = arith.mulf %281, %285 : vector<24x128xf32>
    %288 = arith.addf %286, %287 : vector<24x128xf32>
    %289 = math.tanh %288 : vector<24x128xf32>
    %290 = arith.mulf %283, %289 : vector<24x128xf32>
    %291 = vector.broadcast %6 : vector<24x1xf32> to vector<24x128xf32>
    %292 = arith.mulf %290, %291 : vector<24x128xf32>
    %cst_98 = arith.constant dense<0.000000e+00> : vector<128xf32>
    %293 = vector.multi_reduction <add>, %292, %cst_98 [0] : vector<24x128xf32> to vector<128xf32>
    %294 = vector.shape_cast %293 : vector<128xf32> to vector<1x128xf32>
    %295 = vector.broadcast %7 : vector<24x1xf32> to vector<24x128xf32>
    %296 = arith.mulf %290, %295 : vector<24x128xf32>
    %cst_99 = arith.constant dense<0.000000e+00> : vector<128xf32>
    %297 = vector.multi_reduction <add>, %296, %cst_99 [0] : vector<24x128xf32> to vector<128xf32>
    %298 = vector.shape_cast %297 : vector<128xf32> to vector<1x128xf32>
    %c8_100 = arith.constant 8 : index
    %c0_101 = arith.constant 0 : index
    %299 = vector.load %arg4[%c8_100, %c0_101] : memref<10x128xf32, #tpu.memory_space<vmem>>, vector<1x128xf32>
    %300 = arith.addf %299, %294 : vector<1x128xf32>
    %c8_102 = arith.constant 8 : index
    %c0_103 = arith.constant 0 : index
    %301 = vector.load %arg4[%c8_102, %c0_103] : memref<10x128xf32, #tpu.memory_space<vmem>>, vector<1x128xf32>
    tpu.vector_store %arg4[%c8_102, %c0_103], %300 {strides = array<i32>} : memref<10x128xf32, #tpu.memory_space<vmem>>, vector<1x128xf32>,
    %c1_104 = arith.constant 1 : index
    %c0_105 = arith.constant 0 : index
    %302 = vector.load %arg4[%c1_104, %c0_105] : memref<10x128xf32, #tpu.memory_space<vmem>>, vector<1x128xf32>
    %303 = arith.addf %302, %298 : vector<1x128xf32>
    %c1_106 = arith.constant 1 : index
    %c0_107 = arith.constant 0 : index
    %304 = vector.load %arg4[%c1_106, %c0_107] : memref<10x128xf32, #tpu.memory_space<vmem>>, vector<1x128xf32>
    tpu.vector_store %arg4[%c1_106, %c0_107], %303 {strides = array<i32>} : memref<10x128xf32, #tpu.memory_space<vmem>>, vector<1x128xf32>,
    %cst_108 = arith.constant dense<0.000000e+00> : vector<96x128xf32>
    %305 = tpu.matmul %3, %290, %cst_108 {dimension_numbers = #tpu.dot_dimension_numbers<[1], [0], [0], [1], [0, 0, 1, 1], [], []>} : vector<96x24xf32>, vector<24x128xf32>, vector<96x128xf32> -> vector<96x128xf32>
    %306 = arith.addf %11, %305 : vector<96x128xf32>
    %307 = vector.extract_strided_slice %306 {offsets = [0, 0], sizes = [72, 128], strides = [1, 1]} : vector<96x128xf32> to vector<72x128xf32>
    %308 = arith.negf %307 : vector<72x128xf32>
    %309 = math.exp %308 : vector<72x128xf32>
    %cst_109 = arith.constant 1.000000e+00 : f32
    %310 = vector.broadcast %cst_109 : f32 to vector<72x128xf32>
    %311 = arith.addf %310, %309 : vector<72x128xf32>
    %312 = arith.divf %310, %311 : vector<72x128xf32>
    %313 = vector.extract_strided_slice %312 {offsets = [0, 0], sizes = [24, 128], strides = [1, 1]} : vector<72x128xf32> to vector<24x128xf32>
    %314 = vector.extract_strided_slice %312 {offsets = [24, 0], sizes = [24, 128], strides = [1, 1]} : vector<72x128xf32> to vector<24x128xf32>
    %315 = vector.extract_strided_slice %312 {offsets = [48, 0], sizes = [24, 128], strides = [1, 1]} : vector<72x128xf32> to vector<24x128xf32>
    %316 = vector.extract_strided_slice %306 {offsets = [72, 0], sizes = [24, 128], strides = [1, 1]} : vector<96x128xf32> to vector<24x128xf32>
    %317 = math.tanh %316 : vector<24x128xf32>
    %318 = arith.mulf %314, %288 : vector<24x128xf32>
    %319 = arith.mulf %313, %317 : vector<24x128xf32>
    %320 = arith.addf %318, %319 : vector<24x128xf32>
    %321 = math.tanh %320 : vector<24x128xf32>
    %322 = arith.mulf %315, %321 : vector<24x128xf32>
    %323 = vector.broadcast %6 : vector<24x1xf32> to vector<24x128xf32>
    %324 = arith.mulf %322, %323 : vector<24x128xf32>
    %cst_110 = arith.constant dense<0.000000e+00> : vector<128xf32>
    %325 = vector.multi_reduction <add>, %324, %cst_110 [0] : vector<24x128xf32> to vector<128xf32>
    %326 = vector.shape_cast %325 : vector<128xf32> to vector<1x128xf32>
    %327 = vector.broadcast %7 : vector<24x1xf32> to vector<24x128xf32>
    %328 = arith.mulf %322, %327 : vector<24x128xf32>
    %cst_111 = arith.constant dense<0.000000e+00> : vector<128xf32>
    %329 = vector.multi_reduction <add>, %328, %cst_111 [0] : vector<24x128xf32> to vector<128xf32>
    %330 = vector.shape_cast %329 : vector<128xf32> to vector<1x128xf32>
    %c9_112 = arith.constant 9 : index
    %c0_113 = arith.constant 0 : index
    %331 = vector.load %arg4[%c9_112, %c0_113] : memref<10x128xf32, #tpu.memory_space<vmem>>, vector<1x128xf32>
    %332 = arith.addf %331, %326 : vector<1x128xf32>
    %c9_114 = arith.constant 9 : index
    %c0_115 = arith.constant 0 : index
    %333 = vector.load %arg4[%c9_114, %c0_115] : memref<10x128xf32, #tpu.memory_space<vmem>>, vector<1x128xf32>
    tpu.vector_store %arg4[%c9_114, %c0_115], %332 {strides = array<i32>} : memref<10x128xf32, #tpu.memory_space<vmem>>, vector<1x128xf32>,
    %c0_116 = arith.constant 0 : index
    %c0_117 = arith.constant 0 : index
    %334 = vector.load %arg4[%c0_116, %c0_117] : memref<10x128xf32, #tpu.memory_space<vmem>>, vector<1x128xf32>
    %335 = arith.addf %334, %330 : vector<1x128xf32>
    %c0_118 = arith.constant 0 : index
    %c0_119 = arith.constant 0 : index
    %336 = vector.load %arg4[%c0_118, %c0_119] : memref<10x128xf32, #tpu.memory_space<vmem>>, vector<1x128xf32>
    tpu.vector_store %arg4[%c0_118, %c0_119], %335 {strides = array<i32>} : memref<10x128xf32, #tpu.memory_space<vmem>>, vector<1x128xf32>,
    return
  }
  func.func @transform_0(%arg0: i32) -> (i32, i32) {
    %c0_i32 = arith.constant 0 : i32
    %c0_i32_0 = arith.constant 0 : i32
    return %c0_i32, %arg0 : i32, i32
  }
  func.func @transform_1(%arg0: i32) -> (i32, i32) {
    %c0_i32 = arith.constant 0 : i32
    %c0_i32_0 = arith.constant 0 : i32
    %c0_i32_1 = arith.constant 0 : i32
    return %c0_i32, %c0_i32_0 : i32, i32
  }
  func.func @transform_2(%arg0: i32) -> (i32, i32) {
    %c0_i32 = arith.constant 0 : i32
    %c0_i32_0 = arith.constant 0 : i32
    %c0_i32_1 = arith.constant 0 : i32
    return %c0_i32, %c0_i32_0 : i32, i32
  }
  func.func @transform_3(%arg0: i32) -> (i32, i32) {
    %c0_i32 = arith.constant 0 : i32
    %c0_i32_0 = arith.constant 0 : i32
    return %c0_i32, %arg0 : i32, i32
  }
}

</mosaic_0001>

<bundles_post_ra>
// kernel: decoder_forward.1
= control target key start
LH: loop header
LB: loop body
LE: loop exit
PB: predicated region body
PF: predicated region fallthrough
CT: control target
= control target key end

     0   :  { %v3824_v2 = vmov 0.0   ;;  %s3825_s16 = smov 116   ;;  %vm137_vm0 = vcmask 1043456   ;;  %vm100_vm1 = vcmask 97280   ;;  %v3826_v18 = vmov 0   ;;  %s3827_s6 = smov 125   ;;  %s6611_s1 = inlined_call_operand.vmem [shape: f32[96,36], index: 1, kind: input, shape index: {}]   ;;  %s6612_s0 = inlined_call_operand.vmem [shape: f32[12,128], index: 0, kind: input, shape index: {}]   ;;  %s6613_s2 = inlined_call_operand.vmem [shape: f32[96,4], index: 2, kind: input, shape index: {}]   ;;  %s6614_s3 = inlined_call_operand.vmem [shape: f32[10,128], index: 3, kind: output, shape index: {}]  }
   0x1   :  { %v16_v0 = vld [vmem:[%s6611_s1] sm:$0xff]  ;;  %v18_v1 = vld [vmem:[%s6611_s1 + $0x10] sm:$0xff]  ;;  %265 = vmatpush.msra.mxu1 %v3824_v2  ;;  %v15_v4 = vld [vmem:[%s6612_s0 + $0x8] sm:$0xf]  ;;  %3336 = vset.pattern.permute.xlu1 %v3826_v18  ;;  %vm225_vm2 = vcmask 195584   ;;  %v3828_v37 = vmov 2  }
   0x2   :  { %201 = vrot.lane.b32.xlu0 %v16_v0, %s3825_s16  ;;  %205 = vrot.lane.b32.xlu1 %v18_v1, %s3825_s16  ;;  %v20_v3 = vld [vmem:[%s6611_s1 + $0x20] sm:$0xff]  ;;  %v17_v6 = vld [vmem:[%s6611_s1 + $0x8] sm:$0xff]  ;;  %v3829_v38 = vmov 1  }
   0x3   :  { %209 = vrot.lane.b32.xlu2 %v20_v3, %s3825_s16  ;;  %v14_v5 = vld [vmem:[%s6612_s0] sm:$0xff]  ;;  %3098 = vmatpush.msk.msra.mxu0 %vm137_vm0, %v15_v4  ;;  %v19_v7 = vld [vmem:[%s6611_s1 + $0x18] sm:$0xff]  ;;  %v25_v8 = vld [vmem:[%s6611_s1 + $0x48] sm:$0xff] }
   0x4   :  { %3321 = vmatpush.msk.msra.mxu3 %vm137_vm0, %v15_v4  ;;  %v21_v9 = vld [vmem:[%s6611_s1 + $0x28] sm:$0xff]  ;;  %v23_v10 = vld [vmem:[%s6611_s1 + $0x38] sm:$0xff]  ;;  %v22_v11 = vld [vmem:[%s6611_s1 + $0x30] sm:$0xff]  ;;  %3337 = vset.pattern.permute.xlu2 %v3826_v18 }
   0x5   :  { %156 = vmatpush.msra.mxu0 %v14_v5  ;;  %v26_v12 = vld [vmem:[%s6611_s1 + $0x50] sm:$0xff]  ;;  %v27_v13 = vld [vmem:[%s6611_s1 + $0x58] sm:$0xff]  ;;  %v24_v14 = vld [vmem:[%s6611_s1 + $0x40] sm:$0xff]  ;;  %3335 = vset.pattern.permute.xlu0 %v3826_v18 }
   0x6   :  { %3322 = vmatpush.msra.mxu3 %v14_v5  ;;  %3099 = vmatmul.msk.f32.vlgmr.msra.gmra.mxu0 %vm100_vm1, %v16_v0  ;;  %v33_v16 = vld [vmem:[%s6613_s2 + $0x28] sm:$0xff]  ;;  %v30_v20 = vld [vmem:[%s6613_s2 + $0x10] sm:$0xff]  ;;  %v32_v21 = vld [vmem:[%s6613_s2 + $0x20] sm:$0xff] }
   0x7   :  { %3108 = vmatmul.msk.f32.vlgmr.msra.gmra.mxu3 %vm100_vm1, %v25_v8  ;;  %v29_v19 = vld [vmem:[%s6613_s2 + $0x8] sm:$0xff]  ;;  %v28_v25 = vld [vmem:[%s6613_s2] sm:$0xff]  ;;  %v31_v26 = vld [vmem:[%s6613_s2 + $0x18] sm:$0xff] }
   0x8   :  { %3323 = vmatpush.msrb.mxu3 %v3824_v2  ;;  %v36_v27 = vld [vmem:[%s6613_s2 + $0x40] sm:$0xff]  ;;  %v34_v30 = vld [vmem:[%s6613_s2 + $0x30] sm:$0xff]  ;;  %v39_v31 = vld [vmem:[%s6613_s2 + $0x58] sm:$0xff] }
   0x9   :  { %v37_v33 = vld [vmem:[%s6613_s2 + $0x48] sm:$0xff]  ;;  %v35_v34 = vld [vmem:[%s6613_s2 + $0x38] sm:$0xff]  ;;  %v38_v36 = vld [vmem:[%s6613_s2 + $0x50] sm:$0xff] }
   0xa   :  { %203 = vrot.lane.b32.xlu0 %v17_v6, %s3825_s16  ;;  %207 = vrot.lane.b32.xlu1 %v19_v7, %s3825_s16 }
   0xb   :  { %211 = vrot.lane.b32.xlu2 %v21_v9, %s3825_s16 }
   0xe   :  { %3100 = vmatmul.msk.f32.gmra.mxu0 %vm100_vm1, %v17_v6 }
   0xf   :  { %3109 = vmatmul.msk.f32.gmra.mxu3 %vm100_vm1, %v26_v12 }
  0x12   :  { %215 = vrot.lane.b32.xlu1 %v23_v10, %s3825_s16  ;;  %213 = vrot.lane.b32.xlu0 %v22_v11, %s3825_s16 }
  0x13   :  { %221 = vrot.lane.b32.xlu2 %v26_v12, %s3825_s16 }
  0x16   :  { %3101 = vmatmul.msk.f32.gmra.mxu0 %vm100_vm1, %v18_v1 }
  0x17   :  { %3110 = vmatmul.msk.f32.gmra.mxu3 %vm100_vm1, %v27_v13 }
  0x1a   :  { %223 = vrot.lane.b32.xlu1 %v27_v13, %s3825_s16  ;;  %217 = vrot.lane.b32.xlu0 %v24_v14, %s3825_s16 }
  0x1b   :  { %219 = vrot.lane.b32.xlu2 %v25_v8, %s3825_s16 }
  0x1e   :  { %3102 = vmatmul.msk.f32.gmra.mxu0 %vm100_vm1, %v19_v7 }
  0x22   :  { %67 = vperm.xlu1 %3336, %v33_v16   ;;  %52 = vperm.xlu0 %3335, %v30_v20  }
  0x23   :  { %47 = vperm.xlu2 %3337, %v29_v19  }
  0x26   :  { %3103 = vmatmul.msk.f32.gmra.mxu0 %vm100_vm1, %v20_v3 }
  0x2a   :  { %62 = vperm.xlu1 %3336, %v32_v21   ;;  %57 = vperm.xlu0 %3335, %v31_v26  }
  0x2b   :  { %42 = vperm.xlu2 %3337, %v28_v25  }
  0x2e   :  { %3104 = vmatmul.msk.f32.gmra.mxu0 %vm100_vm1, %v21_v9 }
  0x32   :  { %82 = vperm.xlu1 %3336, %v36_v27   ;;  %72 = vperm.xlu0 %3335, %v34_v30  }
  0x33   :  { %77 = vperm.xlu2 %3337, %v35_v34  }
  0x36   :  { %3105 = vmatmul.msk.f32.gmra.mxu0 %vm100_vm1, %v22_v11 }
  0x3a   :  { %97 = vperm.xlu1 %3336, %v39_v31   ;;  %87 = vperm.xlu0 %3335, %v37_v33  }
  0x3b   :  { %92 = vperm.xlu2 %3337, %v38_v36  }
  0x3e   :  { %3106 = vmatmul.msk.f32.gmra.mxu0 %vm100_vm1, %v23_v10 }
  0x42   :  { %194 = vrot.lane.b32.xlu1 %v28_v25, %s3827_s6  ;;  %3339 = vset.pattern.permute.xlu0 %v3829_v38 }
  0x43   :  { %3340 = vset.pattern.permute.xlu1 %v3828_v37  ;;  %509 = vperm.xlu0 %3339, %v29_v19  }
  0x44   :  { %3338 = vset.pattern.permute.xlu2 %v3829_v38 }
  0x45   :  { %505 = vperm.xlu2 %3338, %v28_v25  }
  0x46   :  { %3107 = vmatmul.msk.f32.gmra.mxu0 %vm100_vm1, %v24_v14 }
  0x4a   :  { %528 = vperm.xlu1 %3340, %v28_v25  }
  0x4b   :  { %3343 = vset.pattern.permute.xlu0 %v3828_v37 }
  0x4d   :  { %3341 = vset.pattern.permute.xlu2 %v3828_v37 }
  0x4e   :  { %532 = vperm.xlu2 %3341, %v29_v19  }
  0x52   :  { %3342 = vset.pattern.permute.xlu1 %v3829_v38 }
  0x53   :  { %513 = vperm.xlu1 %3342, %v30_v20  }
  0x56   :  { %536 = vperm.xlu2 %3341, %v30_v20  }
  0x5d   :  { %v3916_v15 = vpop.permute.xlu2 %209 }
  0x65   :  { %v3921_v17 = vpop.permute.xlu2 %211 }
  0x6d   :  { %v3932_v22 = vpop.permute.xlu2 %221 }
  0x6e   :  { %3121 = vmatmul.msk.f32.vlgmr.msrb.gmra.mxu3 %vm225_vm2, %v3932_v22 }
  0x74   :  { %v3936_v23 = vpop.permute.xlu0 %201  ;;  %v3938_v24 = vpop.permute.xlu1 %205 }
  0x75   :  { %3111 = vmatmul.msk.f32.vlgmr.msra.gmra.mxu1 %vm225_vm2, %v3936_v23  ;;  %v3996_v41 = vpop.permute.xlu2 %219 }
  0x7c   :  { %v3951_v28 = vpop.permute.xlu0 %203  ;;  %v3953_v29 = vpop.permute.xlu1 %207 }
  0x7d   :  { %3112 = vmatmul.msk.f32.gmra.mxu1 %vm225_vm2, %v3951_v28  ;;  %v48_v48 = vpop.permute.xlu2 %47 }
  0x83   :  { %v158_v42 = vpop.f32.mrf.mxu0 }
  0x84   :  { %v3963_v32 = vpop.permute.xlu1 %215  ;;  %v3986_v39 = vpop.permute.xlu0 %213 }
  0x85   :  { %3113 = vmatmul.msk.f32.gmra.mxu1 %vm225_vm2, %v3938_v24  ;;  %v43_v52 = vpop.permute.xlu2 %42 }
  0x86   :  { %v4002_v54 = vadd.f32 %v158_v42, %v43_v52 }
  0x8a   :  { %v4009_v60 = vpop.f32.mrf.mxu3 }
  0x8b   :  { %v161_v44 = vpop.f32.mrf.mxu0 }
  0x8c   :  { %v3973_v35 = vpop.permute.xlu1 %223  ;;  %v3992_v40 = vpop.permute.xlu0 %217  ;;  %v4007_v58 = vadd.f32 %v161_v44, %v48_v48 }
  0x8d   :  { %3114 = vmatmul.msk.f32.gmra.mxu1 %vm225_vm2, %v3953_v29  ;;  %3122 = vmatmul.msk.f32.gmra.mxu3 %vm225_vm2, %v3973_v35  ;;  %v78_v19 = vpop.permute.xlu2 %77 }
  0x92   :  { %v188_v8 = vpop.f32.mrf.mxu3 }
  0x93   :  { %v164_v46 = vpop.f32.mrf.mxu0 }
  0x94   :  { %v68_v43 = vpop.permute.xlu1 %67  ;;  %v53_v53 = vpop.permute.xlu0 %52 }
  0x95   :  { %3115 = vmatmul.msk.f32.gmra.mxu1 %vm225_vm2, %v3916_v15  ;;  %v4012_v1 = vadd.f32 %v164_v46, %v53_v53  ;;  %v93_v46 = vpop.permute.xlu2 %92 }
  0x97   :  { %6633 = vst [vmem:[#allocation2_spill] sm:$0xff] %v4012_v1 }
  0x9a   :  { %v191_v27 = vpop.f32.mrf.mxu3 }
  0x9b   :  { %v167_v51 = vpop.f32.mrf.mxu0 }
  0x9c   :  { %v63_v45 = vpop.permute.xlu1 %62  ;;  %v58_v0 = vpop.permute.xlu0 %57 }
  0x9d   :  { %3116 = vmatmul.msk.f32.gmra.mxu1 %vm225_vm2, %v3921_v17  ;;  %v4014_v3 = vadd.f32 %v167_v51, %v58_v0  ;;  %v4043_v51 = vadd.f32 %v188_v8, %v93_v46 }
  0x9f   :  { %6637 = vst [vmem:[#allocation6_spill] sm:$0xff] %v4043_v51 }
  0xa3   :  { %v170_v59 = vpop.f32.mrf.mxu0 }
  0xa4   :  { %v4000_v49 = vpop.permute.xlu1 %82  ;;  %v4017_v6 = vadd.f32 %v170_v59, %v63_v45  ;;  %v73_v42 = vpop.permute.xlu0 %72 }
  0xa5   :  { %3117 = vmatmul.msk.f32.gmra.mxu1 %vm225_vm2, %v3986_v39 }
  0xa6   :  { %6634 = vst [vmem:[#allocation3_spill] sm:$0xff] %v4017_v6 }
  0xab   :  { %v173_v7 = vpop.f32.mrf.mxu0 }
  0xac   :  { %v4004_v55 = vpop.permute.xlu1 %97  ;;  %v4023_v21 = vadd.f32 %v173_v7, %v68_v43  ;;  %v88_v8 = vpop.permute.xlu0 %87 }
  0xad   :  { %3118 = vmatmul.msk.f32.gmra.mxu1 %vm225_vm2, %v3963_v32 }
  0xae   :  { %6635 = vst [vmem:[#allocation4_spill] sm:$0xff] %v4023_v21 }
  0xb3   :  { %v176_v25 = vpop.f32.mrf.mxu0 }
  0xb4   :  { %v195_v62 = vpop.permute.xlu1 %194  ;;  %v4034_v44 = vadd.f32 %v176_v25, %v73_v42  ;;  %v4072_v25 = vadd.f32 %v4009_v60, %v88_v8 }
  0xb5   :  { %3119 = vmatmul.msk.f32.gmra.mxu1 %vm225_vm2, %v3992_v40  ;;  %3327 = vpush %v195_v62 }
  0xb6   :  { %6636 = vst [vmem:[#allocation5_spill] sm:$0xff] %v4034_v44 }
  0xb7   :  { %6640 = vst [vmem:[#allocation9_spill] sm:$0xff] %v4072_v25 }
  0xbb   :  { %v179_v52 = vpop.f32.mrf.mxu0 }
  0xbc   :  { %v4060_v7 = vadd.f32 %v179_v52, %v78_v19 }
  0xbd   :  { %3120 = vmatmul.msk.f32.gmra.mxu1 %vm225_vm2, %v3996_v41 }
  0xbe   :  { %6638 = vst [vmem:[#allocation7_spill] sm:$0xff] %v4060_v7 }
  0xe6   :  { %s3328_s2 = spop %3327 }
  0xf2   :  { %v267_v47 = vpop.f32.mrf.mxu1 }
  0xf3   :  { %v303_v57 = vadd.f32 %v267_v47, %v4002_v54 }
  0xf5   :  { %v3123_v61 = vmul.f32 -1.442695, %v303_v57  ;;  %v297_v57 = vpop.f32.mrf.mxu3 }
  0xf7   :  { %3344 = vpow2.f32 %v3123_v61 }
  0xfa   :  { %v270_v50 = vpop.f32.mrf.mxu1 }
  0xfb   :  { %v304_v63 = vadd.f32 %v270_v50, %v4007_v58 }
  0xfd   :  { %v3124_v4 = vmul.f32 -1.442695, %v304_v63  ;;  %v3345_v10 = vpop.eup %3344 }
  0xfe   :  { %v4021_v16 = vadd.f32 1.0, %v3345_v10 }
  0xff   :  { %3346 = vpow2.f32 %v3124_v4  ;;  %v313_v4 = vadd.f32 %v297_v57, %v4043_v51 }
 0x100   :  { %vm356_vm3 = vweird.f32 %v4021_v16 }
 0x102   :  { %v273_v56 = vpop.f32.mrf.mxu1 }
 0x103   :  { %v305_v5 = vadd.f32 %v273_v56, %v4012_v1 }
 0x105   :  { %v3125_v11 = vmul.f32 -1.442695, %v305_v5  ;;  %v3347_v20 = vpop.eup %3346 }
 0x106   :  { %v4026_v26 = vadd.f32 1.0, %v3347_v20  ;;  %v4069_v20 = vadd.f32 %v191_v27, %v4004_v55 }
 0x107   :  { %3348 = vpow2.f32 %v3125_v11 }
 0x108   :  { %6639 = vst [vmem:[#allocation8_spill] sm:$0xff] %v4069_v20  ;;  %vm371_vm5 = vweird.f32 %v4026_v26  ;;  %v375_v52 = vand.u32 2147483647, %v4026_v26 }
 0x10a   :  { %v276_v2 = vpop.f32.mrf.mxu1  ;;  %vm4120_vm9 = vcmp.eq.f32.partialorder %v375_v52, 8.507059e+37 }
 0x10b   :  { %v306_v9 = vadd.f32 %v276_v2, %v4014_v3 }
 0x10d   :  { %v3126_v14 = vmul.f32 -1.442695, %v306_v9  ;;  %v3349_v33 = vpop.eup %3348 }
 0x10e   :  { %v4036_v45 = vadd.f32 1.0, %v3349_v33  ;;  %v182_v33 = vpop.f32.mrf.mxu0 }
 0x10f   :  { %v4097_v57 = vadd.f32 %v182_v33, %v4000_v49 }
 0x110   :  { %v300_v27 = vpop.f32.mrf.mxu3  ;;  %vm386_vm8 = vweird.f32 %v4036_v45 }
 0x111   :  { %6641 = vst [vmem:[#allocation10_spill] sm:$0xff] %v4097_v57 }
 0x112   :  { %v279_v12 = vpop.f32.mrf.mxu1 }
 0x113   :  { %v307_v13 = vadd.f32 %v279_v12, %v4017_v6 }
 0x115   :  { %v3127_v18 = vmul.f32 -1.442695, %v307_v13 }
 0x117   :  { %3350 = vpow2.f32 %v3127_v18 }
 0x118   :  { %3352 = vpow2.f32 %v3126_v14 }
 0x119   :  { %3354 = vrcp.f32 %v4021_v16 }
 0x11a   :  { %v282_v30 = vpop.f32.mrf.mxu1  ;;  %3356 = vrcp.f32 %v4026_v26 }
 0x11b   :  { %v308_v31 = vadd.f32 %v282_v30, %v4023_v21 }
 0x11d   :  { %v3351_v34 = vpop.eup %3350  ;;  %v3128_v36 = vmul.f32 -1.442695, %v308_v31  ;;  %v377_v31 = vand.u32 2147483648, %v4026_v26 }
 0x11e   :  { %v3353_v37 = vpop.eup %3352  ;;  %v4030_v38 = vadd.f32 1.0, %v3351_v34 }
 0x11f   :  { %v4032_v43 = vpop.eup %3354  ;;  %3358 = vpow2.f32 %v3128_v36  ;;  %v4039_v47 = vadd.f32 1.0, %v3353_v37  ;;  %v360_v36 = vand.u32 2147483647, %v4021_v16 }
 0x120   :  { %3360 = vrcp.f32 %v4030_v38  ;;  %v352_v48 = vmul.f32 %v4032_v43, %v4021_v16  ;;  %v4046_v56 = vpop.eup %3356  ;;  %vm357_vm4 = vweird.f32 %v4032_v43  ;;  %vm416_vm12 = vweird.f32 %v4030_v38 }
 0x121   :  { %3362 = vrcp.f32 %v4036_v45  ;;  %v367_v2 = vmul.f32 %v4046_v56, %v4026_v26  ;;  %vm4106_vm6 = vmor %vm356_vm3, %vm357_vm4  ;;  %vm372_vm7 = vweird.f32 %v4046_v56  ;;  %v420_v52 = vand.u32 2147483647, %v4030_v38 }
 0x122   :  { %v285_v50 = vpop.f32.mrf.mxu1  ;;  %3364 = vrcp.f32 %v4039_v47  ;;  %v353_v63 = vsub.f32 1.0, %v352_v48  ;;  %vm4135_vm11 = vmor %vm371_vm5, %vm372_vm7  ;;  %vm401_vm5 = vweird.f32 %v4039_v47 }
 0x123   :  { %v309_v53 = vadd.f32 %v285_v50, %v4034_v44  ;;  %v368_v13 = vsub.f32 1.0, %v367_v2  ;;  %v362_v50 = vand.u32 2147483648, %v4021_v16  ;;  %v314_v2 = vadd.f32 %v300_v27, %v4069_v20 }
 0x124   :  { %v354_v11 = vmul.f32 %v4032_v43, %v353_v63  ;;  %v4101_v63 = vor.u32 1.1754944e-38, %v377_v31  ;;  %vm421_vm1 = vcmp.eq.f32.partialorder %v420_v52, 8.507059e+37  ;;  %v4188_v52 = vpop.permute.xlu2 %505 }
 0x125   :  { %v3359_v59 = vpop.eup %3358  ;;  %v3129_v61 = vmul.f32 -1.442695, %v309_v53  ;;  %v369_v46 = vmul.f32 %v4046_v56, %v368_v13  ;;  %v392_v13 = vand.u32 2147483648, %v4036_v45 }
 0x126   :  { %v4050_v62 = vpop.eup %3360  ;;  %v4052_v0 = vadd.f32 1.0, %v3359_v59  ;;  %v4086_v42 = vadd.f32 %v4032_v43, %v354_v11 }
 0x127   :  { %3366 = vpow2.f32 %v3129_v61  ;;  %v412_v5 = vmul.f32 %v4050_v62, %v4030_v38  ;;  %v4062_v9 = vpop.eup %3362  ;;  %v370_v11 = vadd.f32 %v4046_v56, %v369_v46  ;;  %vm417_vm10 = vweird.f32 %v4050_v62 }
 0x128   :  { %3368 = vrcp.f32 %v4052_v0  ;;  %v4065_v12 = vpop.eup %3364  ;;  %v382_v30 = vmul.f32 %v4062_v9, %v4036_v45  ;;  %vm4146_vm13 = vmor %vm416_vm12, %vm417_vm10  ;;  %vm387_vm14 = vweird.f32 %v4062_v9  ;;  %v393_v26 = vor.u32 1.1754944e-38, %v392_v13 }
 0x129   :  { %3370 = vtanh.f32 %v313_v4  ;;  %v413_v18 = vsub.f32 1.0, %v412_v5  ;;  %v397_v55 = vmul.f32 %v4065_v12, %v4039_v47  ;;  %vm402_vm0 = vweird.f32 %v4065_v12  ;;  %vm4180_vm7 = vmor %vm386_vm8, %vm387_vm14 }
 0x12a   :  { %v288_v10 = vpop.f32.mrf.mxu1  ;;  %v383_v61 = vsub.f32 1.0, %v382_v30  ;;  %v390_v30 = vand.u32 2147483647, %v4036_v45  ;;  %vm431_vm3 = vweird.f32 %v4052_v0  ;;  %v435_v13 = vand.u32 2147483647, %v4052_v0  ;;  %vm4198_vm8 = vmor %vm401_vm5, %vm402_vm0 }
 0x12b   :  { %v310_v14 = vadd.f32 %v288_v10, %v4060_v7  ;;  %v414_v53 = vmul.f32 %v4050_v62, %v413_v18  ;;  %v398_v8 = vsub.f32 1.0, %v397_v55  ;;  %vm361_vm12 = vcmp.eq.f32.partialorder %v360_v36, 8.507059e+37 }
 0x12c   :  { %v384_v55 = vmul.f32 %v4062_v9, %v383_v61  ;;  %v374_v61 = vsel %vm4135_vm11, %v4046_v56, %v370_v11  ;;  %v437_v11 = vand.u32 2147483648, %v4052_v0  ;;  %vm436_vm10 = vcmp.eq.f32.partialorder %v435_v13, 8.507059e+37 }
 0x12d   :  { %v3367_v19 = vpop.eup %3366  ;;  %v3130_v34 = vmul.f32 -1.442695, %v310_v14  ;;  %v399_v46 = vmul.f32 %v4065_v12, %v398_v8  ;;  %v6656_v45 = vsel %vm4106_vm6, %v4032_v43, %v4086_v42  ;;  %v4237_v43 = vpop.permute.xlu1 %528 }
 0x12e   :  { %v4079_v37 = vpop.eup %3368  ;;  %v4083_v60 = vadd.f32 1.0, %v3367_v19  ;;  %v415_v19 = vadd.f32 %v4050_v62, %v414_v53  ;;  %v438_v10 = vor.u32 1.1754944e-38, %v437_v11 }
 0x12f   :  { %v427_v48 = vmul.f32 %v4079_v37, %v4052_v0  ;;  %3372 = vpow2.f32 %v3130_v34  ;;  %v4099_v59 = vpop.eup %3370  ;;  %v422_v34 = vand.u32 2147483648, %v4030_v38  ;;  %vm432_vm15 = vweird.f32 %v4079_v37 }
 0x130   :  { %3374 = vrcp.f32 %v4083_v60  ;;  %v419_v38 = vsel %vm4146_vm13, %v4050_v62, %v415_v19  ;;  %v400_v62 = vadd.f32 %v4065_v12, %v399_v46  ;;  %vm4168_vm4 = vmor %vm431_vm3, %vm432_vm15 }
 0x131   :  { %v428_v4 = vsub.f32 1.0, %v427_v48  ;;  %3376 = vtanh.f32 %v314_v2  ;;  %v423_v56 = vor.u32 1.1754944e-38, %v422_v34  ;;  %v405_v48 = vand.u32 2147483647, %v4039_v47 }
 0x132   :  { %v291_v49 = vpop.f32.mrf.mxu1  ;;  %v197_v2 = vstv %s3328_s2 }
 0x133   :  { %v311_v14 = vadd.f32 %v291_v49, %v4097_v57  ;;  %v429_v31 = vmul.f32 %v4079_v37, %v428_v4  ;;  %v385_v49 = vadd.f32 %v4062_v9, %v384_v55  ;;  %199 = vst [vmem:[%s6614_s3] sm:$0xff] %v197_v2  ;;  %vm406_vm11 = vcmp.eq.f32.partialorder %v405_v48, 8.507059e+37 }
 0x134   :  { %200 = vst [vmem:[%s6614_s3 + $0x8] sm:$0x3] %v197_v2  ;;  %v4235_v2 = vpop.permute.xlu2 %532 }
 0x135   :  { %v3373_v33 = vpop.eup %3372  ;;  %v3131_v27 = vmul.f32 -1.442695, %v311_v14  ;;  %v430_v8 = vadd.f32 %v4079_v37, %v429_v31  ;;  %v407_v31 = vand.u32 2147483648, %v4039_v47 }
 0x136   :  { %v4141_v53 = vadd.f32 1.0, %v3373_v33  ;;  %v4151_v4 = vpop.eup %3374  ;;  %v452_v33 = vand.u32 2147483648, %v4083_v60 }
 0x137   :  { %3378 = vpow2.f32 %v3131_v27  ;;  %v3377_v19 = vpop.eup %3376  ;;  %v442_v34 = vmul.f32 %v4151_v4, %v4083_v60  ;;  %v424_v27 = vsel %vm421_vm1, %v423_v56, %v419_v38  ;;  %v434_v46 = vsel %vm4168_vm4, %v4079_v37, %v430_v8 }
 0x138   :  { %3380 = vrcp.f32 %v4141_v53  ;;  %v379_v56 = vsel %vm4120_vm9, %v4101_v63, %v374_v61  ;;  %v490_v63 = vmul.f32 0.0, %v424_v27  ;;  %v408_v18 = vor.u32 1.1754944e-38, %v407_v31 }
 0x139   :  { %v443_v61 = vsub.f32 1.0, %v442_v34  ;;  %v493_v11 = vmul.f32 %v4099_v59, %v379_v56  ;;  %vm391_vm9 = vcmp.eq.f32.partialorder %v390_v30, 8.507059e+37  ;;  %v467_v16 = vand.u32 2147483648, %v4141_v53 }
 0x13a   :  { %v294_v14 = vpop.f32.mrf.mxu1  ;;  %vm461_vm14 = vweird.f32 %v4141_v53  ;;  %vm447_vm15 = vweird.f32 %v4151_v4  ;;  %vm446_vm1 = vweird.f32 %v4083_v60 }
 0x13b   :  { %v312_v55 = vadd.f32 %v294_v14, %v4072_v25  ;;  %v389_v14 = vsel %vm4180_vm7, %v4062_v9, %v385_v49  ;;  %v404_v9 = vsel %vm4198_vm8, %v4065_v12, %v400_v62  ;;  %v439_v49 = vsel %vm436_vm10, %v438_v10, %v434_v46  ;;  %vm4257_vm3 = vmor %vm446_vm1, %vm447_vm15 }
 0x13c   :  { %v394_v13 = vsel %vm391_vm9, %v393_v26, %v389_v14  ;;  %v363_v62 = vor.u32 1.1754944e-38, %v362_v50  ;;  %v491_v31 = vmul.f32 0.0, %v439_v49  ;;  %v4222_v34 = vadd.f32 %v493_v11, %v490_v63 }
 0x13d   :  { %v3379_v38 = vpop.eup %3378  ;;  %3382 = vtanh.f32 %v312_v55  ;;  %v409_v55 = vsel %vm406_vm11, %v408_v18, %v404_v9  ;;  %v444_v26 = vmul.f32 %v4151_v4, %v443_v61  ;;  %v494_v27 = vmul.f32 %v3377_v19, %v394_v13 }
 0x13e   :  { %v3381_v47 = vpop.eup %3380  ;;  %v4205_v37 = vadd.f32 1.0, %v3379_v38  ;;  %v364_v59 = vsel %vm361_vm12, %v363_v62, %v6656_v45  ;;  %v489_v50 = vmul.f32 0.0, %v409_v55  ;;  %v465_v46 = vand.u32 2147483647, %v4141_v53 }
 0x13f   :  { %v457_v8 = vmul.f32 %v3381_v47, %v4141_v53  ;;  %vm462_vm13 = vweird.f32 %v3381_v47  ;;  %v4239_v42 = vadd.f32 %v494_v27, %v491_v31  ;;  %v445_v56 = vadd.f32 %v4151_v4, %v444_v26  ;;  %v4266_v31 = vpop.permute.xlu0 %509  ;;  %v4268_v27 = vpop.permute.xlu2 %536 }
 0x140   :  { %3384 = vrcp.f32 %v4205_v37  ;;  %vm4241_vm6 = vmor %vm461_vm14, %vm462_vm13  ;;  %v468_v14 = vor.u32 1.1754944e-38, %v467_v16  ;;  %vm466_vm0 = vcmp.eq.f32.partialorder %v465_v46, 8.507059e+37  ;;  %v450_v63 = vand.u32 2147483647, %v4083_v60 }
 0x141   :  { %v458_v12 = vsub.f32 1.0, %v457_v8  ;;  %3386 = vtanh.f32 %v4222_v34  ;;  %v482_v18 = vand.u32 2147483648, %v4205_v37  ;;  %v480_v49 = vand.u32 2147483647, %v4205_v37 }
 0x142   :  { %v449_v11 = vsel %vm4257_vm3, %v4151_v4, %v445_v56  ;;  %vm476_vm5 = vweird.f32 %v4205_v37  ;;  %vm451_vm7 = vcmp.eq.f32.partialorder %v450_v63, 8.507059e+37  ;;  %v4270_v4 = vpop.permute.xlu1 %513 }
 0x143   :  { %v3383_v10 = vpop.eup %3382  ;;  %v459_v30 = vmul.f32 %v3381_v47, %v458_v12  ;;  %v453_v12 = vor.u32 1.1754944e-38, %v452_v33  ;;  %vm481_vm10 = vcmp.eq.f32.partialorder %v480_v49, 8.507059e+37 }
 0x144   :  { %v492_v0 = vmul.f32 %v3383_v10, %v364_v59  ;;  %v483_v10 = vor.u32 1.1754944e-38, %v482_v18 }
 0x145   :  { %v460_v36 = vadd.f32 %v3381_v47, %v459_v30  ;;  %v454_v45 = vsel %vm451_vm7, %v453_v12, %v449_v11  ;;  %v550_v12 = vld [vmem:[%s6614_s3] sm:$0x1] }
 0x146   :  { %v3385_v48 = vpop.eup %3384  ;;  %v4233_v5 = vadd.f32 %v492_v0, %v489_v50 }
 0x147   :  { %v472_v38 = vmul.f32 %v3385_v48, %v4205_v37  ;;  %v464_v53 = vsel %vm4241_vm6, %v3381_v47, %v460_v36  ;;  %vm477_vm4 = vweird.f32 %v3385_v48  ;;  %v3387_v13 = vpop.eup %3386 }
 0x148   :  { %3388 = vtanh.f32 %v4233_v5  ;;  %v469_v47 = vsel %vm466_vm0, %v468_v14, %v464_v53  ;;  %vm478_vm8 = vmor %vm476_vm5, %vm477_vm4 }
 0x149   :  { %v473_v9 = vsub.f32 1.0, %v472_v38  ;;  %3390 = vtanh.f32 %v4239_v42  ;;  %v502_v62 = vmul.f32 %v3387_v13, %v469_v47 }
 0x14b   :  { %v474_v8 = vmul.f32 %v3385_v48, %v473_v9  ;;  %v517_v37 = vmul.f32 %v4266_v31, %v502_v62  ;;  %v540_v46 = vmul.f32 %v4235_v2, %v502_v62 }
 0x14d   :  { %v475_v60 = vadd.f32 %v3385_v48, %v474_v8 }
 0x14e   :  { %v3389_v55 = vpop.eup %3388 }
 0x14f   :  { %v479_v59 = vsel %vm478_vm8, %v3385_v48, %v475_v60  ;;  %v501_v30 = vmul.f32 %v3389_v55, %v454_v45  ;;  %v3391_v26 = vpop.eup %3390 }
 0x150   :  { %v484_v50 = vsel %vm481_vm10, %v483_v10, %v479_v59 }
 0x151   :  { %v503_v0 = vmul.f32 %v3391_v26, %v484_v50  ;;  %v516_v16 = vmul.f32 %v4188_v52, %v501_v30  ;;  %v539_v36 = vmul.f32 %v4237_v43, %v501_v30 }
 0x153   :  { %v518_v19 = vmul.f32 %v4270_v4, %v503_v0  ;;  %v541_v48 = vmul.f32 %v4268_v27, %v503_v0  ;;  %569 = vmatpush.msra.mxu2 %v503_v0  ;;  %3324 = vmatpush.msra.mxu3 %v503_v0  ;;  %v519_v38 = vadd.f32 %v517_v37, %v516_v16 }
 0x154   :  { %v542_v53 = vadd.f32 %v540_v46, %v539_v36 }
 0x155   :  { %570 = vmatpush.msra.mxu2 %v502_v62  ;;  %3325 = vmatpush.msra.mxu3 %v502_v62  ;;  %v520_v56 = vadd.f32 %v519_v38, %v518_v19  ;;  %v553_v62 = vld [vmem:[%s6614_s3 + $0x9] sm:$0x1] }
 0x156   :  { %v543_v14 = vadd.f32 %v542_v53, %v541_v48 }
 0x157   :  { %v521_v33 = vrot.slane %v520_v56, 4  ;;  %571 = vmatpush.msra.mxu2 %v501_v30  ;;  %3326 = vmatpush.msra.mxu3 %v501_v30 }
 0x158   :  { %3132 = vmatmul.msk.f32.vlgmr.msra.gmra.mxu2 %vm225_vm2, %v3936_v23  ;;  %3141 = vmatmul.msk.f32.vlgmr.msra.gmra.mxu3 %vm225_vm2, %v3996_v41  ;;  %v544_v9 = vrot.slane %v543_v14, 4 }
 0x159   :  { %v522_v63 = vadd.f32 %v521_v33, %v520_v56 }
 0x15a   :  { %v545_v18 = vadd.f32 %v544_v9, %v543_v14 }
 0x15b   :  { %v523_v47 = vrot.slane %v522_v63, 2 }
 0x15c   :  { %v546_v61 = vrot.slane %v545_v18, 2 }
 0x15d   :  { %v524_v8 = vadd.f32 %v523_v47, %v522_v63 }
 0x15e   :  { %v547_v49 = vadd.f32 %v546_v61, %v545_v18 }
 0x15f   :  { %v525_v11 = vrot.slane %v524_v8, 1 }
 0x160   :  { %v548_v13 = vrot.slane %v547_v49, 1  ;;  %3133 = vmatmul.msk.f32.gmra.mxu2 %vm225_vm2, %v3951_v28  ;;  %3142 = vmatmul.msk.f32.gmra.mxu3 %vm225_vm2, %v3932_v22 }
 0x161   :  { %v526_v60 = vadd.f32 %v525_v11, %v524_v8 }
 0x162   :  { %v549_v55 = vadd.f32 %v548_v13, %v547_v49 }
 0x163   :  { %v551_v10 = vadd.f32 %v550_v12, %v526_v60 }
 0x164   :  { %v554_v45 = vadd.f32 %v553_v62, %v549_v55 }
 0x165   :  { %552 = vst [vmem:[%s6614_s3] sm:$0x1] %v551_v10 }
 0x166   :  { %555 = vst [vmem:[%s6614_s3 + $0x9] sm:$0x1] %v554_v45 }
 0x168   :  { %3134 = vmatmul.msk.f32.gmra.mxu2 %vm225_vm2, %v3938_v24  ;;  %3143 = vmatmul.msk.f32.gmra.mxu3 %vm225_vm2, %v3973_v35 }
 0x170   :  { %3135 = vmatmul.msk.f32.gmra.mxu2 %vm225_vm2, %v3953_v29 }
 0x178   :  { %3136 = vmatmul.msk.f32.gmra.mxu2 %vm225_vm2, %v3916_v15 }
 0x180   :  { %3137 = vmatmul.msk.f32.gmra.mxu2 %vm225_vm2, %v3921_v17 }
 0x188   :  { %3138 = vmatmul.msk.f32.gmra.mxu2 %vm225_vm2, %v3986_v39 }
 0x190   :  { %3139 = vmatmul.msk.f32.gmra.mxu2 %vm225_vm2, %v3963_v32 }
 0x198   :  { %3140 = vmatmul.msk.f32.gmra.mxu2 %vm225_vm2, %v3992_v40 }
 0x1db   :  { %v573_v59 = vpop.f32.mrf.mxu2  ;;  %v600_v61 = vpop.f32.mrf.mxu3 }
 0x1dc   :  { %v609_v50 = vadd.f32 %v573_v59, %v4002_v54 }
 0x1de   :  { %v3144_v37 = vmul.f32 -1.442695, %v609_v50 }
 0x1e0   :  { %3392 = vpow2.f32 %v3144_v37 }
 0x1e3   :  { %v576_v30 = vpop.f32.mrf.mxu2  ;;  %v603_v50 = vpop.f32.mrf.mxu3 }
 0x1e4   :  { %v610_v0 = vadd.f32 %v576_v30, %v4007_v58 }
 0x1e6   :  { %v3145_v16 = vmul.f32 -1.442695, %v610_v0  ;;  %v3393_v38 = vpop.eup %3392 }
 0x1e7   :  { %v4319_v9 = vadd.f32 1.0, %v3393_v38  ;;  %v618_v38 = vadd.f32 %v600_v61, %v4072_v25 }
 0x1e8   :  { %3394 = vpow2.f32 %v3145_v16 }
 0x1e9   :  { %vm662_vm9 = vweird.f32 %v4319_v9 }
 0x1eb   :  { %v579_v26 = vpop.f32.mrf.mxu2 }
 0x1ec   :  { %v611_v48 = vadd.f32 %v579_v26, %v4012_v1 }
 0x1ee   :  { %v3395_v56 = vpop.eup %3394  ;;  %v3146_v33 = vmul.f32 -1.442695, %v611_v48 }
 0x1ef   :  { %v4321_v18 = vadd.f32 1.0, %v3395_v56 }
 0x1f1   :  { %vm677_vm14 = vweird.f32 %v4321_v18 }
 0x1f3   :  { %v582_v36 = vpop.f32.mrf.mxu2 }
 0x1f4   :  { %v612_v46 = vadd.f32 %v582_v36, %v4014_v3 }
 0x1f6   :  { %v3147_v19 = vmul.f32 -1.442695, %v612_v46 }
 0x1f8   :  { %3396 = vpow2.f32 %v3147_v19 }
 0x1fb   :  { %v585_v53 = vpop.f32.mrf.mxu2 }
 0x1fc   :  { %v613_v14 = vadd.f32 %v585_v53, %v4017_v6 }
 0x1fe   :  { %v3148_v63 = vmul.f32 -1.442695, %v613_v14  ;;  %v3397_v47 = vpop.eup %3396  ;;  %v619_v14 = vadd.f32 %v603_v50, %v4043_v51  ;;  %v606_v50 = vpop.f32.mrf.mxu3 }
 0x1ff   :  { %v4325_v8 = vadd.f32 1.0, %v3397_v47 }
 0x200   :  { %3398 = vpow2.f32 %v3148_v63 }
 0x201   :  { %3400 = vpow2.f32 %v3146_v33  ;;  %vm707_vm7 = vweird.f32 %v4325_v8 }
 0x202   :  { %3402 = vrcp.f32 %v4319_v9 }
 0x203   :  { %3404 = vrcp.f32 %v4321_v18  ;;  %v588_v49 = vpop.f32.mrf.mxu2 }
 0x204   :  { %v614_v11 = vadd.f32 %v588_v49, %v4023_v21  ;;  %3406 = vrcp.f32 %v4325_v8 }
 0x206   :  { %v3399_v13 = vpop.eup %3398  ;;  %v3149_v12 = vmul.f32 -1.442695, %v614_v11 }
 0x207   :  { %v3401_v60 = vpop.eup %3400  ;;  %v4329_v62 = vadd.f32 1.0, %v3399_v13 }
 0x208   :  { %v4331_v55 = vpop.eup %3402  ;;  %3408 = vpow2.f32 %v3149_v12  ;;  %v4336_v45 = vadd.f32 1.0, %v3401_v60  ;;  %v666_v12 = vand.u32 2147483647, %v4319_v9 }
 0x209   :  { %v4333_v10 = vpop.eup %3404  ;;  %3410 = vrcp.f32 %v4329_v62  ;;  %v658_v59 = vmul.f32 %v4331_v55, %v4319_v9  ;;  %vm663_vm11 = vweird.f32 %v4331_v55  ;;  %vm722_vm4 = vweird.f32 %v4329_v62 }
 0x20a   :  { %v673_v26 = vmul.f32 %v4333_v10, %v4321_v18  ;;  %v4343_v37 = vpop.eup %3406  ;;  %3412 = vrcp.f32 %v4336_v45  ;;  %vm678_vm12 = vweird.f32 %v4333_v10  ;;  %vm4393_vm13 = vmor %vm662_vm9, %vm663_vm11  ;;  %vm4420_vm1 = vcmp.eq.f32.partialorder %v666_v12, 8.507059e+37 }
 0x20b   :  { %v591_v30 = vpop.f32.mrf.mxu2  ;;  %v659_v19 = vsub.f32 1.0, %v658_v59  ;;  %v703_v33 = vmul.f32 %v4343_v37, %v4325_v8  ;;  %vm4408_vm15 = vmor %vm677_vm14, %vm678_vm12  ;;  %vm708_vm3 = vweird.f32 %v4343_v37 }
 0x20c   :  { %v615_v0 = vadd.f32 %v591_v30, %v4034_v44  ;;  %v674_v53 = vsub.f32 1.0, %v673_v26  ;;  %v681_v30 = vand.u32 2147483647, %v4321_v18  ;;  %v683_v26 = vand.u32 2147483648, %v4321_v18  ;;  %vm4446_vm10 = vmor %vm707_vm7, %vm708_vm3 }
 0x20d   :  { %v660_v63 = vmul.f32 %v4331_v55, %v659_v19  ;;  %v704_v60 = vsub.f32 1.0, %v703_v33  ;;  %v668_v33 = vand.u32 2147483648, %v4319_v9 }
 0x20e   :  { %v3409_v16 = vpop.eup %3408  ;;  %v3150_v36 = vmul.f32 -1.442695, %v615_v0  ;;  %v675_v61 = vmul.f32 %v4333_v10, %v674_v53  ;;  %vm4398_vm6 = vcmp.eq.f32.partialorder %v681_v30, 8.507059e+37 }
 0x20f   :  { %v4346_v46 = vpop.eup %3410  ;;  %v4348_v48 = vadd.f32 1.0, %v3409_v16  ;;  %v669_v12 = vor.u32 1.1754944e-38, %v668_v33 }
 0x210   :  { %v718_v56 = vmul.f32 %v4346_v46, %v4329_v62  ;;  %3414 = vpow2.f32 %v3150_v36  ;;  %v4358_v11 = vpop.eup %3412  ;;  %v4370_v36 = vadd.f32 %v4331_v55, %v660_v63  ;;  %v4383_v63 = vadd.f32 %v606_v50, %v4069_v20 }
 0x211   :  { %3416 = vrcp.f32 %v4348_v48  ;;  %v688_v19 = vmul.f32 %v4358_v11, %v4336_v45  ;;  %vm723_vm0 = vweird.f32 %v4346_v46  ;;  %vm693_vm5 = vweird.f32 %v4358_v11 }
 0x212   :  { %v719_v47 = vsub.f32 1.0, %v718_v56  ;;  %3418 = vtanh.f32 %v618_v38  ;;  %v676_v56 = vadd.f32 %v4333_v10, %v675_v61  ;;  %vm4433_vm8 = vmor %vm722_vm4, %vm723_vm0 }
 0x213   :  { %v594_v49 = vpop.f32.mrf.mxu2  ;;  %3420 = vtanh.f32 %v619_v14  ;;  %v689_v20 = vsub.f32 1.0, %v688_v19 }
 0x214   :  { %v616_v13 = vadd.f32 %v594_v49, %v4060_v7  ;;  %v720_v38 = vmul.f32 %v4346_v46, %v719_v47  ;;  %v705_v49 = vmul.f32 %v4343_v37, %v704_v60 }
 0x216   :  { %v3415_v59 = vpop.eup %3414  ;;  %v3151_v0 = vmul.f32 -1.442695, %v616_v13  ;;  %v721_v18 = vadd.f32 %v4346_v46, %v720_v38  ;;  %v706_v19 = vadd.f32 %v4343_v37, %v705_v49 }
 0x217   :  { %v4367_v16 = vpop.eup %3416  ;;  %v4375_v53 = vadd.f32 1.0, %v3415_v59  ;;  %v684_v59 = vor.u32 1.1754944e-38, %v683_v26  ;;  %v680_v26 = vsel %vm4408_vm15, %v4333_v10, %v676_v56  ;;  %v713_v10 = vand.u32 2147483648, %v4325_v8 }
 0x218   :  { %v733_v14 = vmul.f32 %v4367_v16, %v4348_v48  ;;  %3422 = vpow2.f32 %v3151_v0  ;;  %v4387_v47 = vpop.eup %3418  ;;  %v665_v0 = vsel %vm4393_vm13, %v4331_v55, %v4370_v36  ;;  %v728_v55 = vand.u32 2147483648, %v4329_v62 }
 0x219   :  { %3424 = vrcp.f32 %v4375_v53  ;;  %v3421_v50 = vpop.eup %3420  ;;  %v725_v51 = vsel %vm4433_vm8, %v4346_v46, %v721_v18  ;;  %vm738_vm11 = vweird.f32 %v4367_v16  ;;  %v685_v46 = vsel %vm4398_vm6, %v684_v59, %v680_v26 }
 0x21a   :  { %v734_v60 = vsub.f32 1.0, %v733_v14  ;;  %v726_v14 = vand.u32 2147483647, %v4329_v62  ;;  %v690_v62 = vmul.f32 %v4358_v11, %v689_v20  ;;  %v714_v18 = vor.u32 1.1754944e-38, %v713_v10 }
 0x21b   :  { %v597_v30 = vpop.f32.mrf.mxu2  ;;  %vm737_vm13 = vweird.f32 %v4348_v48  ;;  %vm692_vm6 = vweird.f32 %v4336_v45  ;;  %v670_v33 = vsel %vm4420_vm1, %v669_v12, %v665_v0  ;;  %v799_v26 = vmul.f32 %v3421_v50, %v685_v46 }
 0x21c   :  { %v617_v36 = vadd.f32 %v597_v30, %v4097_v57  ;;  %v735_v38 = vmul.f32 %v4367_v16, %v734_v60  ;;  %v711_v60 = vand.u32 2147483647, %v4325_v8  ;;  %vm727_vm9 = vcmp.eq.f32.partialorder %v726_v14, 8.507059e+37  ;;  %vm4465_vm14 = vmor %vm737_vm13, %vm738_vm11 }
 0x21d   :  { %v729_v57 = vor.u32 1.1754944e-38, %v728_v55  ;;  %v710_v8 = vsel %vm4446_vm10, %v4343_v37, %v706_v19  ;;  %v743_v14 = vand.u32 2147483648, %v4348_v48  ;;  %vm4479_vm15 = vmor %vm692_vm6, %vm693_vm5  ;;  %vm752_vm5 = vweird.f32 %v4375_v53 }
 0x21e   :  { %v3423_v9 = vpop.eup %3422  ;;  %v3152_v56 = vmul.f32 -1.442695, %v617_v36  ;;  %v736_v20 = vadd.f32 %v4367_v16, %v735_v38  ;;  %vm712_vm12 = vcmp.eq.f32.partialorder %v711_v60, 8.507059e+37  ;;  %v741_v38 = vand.u32 2147483647, %v4348_v48 }
 0x21f   :  { %v4437_v49 = vpop.eup %3424  ;;  %v4441_v30 = vadd.f32 1.0, %v3423_v9  ;;  %v730_v55 = vsel %vm727_vm9, %v729_v57, %v725_v51  ;;  %v691_v9 = vadd.f32 %v4358_v11, %v690_v62  ;;  %v715_v37 = vsel %vm712_vm12, %v714_v18, %v710_v8 }
 0x220   :  { %3426 = vpow2.f32 %v3152_v56  ;;  %v748_v36 = vmul.f32 %v4437_v49, %v4375_v53  ;;  %v698_v56 = vand.u32 2147483648, %v4336_v45  ;;  %v696_v51 = vand.u32 2147483647, %v4336_v45 }
 0x221   :  { %3428 = vrcp.f32 %v4441_v30  ;;  %v740_v57 = vsel %vm4465_vm14, %v4367_v16, %v736_v20  ;;  %v796_v59 = vmul.f32 %v730_v55, %v4222_v34  ;;  %v744_v45 = vor.u32 1.1754944e-38, %v743_v14 }
 0x222   :  { %v749_v13 = vsub.f32 1.0, %v748_v36  ;;  %3430 = vtanh.f32 %v4383_v63  ;;  %v695_v16 = vsel %vm4479_vm15, %v4358_v11, %v691_v9  ;;  %vm742_vm0 = vcmp.eq.f32.partialorder %v741_v38, 8.507059e+37 }
 0x223   :  { %v795_v61 = vmul.f32 %v715_v37, %v4233_v5  ;;  %v699_v0 = vor.u32 1.1754944e-38, %v698_v56  ;;  %v745_v50 = vsel %vm742_vm0, %v744_v45, %v740_v57  ;;  %v798_v36 = vmul.f32 %v4387_v47, %v670_v33 }
 0x224   :  { %v750_v60 = vmul.f32 %v4437_v49, %v749_v13  ;;  %vm697_vm1 = vcmp.eq.f32.partialorder %v696_v51, 8.507059e+37  ;;  %v4491_v63 = vadd.f32 %v799_v26, %v796_v59  ;;  %v797_v11 = vmul.f32 %v745_v50, %v4239_v42 }
 0x225   :  { %v700_v20 = vsel %vm697_vm1, %v699_v0, %v695_v16  ;;  %v773_v46 = vand.u32 2147483648, %v4441_v30  ;;  %vm753_vm3 = vweird.f32 %v4437_v49  ;;  %v4496_v5 = vadd.f32 %v798_v36, %v795_v61 }
 0x226   :  { %v3427_v48 = vpop.eup %3426  ;;  %v771_v55 = vand.u32 2147483647, %v4441_v30  ;;  %v751_v47 = vadd.f32 %v4437_v49, %v750_v60  ;;  %v758_v42 = vand.u32 2147483648, %v4375_v53  ;;  %vm767_vm7 = vweird.f32 %v4441_v30  ;;  %vm4504_vm8 = vmor %vm752_vm5, %vm753_vm3 }
 0x227   :  { %v3429_v10 = vpop.eup %3428  ;;  %v656_v34 = vadd.f32 1.0, %v3427_v48  ;;  %v756_v56 = vand.u32 2147483647, %v4375_v53  ;;  %v774_v13 = vor.u32 1.1754944e-38, %v773_v46 }
 0x228   :  { %v763_v62 = vmul.f32 %v3429_v10, %v4441_v30  ;;  %v3431_v18 = vpop.eup %3430  ;;  %vm768_vm4 = vweird.f32 %v3429_v10  ;;  %vm772_vm9 = vcmp.eq.f32.partialorder %v771_v55, 8.507059e+37  ;;  %v755_v30 = vsel %vm4504_vm8, %v4437_v49, %v751_v47 }
 0x229   :  { %3432 = vrcp.f32 %v656_v34  ;;  %v800_v9 = vmul.f32 %v3431_v18, %v700_v20  ;;  %vm769_vm10 = vmor %vm767_vm7, %vm768_vm4  ;;  %v759_v48 = vor.u32 1.1754944e-38, %v758_v42  ;;  %vm757_vm11 = vcmp.eq.f32.partialorder %v756_v56, 8.507059e+37 }
 0x22a   :  { %v764_v8 = vsub.f32 1.0, %v763_v62  ;;  %3434 = vtanh.f32 %v4491_v63  ;;  %v788_v53 = vand.u32 2147483648, %v656_v34  ;;  %v786_v16 = vand.u32 2147483647, %v656_v34 }
 0x22b   :  { %v4509_v37 = vadd.f32 %v800_v9, %v797_v11  ;;  %3436 = vtanh.f32 %v4496_v5  ;;  %v760_v19 = vsel %vm757_vm11, %v759_v48, %v755_v30  ;;  %vm782_vm13 = vweird.f32 %v656_v34 }
 0x22c   :  { %v765_v14 = vmul.f32 %v3429_v10, %v764_v8  ;;  %v789_v62 = vor.u32 1.1754944e-38, %v788_v53  ;;  %vm787_vm6 = vcmp.eq.f32.partialorder %v786_v16, 8.507059e+37 }
 0x22d   :  { %3438 = vtanh.f32 %v4509_v37 }
 0x22e   :  { %v766_v38 = vadd.f32 %v3429_v10, %v765_v14 }
 0x22f   :  { %v3433_v25 = vpop.eup %3432 }
 0x230   :  { %v778_v51 = vmul.f32 %v3433_v25, %v656_v34  ;;  %v770_v57 = vsel %vm769_vm10, %v3429_v10, %v766_v38  ;;  %v3435_v26 = vpop.eup %3434  ;;  %vm783_vm12 = vweird.f32 %v3433_v25 }
 0x231   :  { %v775_v59 = vsel %vm772_vm9, %v774_v13, %v770_v57  ;;  %v3437_v0 = vpop.eup %3436  ;;  %vm784_vm14 = vmor %vm782_vm13, %vm783_vm12 }
 0x232   :  { %v779_v33 = vsub.f32 1.0, %v778_v51  ;;  %v808_v61 = vmul.f32 %v3435_v26, %v775_v59  ;;  %v807_v50 = vmul.f32 %v3437_v0, %v760_v19  ;;  %v835_v26 = vld [vmem:[%s6614_s3 + $0x8] sm:$0x1] }
 0x233   :  { %v3439_v20 = vpop.eup %3438 }
 0x234   :  { %v780_v45 = vmul.f32 %v3433_v25, %v779_v33  ;;  %v811_v60 = vmul.f32 %v808_v61, %v4266_v31  ;;  %v822_v36 = vmul.f32 %v808_v61, %v4235_v2  ;;  %v810_v46 = vmul.f32 %v807_v50, %v4188_v52  ;;  %v832_v33 = vld [vmem:[%s6614_s3 + $0x1] sm:$0x1] }
 0x235   :  { %v821_v18 = vmul.f32 %v807_v50, %v4237_v43 }
 0x236   :  { %v781_v10 = vadd.f32 %v3433_v25, %v780_v45  ;;  %v813_v55 = vadd.f32 %v811_v60, %v810_v46 }
 0x237   :  { %v824_v47 = vadd.f32 %v822_v36, %v821_v18 }
 0x238   :  { %v785_v49 = vsel %vm784_vm14, %v3433_v25, %v781_v10 }
 0x239   :  { %v790_v8 = vsel %vm787_vm6, %v789_v62, %v785_v49 }
 0x23a   :  { %v809_v11 = vmul.f32 %v3439_v20, %v790_v8 }
 0x23c   :  { %v812_v14 = vmul.f32 %v809_v11, %v4270_v4  ;;  %v823_v34 = vmul.f32 %v809_v11, %v4268_v27  ;;  %851 = vmatpush.msrb.mxu3 %v809_v11 }
 0x23e   :  { %852 = vmatpush.msrb.mxu3 %v808_v61  ;;  %v814_v9 = vadd.f32 %v813_v55, %v812_v14  ;;  %v825_v42 = vadd.f32 %v824_v47, %v823_v34 }
 0x240   :  { %v815_v38 = vrot.slane %v814_v9, 4  ;;  %v826_v12 = vrot.slane %v825_v42, 4  ;;  %853 = vmatpush.msrb.mxu3 %v807_v50 }
 0x241   :  { %3153 = vmatmul.msk.f32.vlgmr.msrb.gmra.mxu3 %vm225_vm2, %v3936_v23 }
 0x242   :  { %v816_v56 = vadd.f32 %v815_v38, %v814_v9  ;;  %v827_v25 = vadd.f32 %v826_v12, %v825_v42 }
 0x244   :  { %v817_v13 = vrot.slane %v816_v56, 2  ;;  %v828_v51 = vrot.slane %v827_v25, 2 }
 0x246   :  { %v818_v57 = vadd.f32 %v817_v13, %v816_v56  ;;  %v829_v30 = vadd.f32 %v828_v51, %v827_v25 }
 0x248   :  { %v819_v59 = vrot.slane %v818_v57, 1  ;;  %v830_v48 = vrot.slane %v829_v30, 1 }
 0x249   :  { %3154 = vmatmul.msk.f32.gmra.mxu3 %vm225_vm2, %v3951_v28 }
 0x24a   :  { %v820_v53 = vadd.f32 %v819_v59, %v818_v57  ;;  %v831_v19 = vadd.f32 %v830_v48, %v829_v30 }
 0x24c   :  { %v833_v45 = vadd.f32 %v832_v33, %v820_v53  ;;  %v836_v16 = vadd.f32 %v835_v26, %v831_v19 }
 0x24e   :  { %834 = vst [vmem:[%s6614_s3 + $0x1] sm:$0x1] %v833_v45 }
 0x24f   :  { %837 = vst [vmem:[%s6614_s3 + $0x8] sm:$0x1] %v836_v16 }
 0x251   :  { %3155 = vmatmul.msk.f32.gmra.mxu3 %vm225_vm2, %v3938_v24 }
 0x259   :  { %3156 = vmatmul.msk.f32.gmra.mxu3 %vm225_vm2, %v3953_v29 }
 0x261   :  { %3157 = vmatmul.msk.f32.gmra.mxu3 %vm225_vm2, %v3916_v15 }
 0x269   :  { %3158 = vmatmul.msk.f32.gmra.mxu3 %vm225_vm2, %v3921_v17 }
 0x271   :  { %3159 = vmatmul.msk.f32.gmra.mxu3 %vm225_vm2, %v3986_v39 }
 0x279   :  { %3160 = vmatmul.msk.f32.gmra.mxu3 %vm225_vm2, %v3963_v32 }
 0x281   :  { %3161 = vmatmul.msk.f32.gmra.mxu3 %vm225_vm2, %v3992_v40 }
 0x289   :  { %3162 = vmatmul.msk.f32.gmra.mxu3 %vm225_vm2, %v3996_v41 }
 0x291   :  { %3163 = vmatmul.msk.f32.gmra.mxu3 %vm225_vm2, %v3932_v22 }
 0x299   :  { %3164 = vmatmul.msk.f32.gmra.mxu3 %vm225_vm2, %v3973_v35 }
 0x2c4   :  { %v855_v61 = vpop.f32.mrf.mxu3 }
 0x2c5   :  { %v891_v62 = vadd.f32 %v855_v61, %v4002_v54 }
 0x2c7   :  { %v3165_v60 = vmul.f32 -1.442695, %v891_v62 }
 0x2c9   :  { %3440 = vpow2.f32 %v3165_v60 }
 0x2cc   :  { %v858_v0 = vpop.f32.mrf.mxu3 }
 0x2cd   :  { %v892_v36 = vadd.f32 %v858_v0, %v4007_v58 }
 0x2cf   :  { %v3166_v11 = vmul.f32 -1.442695, %v892_v36  ;;  %v3441_v34 = vpop.eup %3440  ;;  %v6679_v36 = vld [vmem:[#allocation10_spill] sm:$0xff] }
 0x2d0   :  { %v4564_v9 = vadd.f32 1.0, %v3441_v34 }
 0x2d1   :  { %3442 = vpow2.f32 %v3166_v11 }
 0x2d2   :  { %vm944_vm0 = vweird.f32 %v4564_v9 }
 0x2d4   :  { %v861_v10 = vpop.f32.mrf.mxu3 }
 0x2d5   :  { %v893_v55 = vadd.f32 %v861_v10, %v4012_v1 }
 0x2d7   :  { %v3167_v38 = vmul.f32 -1.442695, %v893_v55  ;;  %v3443_v12 = vpop.eup %3442 }
 0x2d8   :  { %v4567_v51 = vadd.f32 1.0, %v3443_v12 }
 0x2da   :  { %vm959_vm4 = vweird.f32 %v4567_v51 }
 0x2dc   :  { %v864_v50 = vpop.f32.mrf.mxu3 }
 0x2dd   :  { %v894_v20 = vadd.f32 %v864_v50, %v4014_v3 }
 0x2df   :  { %v3168_v18 = vmul.f32 -1.442695, %v894_v20 }
 0x2e1   :  { %3444 = vpow2.f32 %v3168_v18 }
 0x2e4   :  { %v867_v49 = vpop.f32.mrf.mxu3 }
 0x2e5   :  { %v895_v8 = vadd.f32 %v867_v49, %v4017_v6 }
 0x2e7   :  { %v3169_v14 = vmul.f32 -1.442695, %v895_v8  ;;  %v3445_v25 = vpop.eup %3444 }
 0x2e8   :  { %v4569_v57 = vadd.f32 1.0, %v3445_v25 }
 0x2e9   :  { %3446 = vpow2.f32 %v3169_v14 }
 0x2ea   :  { %3448 = vrcp.f32 %v4564_v9  ;;  %vm989_vm9 = vweird.f32 %v4569_v57 }
 0x2eb   :  { %3450 = vpow2.f32 %v3167_v38 }
 0x2ec   :  { %v870_v46 = vpop.f32.mrf.mxu3 }
 0x2ed   :  { %v896_v47 = vadd.f32 %v870_v46, %v4023_v21 }
 0x2ef   :  { %v3170_v56 = vmul.f32 -1.442695, %v896_v47  ;;  %v3447_v13 = vpop.eup %3446 }
 0x2f0   :  { %v4571_v30 = vadd.f32 1.0, %v3447_v13  ;;  %v4576_v26 = vpop.eup %3448 }
 0x2f1   :  { %3452 = vpow2.f32 %v3170_v56  ;;  %v3451_v53 = vpop.eup %3450  ;;  %v940_v61 = vmul.f32 %v4576_v26, %v4564_v9  ;;  %vm945_vm15 = vweird.f32 %v4576_v26 }
 0x2f2   :  { %3454 = vrcp.f32 %v4567_v51  ;;  %v4582_v0 = vadd.f32 1.0, %v3451_v53  ;;  %v950_v53 = vand.u32 2147483648, %v4564_v9  ;;  %vm4630_vm1 = vmor %vm944_vm0, %vm945_vm15  ;;  %vm1004_vm13 = vweird.f32 %v4571_v30 }
 0x2f3   :  { %3456 = vrcp.f32 %v4569_v57  ;;  %v941_v8 = vsub.f32 1.0, %v940_v61 }
 0x2f4   :  { %v873_v42 = vpop.f32.mrf.mxu3  ;;  %3458 = vrcp.f32 %v4571_v30 }
 0x2f5   :  { %v897_v59 = vadd.f32 %v873_v42, %v4034_v44  ;;  %v942_v38 = vmul.f32 %v4576_v26, %v941_v8  ;;  %v6680_v8 = vld [vmem:[#allocation9_spill] sm:$0xff] }
 0x2f7   :  { %v3171_v19 = vmul.f32 -1.442695, %v897_v59  ;;  %v3453_v16 = vpop.eup %3452 }
 0x2f8   :  { %v4584_v10 = vpop.eup %3454  ;;  %v4586_v50 = vadd.f32 1.0, %v3453_v16  ;;  %v963_v16 = vand.u32 2147483647, %v4567_v51 }
 0x2f9   :  { %v4588_v62 = vpop.eup %3456  ;;  %v955_v11 = vmul.f32 %v4584_v10, %v4567_v51  ;;  %vm960_vm5 = vweird.f32 %v4584_v10 }
 0x2fa   :  { %v4590_v60 = vpop.eup %3458  ;;  %v985_v18 = vmul.f32 %v4588_v62, %v4569_v57  ;;  %vm4645_vm7 = vcmp.eq.f32.partialorder %v963_v16, 8.507059e+37  ;;  %vm990_vm8 = vweird.f32 %v4588_v62  ;;  %v1010_v16 = vand.u32 2147483648, %v4571_v30  ;;  %vm4664_vm11 = vmor %vm959_vm4, %vm960_vm5 }
 0x2fb   :  { %v1000_v34 = vmul.f32 %v4590_v60, %v4571_v30  ;;  %v956_v47 = vsub.f32 1.0, %v955_v11  ;;  %vm1005_vm10 = vweird.f32 %v4590_v60  ;;  %vm4672_vm12 = vmor %vm989_vm9, %vm990_vm8  ;;  %vm974_vm5 = vweird.f32 %v4582_v0 }
 0x2fc   :  { %v876_v48 = vpop.f32.mrf.mxu3  ;;  %v986_v12 = vsub.f32 1.0, %v985_v18  ;;  %vm4681_vm14 = vmor %vm1004_vm13, %vm1005_vm10 }
 0x2fd   :  { %v898_v33 = vadd.f32 %v876_v48, %v4060_v7  ;;  %v1001_v25 = vsub.f32 1.0, %v1000_v34 }
 0x2ff   :  { %v3172_v45 = vmul.f32 -1.442695, %v898_v33  ;;  %v948_v33 = vand.u32 2147483647, %v4564_v9  ;;  %v951_v9 = vor.u32 1.1754944e-38, %v950_v53 }
 0x301   :  { %3460 = vpow2.f32 %v3172_v45  ;;  %v957_v45 = vmul.f32 %v4584_v10, %v956_v47  ;;  %vm4634_vm3 = vcmp.eq.f32.partialorder %v948_v33, 8.507059e+37  ;;  %v965_v47 = vand.u32 2147483648, %v4567_v51 }
 0x302   :  { %3462 = vpow2.f32 %v3171_v19  ;;  %v943_v19 = vadd.f32 %v4576_v26, %v942_v38 }
 0x303   :  { %3464 = vrcp.f32 %v4582_v0 }
 0x304   :  { %v879_v49 = vpop.f32.mrf.mxu3  ;;  %3466 = vrcp.f32 %v4586_v50  ;;  %v947_v38 = vsel %vm4630_vm1, %v4576_v26, %v943_v19  ;;  %vm1019_vm1 = vweird.f32 %v4586_v50 }
 0x305   :  { %v899_v20 = vadd.f32 %v879_v49, %v6679_v36 }
 0x307   :  { %v3461_v46 = vpop.eup %3460  ;;  %v3173_v14 = vmul.f32 -1.442695, %v899_v20  ;;  %v987_v20 = vmul.f32 %v4588_v62, %v986_v12  ;;  %v958_v12 = vadd.f32 %v4584_v10, %v957_v45  ;;  %v995_v45 = vand.u32 2147483648, %v4569_v57 }
 0x308   :  { %v3463_v55 = vpop.eup %3462  ;;  %v4601_v42 = vadd.f32 1.0, %v3461_v46  ;;  %v1002_v46 = vmul.f32 %v4590_v60, %v1001_v25  ;;  %v1025_v25 = vand.u32 2147483648, %v4586_v50 }
 0x309   :  { %3468 = vpow2.f32 %v3173_v14  ;;  %v4604_v56 = vpop.eup %3464  ;;  %v4606_v13 = vadd.f32 1.0, %v3463_v55  ;;  %v988_v33 = vadd.f32 %v4588_v62, %v987_v20  ;;  %v962_v36 = vsel %vm4664_vm11, %v4584_v10, %v958_v12 }
 0x30a   :  { %v4608_v48 = vpop.eup %3466  ;;  %3470 = vrcp.f32 %v4601_v42  ;;  %v970_v49 = vmul.f32 %v4604_v56, %v4582_v0  ;;  %v1003_v19 = vadd.f32 %v4590_v60, %v1002_v46  ;;  %v996_v1 = vor.u32 1.1754944e-38, %v995_v45 }
 0x30b   :  { %v1015_v18 = vmul.f32 %v4608_v48, %v4586_v50  ;;  %3472 = vrcp.f32 %v4606_v13  ;;  %v1011_v20 = vor.u32 1.1754944e-38, %v1010_v16  ;;  %v980_v12 = vand.u32 2147483648, %v4582_v0  ;;  %v6694_v16 = vld [vmem:[#allocation8_spill] sm:$0xff] }
 0x30c   :  { %v882_v59 = vpop.f32.mrf.mxu3  ;;  %v1007_v44 = vsel %vm4681_vm14, %v4590_v60, %v1003_v19  ;;  %vm975_vm0 = vweird.f32 %v4604_v56  ;;  %v978_v46 = vand.u32 2147483647, %v4582_v0  ;;  %vm1034_vm14 = vweird.f32 %v4606_v13 }
 0x30d   :  { %v900_v11 = vadd.f32 %v882_v59, %v6680_v8  ;;  %v971_v59 = vsub.f32 1.0, %v970_v49  ;;  %v6687_v49 = vld [vmem:[#allocation6_spill] sm:$0xff] }
 0x30e   :  { %vm979_vm10 = vcmp.eq.f32.partialorder %v978_v46, 8.507059e+37 }
 0x30f   :  { %v3469_v61 = vpop.eup %3468  ;;  %3474 = vtanh.f32 %v900_v11  ;;  %v972_v7 = vmul.f32 %v4604_v56, %v971_v59 }
 0x310   :  { %v4626_v14 = vadd.f32 1.0, %v3469_v61  ;;  %v4651_v53 = vpop.eup %3470  ;;  %v1016_v61 = vsub.f32 1.0, %v1015_v18  ;;  %v993_v18 = vand.u32 2147483647, %v4569_v57 }
 0x311   :  { %v4668_v11 = vpop.eup %3472  ;;  %v1045_v8 = vmul.f32 %v4651_v53, %v4601_v42  ;;  %v973_v60 = vadd.f32 %v4604_v56, %v972_v7  ;;  %vm1050_vm9 = vweird.f32 %v4651_v53 }
 0x312   :  { %3476 = vrcp.f32 %v4626_v14  ;;  %v1017_v57 = vmul.f32 %v4608_v48, %v1016_v61  ;;  %v1030_v10 = vmul.f32 %v4668_v11, %v4606_v13  ;;  %vm994_vm6 = vcmp.eq.f32.partialorder %v993_v18, 8.507059e+37 }
 0x313   :  { %vm1035_vm11 = vweird.f32 %v4668_v11 }
 0x314   :  { %v885_v26 = vpop.f32.mrf.mxu3  ;;  %v1018_v19 = vadd.f32 %v4608_v48, %v1017_v57 }
 0x315   :  { %v901_v34 = vadd.f32 %v885_v26, %v6687_v49  ;;  %v966_v26 = vor.u32 1.1754944e-38, %v965_v47  ;;  %v1008_v49 = vand.u32 2147483647, %v4571_v30  ;;  %v952_v30 = vsel %vm4634_vm3, %v951_v9, %v947_v38  ;;  %v3475_v21 = vpop.eup %3474 }
 0x316   :  { %v992_v47 = vsel %vm4672_vm12, %v4588_v62, %v988_v33  ;;  %v1046_v38 = vsub.f32 1.0, %v1045_v8  ;;  %vm1020_vm3 = vweird.f32 %v4608_v48  ;;  %v1080_v33 = vmul.f32 %v3475_v21, %v952_v30 }
 0x317   :  { %3478 = vtanh.f32 %v901_v34  ;;  %v967_v55 = vsel %vm4645_vm7, %v966_v26, %v962_v36  ;;  %vm1009_vm15 = vcmp.eq.f32.partialorder %v1008_v49, 8.507059e+37  ;;  %v997_v62 = vsel %vm994_vm6, %v996_v1, %v992_v47  ;;  %vm4719_vm4 = vmor %vm1019_vm1, %vm1020_vm3 }
 0x318   :  { %v4703_v59 = vpop.eup %3476  ;;  %v1012_v9 = vsel %vm1009_vm15, %v1011_v20, %v1007_v44  ;;  %v1031_v44 = vsub.f32 1.0, %v1030_v10  ;;  %v1077_v7 = vmul.f32 %v997_v62, %v4496_v5  ;;  %v1023_v34 = vand.u32 2147483647, %v4586_v50  ;;  %vm976_vm7 = vmor %vm974_vm5, %vm975_vm0 }
 0x319   :  { %v1060_v36 = vmul.f32 %v4703_v59, %v4626_v14  ;;  %v1078_v8 = vmul.f32 %v1012_v9, %v4491_v63  ;;  %v1047_v18 = vmul.f32 %v4651_v53, %v1046_v38  ;;  %v1022_v63 = vsel %vm4719_vm4, %v4608_v48, %v1018_v19  ;;  %vm4762_vm6 = vmor %vm1034_vm14, %vm1035_vm11 }
 0x31a   :  { %v4726_v26 = vadd.f32 %v1080_v33, %v1077_v7  ;;  %v1026_v5 = vor.u32 1.1754944e-38, %v1025_v25  ;;  %v977_v50 = vsel %vm976_vm7, %v4604_v56, %v973_v60  ;;  %v1032_v0 = vmul.f32 %v4668_v11, %v1031_v44 }
 0x31b   :  { %v1061_v57 = vsub.f32 1.0, %v1060_v36  ;;  %v981_v30 = vor.u32 1.1754944e-38, %v980_v12  ;;  %vm1024_vm8 = vcmp.eq.f32.partialorder %v1023_v34, 8.507059e+37  ;;  %v1048_v20 = vadd.f32 %v4651_v53, %v1047_v18 }
 0x31c   :  { %v888_v61 = vpop.f32.mrf.mxu3  ;;  %v1027_v47 = vsel %vm1024_vm8, %v1026_v5, %v1022_v63  ;;  %vm1049_vm12 = vweird.f32 %v4601_v42  ;;  %v1053_v12 = vand.u32 2147483647, %v4601_v42  ;;  %v1033_v62 = vadd.f32 %v4668_v11, %v1032_v0 }
 0x31d   :  { %v3479_v45 = vpop.eup %3478  ;;  %v902_v1 = vadd.f32 %v888_v61, %v6694_v16  ;;  %v982_v10 = vsel %vm979_vm10, %v981_v30, %v977_v50  ;;  %v1062_v48 = vmul.f32 %v4703_v59, %v1061_v57  ;;  %v1079_v9 = vmul.f32 %v1027_v47, %v4509_v37  ;;  %vm4748_vm13 = vmor %vm1049_vm12, %vm1050_vm9 }
 0x31e   :  { %v1081_v49 = vmul.f32 %v3479_v45, %v967_v55  ;;  %v1055_v55 = vand.u32 2147483648, %v4601_v42  ;;  %v1040_v33 = vand.u32 2147483648, %v4606_v13  ;;  %v1052_v61 = vsel %vm4748_vm13, %v4651_v53, %v1048_v20 }
 0x31f   :  { %3480 = vtanh.f32 %v902_v1  ;;  %v1038_v19 = vand.u32 2147483647, %v4606_v13  ;;  %v1063_v36 = vadd.f32 %v4703_v59, %v1062_v48  ;;  %vm1065_vm15 = vweird.f32 %v4703_v59 }
 0x320   :  { %v4728_v51 = vadd.f32 %v1081_v49, %v1078_v8  ;;  %v1056_v25 = vor.u32 1.1754944e-38, %v1055_v55  ;;  %vm1054_vm0 = vcmp.eq.f32.partialorder %v1053_v12, 8.507059e+37  ;;  %v1037_v53 = vsel %vm4762_vm6, %v4668_v11, %v1033_v62 }
 0x321   :  { %v1070_v1 = vand.u32 2147483648, %v4626_v14  ;;  %v1041_v7 = vor.u32 1.1754944e-38, %v1040_v33  ;;  %vm1064_vm1 = vweird.f32 %v4626_v14  ;;  %v1068_v8 = vand.u32 2147483647, %v4626_v14 }
 0x322   :  { %3482 = vtanh.f32 %v4728_v51  ;;  %v1057_v44 = vsel %vm1054_vm0, %v1056_v25, %v1052_v61  ;;  %vm1039_vm3 = vcmp.eq.f32.partialorder %v1038_v19, 8.507059e+37  ;;  %vm1066_vm4 = vmor %vm1064_vm1, %vm1065_vm15  ;;  %v1117_v25 = vld [vmem:[%s6614_s3 + $0x7] sm:$0x1] }
 0x323   :  { %3484 = vtanh.f32 %v4726_v26  ;;  %v1042_v34 = vsel %vm1039_vm3, %v1041_v7, %v1037_v53  ;;  %v1067_v21 = vsel %vm1066_vm4, %v4703_v59, %v1063_v36  ;;  %v1071_v18 = vor.u32 1.1754944e-38, %v1070_v1 }
 0x324   :  { %vm1069_vm5 = vcmp.eq.f32.partialorder %v1068_v8, 8.507059e+37 }
 0x325   :  { %v3481_v56 = vpop.eup %3480  ;;  %v1072_v50 = vsel %vm1069_vm5, %v1071_v18, %v1067_v21 }
 0x326   :  { %v1082_v60 = vmul.f32 %v3481_v56, %v982_v10 }
 0x328   :  { %v3483_v42 = vpop.eup %3482  ;;  %v4758_v45 = vadd.f32 %v1082_v60, %v1079_v9 }
 0x329   :  { %v3485_v13 = vpop.eup %3484  ;;  %v1090_v49 = vmul.f32 %v3483_v42, %v1057_v44  ;;  %v1114_v42 = vld [vmem:[%s6614_s3 + $0x2] sm:$0x1] }
 0x32a   :  { %3486 = vtanh.f32 %v4758_v45  ;;  %v1089_v46 = vmul.f32 %v3485_v13, %v1042_v34 }
 0x32b   :  { %v1093_v11 = vmul.f32 %v1090_v49, %v4266_v31  ;;  %v1104_v63 = vmul.f32 %v1090_v49, %v4235_v2 }
 0x32c   :  { %v1092_v0 = vmul.f32 %v1089_v46, %v4188_v52  ;;  %v1103_v14 = vmul.f32 %v1089_v46, %v4237_v43 }
 0x32e   :  { %v1095_v59 = vadd.f32 %v1093_v11, %v1092_v0  ;;  %v1106_v20 = vadd.f32 %v1104_v63, %v1103_v14  ;;  %v6701_v14 = vld [vmem:[#allocation2_spill] sm:$0xff] }
 0x330   :  { %v3487_v5 = vpop.eup %3486 }
 0x331   :  { %v1091_v57 = vmul.f32 %v3487_v5, %v1072_v50 }
 0x333   :  { %v1094_v30 = vmul.f32 %v1091_v57, %v4270_v4  ;;  %v1105_v47 = vmul.f32 %v1091_v57, %v4268_v27  ;;  %1133 = vmatpush.msrb.mxu1 %v1091_v57 }
 0x335   :  { %1134 = vmatpush.msrb.mxu1 %v1090_v49  ;;  %v1096_v10 = vadd.f32 %v1095_v59, %v1094_v30  ;;  %v1107_v55 = vadd.f32 %v1106_v20, %v1105_v47  ;;  %v6702_v47 = vld [vmem:[#allocation4_spill] sm:$0xff] }
 0x337   :  { %v1097_v56 = vrot.slane %v1096_v10, 4  ;;  %v1108_v48 = vrot.slane %v1107_v55, 4  ;;  %1135 = vmatpush.msrb.mxu1 %v1089_v46 }
 0x338   :  { %3174 = vmatmul.msk.f32.vlgmr.msrb.gmra.mxu1 %vm225_vm2, %v3936_v23 }
 0x339   :  { %v1098_v12 = vadd.f32 %v1097_v56, %v1096_v10  ;;  %v1109_v62 = vadd.f32 %v1108_v48, %v1107_v55 }
 0x33b   :  { %v1099_v9 = vrot.slane %v1098_v12, 2  ;;  %v1110_v60 = vrot.slane %v1109_v62, 2 }
 0x33d   :  { %v1100_v38 = vadd.f32 %v1099_v9, %v1098_v12  ;;  %v1111_v33 = vadd.f32 %v1110_v60, %v1109_v62 }
 0x33f   :  { %v1101_v61 = vrot.slane %v1100_v38, 1  ;;  %v1112_v19 = vrot.slane %v1111_v33, 1 }
 0x340   :  { %3175 = vmatmul.msk.f32.gmra.mxu1 %vm225_vm2, %v3951_v28 }
 0x341   :  { %v1102_v37 = vadd.f32 %v1101_v61, %v1100_v38  ;;  %v1113_v36 = vadd.f32 %v1112_v19, %v1111_v33  ;;  %v6703_v33 = vld [vmem:[#allocation5_spill] sm:$0xff] }
 0x343   :  { %v1115_v53 = vadd.f32 %v1114_v42, %v1102_v37  ;;  %v1118_v13 = vadd.f32 %v1117_v25, %v1113_v36  ;;  %v6704_v42 = vld [vmem:[#allocation7_spill] sm:$0xff] }
 0x345   :  { %1116 = vst [vmem:[%s6614_s3 + $0x2] sm:$0x1] %v1115_v53 }
 0x346   :  { %1119 = vst [vmem:[%s6614_s3 + $0x7] sm:$0x1] %v1118_v13 }
 0x348   :  { %3176 = vmatmul.msk.f32.gmra.mxu1 %vm225_vm2, %v3938_v24 }
 0x350   :  { %3177 = vmatmul.msk.f32.gmra.mxu1 %vm225_vm2, %v3953_v29 }
 0x358   :  { %3178 = vmatmul.msk.f32.gmra.mxu1 %vm225_vm2, %v3916_v15 }
 0x360   :  { %3179 = vmatmul.msk.f32.gmra.mxu1 %vm225_vm2, %v3921_v17 }
 0x368   :  { %3180 = vmatmul.msk.f32.gmra.mxu1 %vm225_vm2, %v3986_v39 }
 0x370   :  { %3181 = vmatmul.msk.f32.gmra.mxu1 %vm225_vm2, %v3963_v32 }
 0x378   :  { %3182 = vmatmul.msk.f32.gmra.mxu1 %vm225_vm2, %v3992_v40 }
 0x380   :  { %3183 = vmatmul.msk.f32.gmra.mxu1 %vm225_vm2, %v3996_v41 }
 0x388   :  { %3184 = vmatmul.msk.f32.gmra.mxu1 %vm225_vm2, %v3932_v22 }
 0x390   :  { %3185 = vmatmul.msk.f32.gmra.mxu1 %vm225_vm2, %v3973_v35 }
 0x3b5   :  { %v1137_v1 = vpop.f32.mrf.mxu1 }
 0x3b6   :  { %v1173_v49 = vadd.f32 %v1137_v1, %v4002_v54 }
 0x3b8   :  { %v3186_v21 = vmul.f32 -1.442695, %v1173_v49 }
 0x3ba   :  { %3488 = vpow2.f32 %v3186_v21 }
 0x3bd   :  { %v1140_v44 = vpop.f32.mrf.mxu1 }
 0x3be   :  { %v1174_v46 = vadd.f32 %v1140_v44, %v4007_v58 }
 0x3c0   :  { %v3187_v63 = vmul.f32 -1.442695, %v1174_v46  ;;  %v3489_v0 = vpop.eup %3488 }
 0x3c1   :  { %v4824_v20 = vadd.f32 1.0, %v3489_v0 }
 0x3c2   :  { %3490 = vpow2.f32 %v3187_v63 }
 0x3c3   :  { %vm1226_vm8 = vweird.f32 %v4824_v20 }
 0x3c5   :  { %v1143_v7 = vpop.f32.mrf.mxu1 }
 0x3c6   :  { %v1175_v30 = vadd.f32 %v1143_v7, %v6701_v14 }
 0x3c8   :  { %v3188_v55 = vmul.f32 -1.442695, %v1175_v30  ;;  %v3491_v56 = vpop.eup %3490 }
 0x3c9   :  { %v4827_v9 = vadd.f32 1.0, %v3491_v56 }
 0x3cb   :  { %vm1241_vm11 = vweird.f32 %v4827_v9 }
 0x3cd   :  { %v1146_v8 = vpop.f32.mrf.mxu1 }
 0x3ce   :  { %v1176_v18 = vadd.f32 %v1146_v8, %v4014_v3 }
 0x3d0   :  { %v3189_v50 = vmul.f32 -1.442695, %v1176_v18  ;;  %v6705_v18 = vld [vmem:[#allocation10_spill] sm:$0xff] }
 0x3d2   :  { %3492 = vpow2.f32 %v3189_v50 }
 0x3d5   :  { %v1149_v34 = vpop.f32.mrf.mxu1 }
 0x3d6   :  { %v1177_v11 = vadd.f32 %v1149_v34, %v4017_v6 }
 0x3d8   :  { %v3190_v57 = vmul.f32 -1.442695, %v1177_v11  ;;  %v3493_v12 = vpop.eup %3492 }
 0x3d9   :  { %v4829_v60 = vadd.f32 1.0, %v3493_v12 }
 0x3da   :  { %3494 = vpow2.f32 %v3190_v57 }
 0x3db   :  { %3496 = vrcp.f32 %v4824_v20  ;;  %vm1271_vm15 = vweird.f32 %v4829_v60 }
 0x3dc   :  { %3498 = vpow2.f32 %v3188_v55 }
 0x3dd   :  { %v1152_v5 = vpop.f32.mrf.mxu1 }
 0x3de   :  { %v1178_v59 = vadd.f32 %v1152_v5, %v6702_v47 }
 0x3e0   :  { %v3191_v48 = vmul.f32 -1.442695, %v1178_v59  ;;  %v3495_v62 = vpop.eup %3494 }
 0x3e1   :  { %v4831_v38 = vadd.f32 1.0, %v3495_v62  ;;  %v4836_v37 = vpop.eup %3496 }
 0x3e2   :  { %3500 = vpow2.f32 %v3191_v48  ;;  %v3499_v36 = vpop.eup %3498  ;;  %v1222_v44 = vmul.f32 %v4836_v37, %v4824_v20  ;;  %vm1227_vm7 = vweird.f32 %v4836_v37 }
 0x3e3   :  { %3502 = vrcp.f32 %v4827_v9  ;;  %v4842_v7 = vadd.f32 1.0, %v3499_v36  ;;  %v1230_v36 = vand.u32 2147483647, %v4824_v20  ;;  %vm4890_vm10 = vmor %vm1226_vm8, %vm1227_vm7  ;;  %vm1286_vm3 = vweird.f32 %v4831_v38 }
 0x3e4   :  { %3504 = vrcp.f32 %v4829_v60  ;;  %v1223_v63 = vsub.f32 1.0, %v1222_v44  ;;  %v1245_v44 = vand.u32 2147483647, %v4827_v9 }
 0x3e5   :  { %v1155_v10 = vpop.f32.mrf.mxu1  ;;  %3506 = vrcp.f32 %v4831_v38  ;;  %vm4894_vm9 = vcmp.eq.f32.partialorder %v1230_v36, 8.507059e+37 }
 0x3e6   :  { %v1179_v61 = vadd.f32 %v1155_v10, %v6703_v33  ;;  %v1224_v56 = vmul.f32 %v4836_v37, %v1223_v63  ;;  %vm4905_vm13 = vcmp.eq.f32.partialorder %v1245_v44, 8.507059e+37  ;;  %v1292_v44 = vand.u32 2147483648, %v4831_v38 }
 0x3e8   :  { %v3192_v53 = vmul.f32 -1.442695, %v1179_v61  ;;  %v3501_v1 = vpop.eup %3500 }
 0x3e9   :  { %v4844_v8 = vpop.eup %3502  ;;  %v4846_v49 = vadd.f32 1.0, %v3501_v1 }
 0x3ea   :  { %v4848_v34 = vpop.eup %3504  ;;  %v1237_v5 = vmul.f32 %v4844_v8, %v4827_v9  ;;  %vm1242_vm12 = vweird.f32 %v4844_v8 }
 0x3eb   :  { %v4850_v46 = vpop.eup %3506  ;;  %v1267_v57 = vmul.f32 %v4848_v34, %v4829_v60  ;;  %vm1272_vm14 = vweird.f32 %v4848_v34  ;;  %vm4924_vm0 = vmor %vm1241_vm11, %vm1242_vm12  ;;  %vm1256_vm12 = vweird.f32 %v4842_v7 }
 0x3ec   :  { %v1282_v30 = vmul.f32 %v4850_v46, %v4831_v38  ;;  %v1238_v10 = vsub.f32 1.0, %v1237_v5  ;;  %v6706_v5 = vld [vmem:[#allocation9_spill] sm:$0xff]  ;;  %vm1287_vm6 = vweird.f32 %v4850_v46  ;;  %vm4932_vm1 = vmor %vm1271_vm15, %vm1272_vm14 }
 0x3ed   :  { %v1158_v19 = vpop.f32.mrf.mxu1  ;;  %v1268_v48 = vsub.f32 1.0, %v1267_v57  ;;  %vm4941_vm4 = vmor %vm1286_vm3, %vm1287_vm6 }
 0x3ee   :  { %v1180_v25 = vadd.f32 %v1158_v19, %v6704_v42  ;;  %v1283_v62 = vsub.f32 1.0, %v1282_v30  ;;  %v1239_v1 = vmul.f32 %v4844_v8, %v1238_v10 }
 0x3ef   :  { %v1269_v63 = vmul.f32 %v4848_v34, %v1268_v48 }
 0x3f0   :  { %v3193_v13 = vmul.f32 -1.442695, %v1180_v25  ;;  %v1284_v57 = vmul.f32 %v4850_v46, %v1283_v62  ;;  %v1240_v62 = vadd.f32 %v4844_v8, %v1239_v1  ;;  %v1277_v1 = vand.u32 2147483648, %v4829_v60 }
 0x3f2   :  { %3508 = vpow2.f32 %v3193_v13  ;;  %v1225_v13 = vadd.f32 %v4836_v37, %v1224_v56  ;;  %v1247_v56 = vand.u32 2147483648, %v4827_v9  ;;  %v1244_v42 = vsel %vm4924_vm0, %v4844_v8, %v1240_v62 }
 0x3f3   :  { %3510 = vpow2.f32 %v3192_v53  ;;  %v1232_v53 = vand.u32 2147483648, %v4824_v20  ;;  %v1278_v6 = vor.u32 1.1754944e-38, %v1277_v1 }
 0x3f4   :  { %3512 = vrcp.f32 %v4842_v7  ;;  %v1229_v48 = vsel %vm4890_vm10, %v4836_v37, %v1225_v13  ;;  %v1285_v13 = vadd.f32 %v4850_v46, %v1284_v57  ;;  %vm1301_vm10 = vweird.f32 %v4846_v49 }
 0x3f5   :  { %v1161_v21 = vpop.f32.mrf.mxu1  ;;  %3514 = vrcp.f32 %v4846_v49  ;;  %v1233_v20 = vor.u32 1.1754944e-38, %v1232_v53  ;;  %v1270_v53 = vadd.f32 %v4848_v34, %v1269_v63  ;;  %v1293_v63 = vor.u32 1.1754944e-38, %v1292_v44 }
 0x3f6   :  { %v1181_v11 = vadd.f32 %v1161_v21, %v6705_v18  ;;  %v1289_v47 = vsel %vm4941_vm4, %v4850_v46, %v1285_v13  ;;  %v1305_v44 = vand.u32 2147483647, %v4846_v49 }
 0x3f8   :  { %v3509_v50 = vpop.eup %3508  ;;  %v3194_v0 = vmul.f32 -1.442695, %v1181_v11  ;;  %vm1306_vm14 = vcmp.eq.f32.partialorder %v1305_v44, 8.507059e+37 }
 0x3f9   :  { %v3511_v59 = vpop.eup %3510  ;;  %v4861_v55 = vadd.f32 1.0, %v3509_v50 }
 0x3fa   :  { %3516 = vpow2.f32 %v3194_v0  ;;  %v4864_v12 = vpop.eup %3512  ;;  %v4866_v61 = vadd.f32 1.0, %v3511_v59 }
 0x3fb   :  { %v4868_v25 = vpop.eup %3514  ;;  %3518 = vrcp.f32 %v4861_v55  ;;  %v1252_v11 = vmul.f32 %v4864_v12, %v4842_v7  ;;  %vm1257_vm8 = vweird.f32 %v4864_v12 }
 0x3fc   :  { %v1297_v0 = vmul.f32 %v4868_v25, %v4846_v49  ;;  %3520 = vrcp.f32 %v4866_v61  ;;  %vm1316_vm4 = vweird.f32 %v4866_v61 }
 0x3fd   :  { %v1164_v19 = vpop.f32.mrf.mxu1  ;;  %v1253_v36 = vsub.f32 1.0, %v1252_v11  ;;  %v6713_v11 = vld [vmem:[#allocation6_spill] sm:$0xff] }
 0x3fe   :  { %v1182_v50 = vadd.f32 %v1164_v19, %v6706_v5  ;;  %v1298_v59 = vsub.f32 1.0, %v1297_v0  ;;  %v1275_v0 = vand.u32 2147483647, %v4829_v60  ;;  %v1307_v19 = vand.u32 2147483648, %v4846_v49 }
 0x3ff   :  { %v1254_v33 = vmul.f32 %v4864_v12, %v1253_v36 }
 0x400   :  { %v3517_v21 = vpop.eup %3516  ;;  %3522 = vtanh.f32 %v1182_v50  ;;  %v1299_v60 = vmul.f32 %v4868_v25, %v1298_v59  ;;  %vm1276_vm5 = vcmp.eq.f32.partialorder %v1275_v0, 8.507059e+37 }
 0x401   :  { %v4886_v30 = vadd.f32 1.0, %v3517_v21  ;;  %v4911_v21 = vpop.eup %3518  ;;  %v1255_v46 = vadd.f32 %v4864_v12, %v1254_v33 }
 0x402   :  { %v4928_v50 = vpop.eup %3520  ;;  %v1327_v18 = vmul.f32 %v4911_v21, %v4861_v55  ;;  %v1300_v59 = vadd.f32 %v4868_v25, %v1299_v60  ;;  %vm1332_vm15 = vweird.f32 %v4911_v21 }
 0x403   :  { %3524 = vrcp.f32 %v4886_v30  ;;  %v1312_v8 = vmul.f32 %v4928_v50, %v4866_v61  ;;  %vm1317_vm0 = vweird.f32 %v4928_v50 }
 0x405   :  { %v1167_v37 = vpop.f32.mrf.mxu1 }
 0x406   :  { %v1183_v5 = vadd.f32 %v1167_v37, %v6713_v11  ;;  %v1248_v37 = vor.u32 1.1754944e-38, %v1247_v56  ;;  %v1290_v11 = vand.u32 2147483647, %v4831_v38  ;;  %v1234_v38 = vsel %vm4894_vm9, %v1233_v20, %v1229_v48  ;;  %v3523_v14 = vpop.eup %3522 }
 0x407   :  { %v1274_v56 = vsel %vm4932_vm1, %v4848_v34, %v1270_v53  ;;  %v1328_v48 = vsub.f32 1.0, %v1327_v18  ;;  %vm1302_vm9 = vweird.f32 %v4868_v25  ;;  %v1362_v36 = vmul.f32 %v3523_v14, %v1234_v38 }
 0x408   :  { %3526 = vtanh.f32 %v1183_v5  ;;  %v1262_v5 = vand.u32 2147483648, %v4842_v7  ;;  %v1249_v10 = vsel %vm4905_vm13, %v1248_v37, %v1244_v42  ;;  %vm1291_vm7 = vcmp.eq.f32.partialorder %v1290_v11, 8.507059e+37  ;;  %vm4979_vm11 = vmor %vm1301_vm10, %vm1302_vm9 }
 0x409   :  { %v4963_v62 = vpop.eup %3524  ;;  %v1279_v34 = vsel %vm1276_vm5, %v1278_v6, %v1274_v56  ;;  %v1294_v20 = vsel %vm1291_vm7, %v1293_v63, %v1289_v47  ;;  %v1313_v47 = vsub.f32 1.0, %v1312_v8  ;;  %v1260_v11 = vand.u32 2147483647, %v4842_v7  ;;  %vm1258_vm13 = vmor %vm1256_vm12, %vm1257_vm8 }
 0x40a   :  { %v1342_v42 = vmul.f32 %v4963_v62, %v4886_v30  ;;  %v1359_v33 = vmul.f32 %v1279_v34, %v4726_v26  ;;  %v1360_v18 = vmul.f32 %v1294_v20, %v4728_v51  ;;  %v1329_v57 = vmul.f32 %v4911_v21, %v1328_v48  ;;  %vm5022_vm5 = vmor %vm1316_vm4, %vm1317_vm0 }
 0x40b   :  { %v1304_v26 = vsel %vm4979_vm11, %v4868_v25, %v1300_v59  ;;  %v1308_v51 = vor.u32 1.1754944e-38, %v1307_v19  ;;  %v1259_v49 = vsel %vm1258_vm13, %v4864_v12, %v1255_v46  ;;  %v1314_v7 = vmul.f32 %v4928_v50, %v1313_v47 }
 0x40c   :  { %v4986_v0 = vadd.f32 %v1362_v36, %v1359_v33  ;;  %v1343_v9 = vsub.f32 1.0, %v1342_v42  ;;  %v1263_v60 = vor.u32 1.1754944e-38, %v1262_v5  ;;  %vm1261_vm6 = vcmp.eq.f32.partialorder %v1260_v11, 8.507059e+37 }
 0x40d   :  { %v1170_v53 = vpop.f32.mrf.mxu1  ;;  %v1309_v38 = vsel %vm1306_vm14, %v1308_v51, %v1304_v26  ;;  %v1330_v56 = vadd.f32 %v4911_v21, %v1329_v57  ;;  %v1337_v8 = vand.u32 2147483648, %v4861_v55  ;;  %vm1331_vm1 = vweird.f32 %v4861_v55 }
 0x40e   :  { %v3527_v13 = vpop.eup %3526  ;;  %v1184_v6 = vadd.f32 %v1170_v53, %v6694_v16  ;;  %v1264_v63 = vsel %vm1261_vm6, %v1263_v60, %v1259_v49  ;;  %v1344_v25 = vmul.f32 %v4963_v62, %v1343_v9  ;;  %v1335_v5 = vand.u32 2147483647, %v4861_v55  ;;  %vm5008_vm3 = vmor %vm1331_vm1, %vm1332_vm15 }
 0x40f   :  { %v1363_v1 = vmul.f32 %v3527_v13, %v1249_v10  ;;  %v1315_v10 = vadd.f32 %v4928_v50, %v1314_v7  ;;  %v1361_v34 = vmul.f32 %v1309_v38, %v4758_v45  ;;  %v1322_v48 = vand.u32 2147483648, %v4866_v61 }
 0x410   :  { %3528 = vtanh.f32 %v1184_v6  ;;  %v1334_v36 = vsel %vm5008_vm3, %v4911_v21, %v1330_v56  ;;  %v1320_v53 = vand.u32 2147483647, %v4866_v61  ;;  %v1338_v13 = vor.u32 1.1754944e-38, %v1337_v8 }
 0x411   :  { %v4988_v37 = vadd.f32 %v1363_v1, %v1360_v18  ;;  %v1345_v19 = vadd.f32 %v4963_v62, %v1344_v25  ;;  %vm1347_vm7 = vweird.f32 %v4963_v62  ;;  %vm1336_vm8 = vcmp.eq.f32.partialorder %v1335_v5, 8.507059e+37 }
 0x412   :  { %v1319_v21 = vsel %vm5022_vm5, %v4928_v50, %v1315_v10  ;;  %v1352_v42 = vand.u32 2147483648, %v4886_v30  ;;  %v1339_v6 = vsel %vm1336_vm8, %v1338_v13, %v1334_v36  ;;  %v1323_v47 = vor.u32 1.1754944e-38, %v1322_v48 }
 0x413   :  { %3530 = vtanh.f32 %v4988_v37  ;;  %vm1346_vm10 = vweird.f32 %v4886_v30  ;;  %v1350_v33 = vand.u32 2147483647, %v4886_v30  ;;  %vm1321_vm9 = vcmp.eq.f32.partialorder %v1320_v53, 8.507059e+37  ;;  %v1396_v53 = vld [vmem:[%s6614_s3 + $0x3] sm:$0x1] }
 0x414   :  { %3532 = vtanh.f32 %v4986_v0  ;;  %vm1348_vm11 = vmor %vm1346_vm10, %vm1347_vm7  ;;  %v1324_v1 = vsel %vm1321_vm9, %v1323_v47, %v1319_v21  ;;  %v1353_v11 = vor.u32 1.1754944e-38, %v1352_v42 }
 0x415   :  { %v1349_v44 = vsel %vm1348_vm11, %v4963_v62, %v1345_v19  ;;  %vm1351_vm12 = vcmp.eq.f32.partialorder %v1350_v33, 8.507059e+37 }
 0x416   :  { %v3529_v12 = vpop.eup %3528  ;;  %v1354_v51 = vsel %vm1351_vm12, %v1353_v11, %v1349_v44  ;;  %v6726_v11 = vld [vmem:[#allocation3_spill] sm:$0xff] }
 0x417   :  { %v1364_v20 = vmul.f32 %v3529_v12, %v1264_v63 }
 0x419   :  { %v3531_v55 = vpop.eup %3530  ;;  %v5018_v59 = vadd.f32 %v1364_v20, %v1361_v34 }
 0x41a   :  { %v3533_v61 = vpop.eup %3532  ;;  %v1372_v18 = vmul.f32 %v3531_v55, %v1339_v6  ;;  %v1399_v55 = vld [vmem:[%s6614_s3 + $0x6] sm:$0x1] }
 0x41b   :  { %3534 = vtanh.f32 %v5018_v59  ;;  %v1371_v14 = vmul.f32 %v3533_v61, %v1324_v1 }
 0x41c   :  { %v1375_v50 = vmul.f32 %v1372_v18, %v4266_v31  ;;  %v1386_v57 = vmul.f32 %v1372_v18, %v4235_v2 }
 0x41d   :  { %v1374_v9 = vmul.f32 %v1371_v14, %v4188_v52  ;;  %v1385_v30 = vmul.f32 %v1371_v14, %v4237_v43 }
 0x41f   :  { %v1377_v62 = vadd.f32 %v1375_v50, %v1374_v9  ;;  %v1388_v38 = vadd.f32 %v1386_v57, %v1385_v30  ;;  %v6727_v30 = vld [vmem:[#allocation2_spill] sm:$0xff] }
 0x421   :  { %v3535_v26 = vpop.eup %3534 }
 0x422   :  { %v1373_v49 = vmul.f32 %v3535_v26, %v1354_v51 }
 0x424   :  { %v1376_v7 = vmul.f32 %v1373_v49, %v4270_v4  ;;  %v1387_v60 = vmul.f32 %v1373_v49, %v4268_v27  ;;  %1415 = vmatpush.msrb.mxu0 %v1373_v49 }
 0x426   :  { %1416 = vmatpush.msrb.mxu0 %v1372_v18  ;;  %v1378_v56 = vadd.f32 %v1377_v62, %v1376_v7  ;;  %v1389_v63 = vadd.f32 %v1388_v38, %v1387_v60  ;;  %v6728_v60 = vld [vmem:[#allocation4_spill] sm:$0xff] }
 0x428   :  { %v1379_v8 = vrot.slane %v1378_v56, 4  ;;  %v1390_v12 = vrot.slane %v1389_v63, 4  ;;  %1417 = vmatpush.msrb.mxu0 %v1371_v14 }
 0x429   :  { %3195 = vmatmul.msk.f32.vlgmr.msrb.gmra.mxu0 %vm225_vm2, %v3936_v23 }
 0x42a   :  { %v1380_v25 = vadd.f32 %v1379_v8, %v1378_v56  ;;  %v1391_v5 = vadd.f32 %v1390_v12, %v1389_v63 }
 0x42c   :  { %v1381_v10 = vrot.slane %v1380_v25, 2  ;;  %v1392_v34 = vrot.slane %v1391_v5, 2 }
 0x42e   :  { %v1382_v20 = vadd.f32 %v1381_v10, %v1380_v25  ;;  %v1393_v46 = vadd.f32 %v1392_v34, %v1391_v5 }
 0x430   :  { %v1383_v48 = vrot.slane %v1382_v20, 1  ;;  %v1394_v36 = vrot.slane %v1393_v46, 1 }
 0x431   :  { %3196 = vmatmul.msk.f32.gmra.mxu0 %vm225_vm2, %v3951_v28 }
 0x432   :  { %v1384_v13 = vadd.f32 %v1383_v48, %v1382_v20  ;;  %v1395_v45 = vadd.f32 %v1394_v36, %v1393_v46  ;;  %v6729_v46 = vld [vmem:[#allocation5_spill] sm:$0xff] }
 0x434   :  { %v1397_v19 = vadd.f32 %v1396_v53, %v1384_v13  ;;  %v1400_v21 = vadd.f32 %v1399_v55, %v1395_v45  ;;  %v6730_v53 = vld [vmem:[#allocation7_spill] sm:$0xff] }
 0x436   :  { %1398 = vst [vmem:[%s6614_s3 + $0x3] sm:$0x1] %v1397_v19 }
 0x437   :  { %1401 = vst [vmem:[%s6614_s3 + $0x6] sm:$0x1] %v1400_v21 }
 0x439   :  { %3197 = vmatmul.msk.f32.gmra.mxu0 %vm225_vm2, %v3938_v24 }
 0x441   :  { %3198 = vmatmul.msk.f32.gmra.mxu0 %vm225_vm2, %v3953_v29 }
 0x449   :  { %3199 = vmatmul.msk.f32.gmra.mxu0 %vm225_vm2, %v3916_v15 }
 0x451   :  { %3200 = vmatmul.msk.f32.gmra.mxu0 %vm225_vm2, %v3921_v17 }
 0x459   :  { %3201 = vmatmul.msk.f32.gmra.mxu0 %vm225_vm2, %v3986_v39 }
 0x461   :  { %3202 = vmatmul.msk.f32.gmra.mxu0 %vm225_vm2, %v3963_v32 }
 0x469   :  { %3203 = vmatmul.msk.f32.gmra.mxu0 %vm225_vm2, %v3992_v40 }
 0x471   :  { %3204 = vmatmul.msk.f32.gmra.mxu0 %vm225_vm2, %v3996_v41 }
 0x479   :  { %3205 = vmatmul.msk.f32.gmra.mxu0 %vm225_vm2, %v3932_v22 }
 0x481   :  { %3206 = vmatmul.msk.f32.gmra.mxu0 %vm225_vm2, %v3973_v35 }
 0x4a6   :  { %v1419_v61 = vpop.f32.mrf.mxu0 }
 0x4a7   :  { %v1455_v33 = vadd.f32 %v1419_v61, %v4002_v54 }
 0x4a9   :  { %v3207_v1 = vmul.f32 -1.442695, %v1455_v33 }
 0x4ab   :  { %3536 = vpow2.f32 %v3207_v1 }
 0x4ae   :  { %v1422_v42 = vpop.f32.mrf.mxu0 }
 0x4af   :  { %v1456_v44 = vadd.f32 %v1422_v42, %v4007_v58 }
 0x4b1   :  { %v3208_v57 = vmul.f32 -1.442695, %v1456_v44  ;;  %v3537_v9 = vpop.eup %3536 }
 0x4b2   :  { %v5084_v38 = vadd.f32 1.0, %v3537_v9 }
 0x4b3   :  { %3538 = vpow2.f32 %v3208_v57 }
 0x4b4   :  { %vm1508_vm14 = vweird.f32 %v5084_v38 }
 0x4b6   :  { %v1425_v6 = vpop.f32.mrf.mxu0 }
 0x4b7   :  { %v1457_v7 = vadd.f32 %v1425_v6, %v6727_v30 }
 0x4b9   :  { %v3209_v63 = vmul.f32 -1.442695, %v1457_v7  ;;  %v3539_v8 = vpop.eup %3538 }
 0x4ba   :  { %v5087_v10 = vadd.f32 1.0, %v3539_v8 }
 0x4bc   :  { %vm1523_vm0 = vweird.f32 %v5087_v10 }
 0x4be   :  { %v1428_v47 = vpop.f32.mrf.mxu0 }
 0x4bf   :  { %v1458_v14 = vadd.f32 %v1428_v47, %v4014_v3 }
 0x4c1   :  { %v3210_v51 = vmul.f32 -1.442695, %v1458_v14  ;;  %v6731_v14 = vld [vmem:[#allocation10_spill] sm:$0xff] }
 0x4c3   :  { %3540 = vpow2.f32 %v3210_v51 }
 0x4c6   :  { %v1431_v18 = vpop.f32.mrf.mxu0 }
 0x4c7   :  { %v1459_v50 = vadd.f32 %v1431_v18, %v6726_v11 }
 0x4c9   :  { %v3211_v49 = vmul.f32 -1.442695, %v1459_v50  ;;  %v3541_v25 = vpop.eup %3540 }
 0x4ca   :  { %v5089_v34 = vadd.f32 1.0, %v3541_v25 }
 0x4cb   :  { %3542 = vpow2.f32 %v3211_v49 }
 0x4cc   :  { %3544 = vrcp.f32 %v5084_v38  ;;  %vm1553_vm7 = vweird.f32 %v5089_v34 }
 0x4cd   :  { %3546 = vpow2.f32 %v3209_v63 }
 0x4ce   :  { %v1434_v26 = vpop.f32.mrf.mxu0 }
 0x4cf   :  { %v1460_v62 = vadd.f32 %v1434_v26, %v6728_v60 }
 0x4d1   :  { %v3212_v12 = vmul.f32 -1.442695, %v1460_v62  ;;  %v3543_v5 = vpop.eup %3542 }
 0x4d2   :  { %v5091_v20 = vadd.f32 1.0, %v3543_v5  ;;  %v5096_v13 = vpop.eup %3544 }
 0x4d3   :  { %3548 = vpow2.f32 %v3212_v12  ;;  %v3547_v45 = vpop.eup %3546  ;;  %v1504_v42 = vmul.f32 %v5096_v13, %v5084_v38  ;;  %vm1509_vm13 = vweird.f32 %v5096_v13 }
 0x4d4   :  { %3550 = vrcp.f32 %v5087_v10  ;;  %v5102_v6 = vadd.f32 1.0, %v3547_v45  ;;  %v1512_v45 = vand.u32 2147483647, %v5084_v38  ;;  %vm5150_vm6 = vmor %vm1508_vm14, %vm1509_vm13  ;;  %vm1568_vm9 = vweird.f32 %v5091_v20 }
 0x4d5   :  { %3552 = vrcp.f32 %v5089_v34  ;;  %v1505_v57 = vsub.f32 1.0, %v1504_v42  ;;  %v1527_v42 = vand.u32 2147483647, %v5087_v10 }
 0x4d6   :  { %v1437_v56 = vpop.f32.mrf.mxu0  ;;  %3554 = vrcp.f32 %v5091_v20  ;;  %vm5154_vm15 = vcmp.eq.f32.partialorder %v1512_v45, 8.507059e+37 }
 0x4d7   :  { %v1461_v48 = vadd.f32 %v1437_v56, %v6729_v46  ;;  %v1506_v8 = vmul.f32 %v5096_v13, %v1505_v57  ;;  %vm5165_vm3 = vcmp.eq.f32.partialorder %v1527_v42, 8.507059e+37  ;;  %v1574_v42 = vand.u32 2147483648, %v5091_v20 }
 0x4d9   :  { %v3213_v19 = vmul.f32 -1.442695, %v1461_v48  ;;  %v3549_v61 = vpop.eup %3548 }
 0x4da   :  { %v5104_v47 = vpop.eup %3550  ;;  %v5106_v33 = vadd.f32 1.0, %v3549_v61 }
 0x4db   :  { %v5108_v18 = vpop.eup %3552  ;;  %v1519_v26 = vmul.f32 %v5104_v47, %v5087_v10  ;;  %vm1524_vm1 = vweird.f32 %v5104_v47 }
 0x4dc   :  { %v5110_v44 = vpop.eup %3554  ;;  %v1549_v49 = vmul.f32 %v5108_v18, %v5089_v34  ;;  %vm1554_vm4 = vweird.f32 %v5108_v18  ;;  %vm5184_vm8 = vmor %vm1523_vm0, %vm1524_vm1  ;;  %vm1538_vm1 = vweird.f32 %v5102_v6 }
 0x4dd   :  { %v1564_v7 = vmul.f32 %v5110_v44, %v5091_v20  ;;  %v1520_v56 = vsub.f32 1.0, %v1519_v26  ;;  %v6732_v26 = vld [vmem:[#allocation9_spill] sm:$0xff]  ;;  %vm1569_vm5 = vweird.f32 %v5110_v44  ;;  %vm5192_vm10 = vmor %vm1553_vm7, %vm1554_vm4 }
 0x4de   :  { %v1440_v36 = vpop.f32.mrf.mxu0  ;;  %v1550_v12 = vsub.f32 1.0, %v1549_v49  ;;  %vm5201_vm11 = vmor %vm1568_vm9, %vm1569_vm5 }
 0x4df   :  { %v1462_v55 = vadd.f32 %v1440_v36, %v6730_v53  ;;  %v1565_v5 = vsub.f32 1.0, %v1564_v7  ;;  %v1521_v61 = vmul.f32 %v5104_v47, %v1520_v56 }
 0x4e0   :  { %v1551_v57 = vmul.f32 %v5108_v18, %v1550_v12 }
 0x4e1   :  { %v3214_v21 = vmul.f32 -1.442695, %v1462_v55  ;;  %v1566_v49 = vmul.f32 %v5110_v44, %v1565_v5  ;;  %v1522_v5 = vadd.f32 %v5104_v47, %v1521_v61  ;;  %v1559_v61 = vand.u32 2147483648, %v5089_v34 }
 0x4e3   :  { %3556 = vpow2.f32 %v3214_v21  ;;  %v1507_v21 = vadd.f32 %v5096_v13, %v1506_v8  ;;  %v1529_v8 = vand.u32 2147483648, %v5087_v10  ;;  %v1526_v53 = vsel %vm5184_vm8, %v5104_v47, %v1522_v5 }
 0x4e4   :  { %3558 = vpow2.f32 %v3213_v19  ;;  %v1514_v19 = vand.u32 2147483648, %v5084_v38  ;;  %v1560_v11 = vor.u32 1.1754944e-38, %v1559_v61 }
 0x4e5   :  { %3560 = vrcp.f32 %v5102_v6  ;;  %v1511_v12 = vsel %vm5150_vm6, %v5096_v13, %v1507_v21  ;;  %v1567_v21 = vadd.f32 %v5110_v44, %v1566_v49  ;;  %vm1583_vm6 = vweird.f32 %v5106_v33 }
 0x4e6   :  { %v1443_v1 = vpop.f32.mrf.mxu0  ;;  %3562 = vrcp.f32 %v5106_v33  ;;  %v1515_v38 = vor.u32 1.1754944e-38, %v1514_v19  ;;  %v1552_v19 = vadd.f32 %v5108_v18, %v1551_v57  ;;  %v1575_v57 = vor.u32 1.1754944e-38, %v1574_v42 }
 0x4e7   :  { %v1463_v50 = vadd.f32 %v1443_v1, %v6731_v14  ;;  %v1571_v60 = vsel %vm5201_vm11, %v5110_v44, %v1567_v21  ;;  %v1587_v42 = vand.u32 2147483647, %v5106_v33 }
 0x4e9   :  { %v3557_v51 = vpop.eup %3556  ;;  %v3215_v9 = vmul.f32 -1.442695, %v1463_v50  ;;  %vm1588_vm4 = vcmp.eq.f32.partialorder %v1587_v42, 8.507059e+37 }
 0x4ea   :  { %v3559_v62 = vpop.eup %3558  ;;  %v5121_v63 = vadd.f32 1.0, %v3557_v51 }
 0x4eb   :  { %3564 = vpow2.f32 %v3215_v9  ;;  %v5124_v25 = vpop.eup %3560  ;;  %v5126_v48 = vadd.f32 1.0, %v3559_v62 }
 0x4ec   :  { %v5128_v55 = vpop.eup %3562  ;;  %3566 = vrcp.f32 %v5121_v63  ;;  %v1534_v50 = vmul.f32 %v5124_v25, %v5102_v6  ;;  %vm1539_vm14 = vweird.f32 %v5124_v25 }
 0x4ed   :  { %v1579_v9 = vmul.f32 %v5128_v55, %v5106_v33  ;;  %3568 = vrcp.f32 %v5126_v48  ;;  %vm1598_vm11 = vweird.f32 %v5126_v48 }
 0x4ee   :  { %v1446_v36 = vpop.f32.mrf.mxu0  ;;  %v1535_v45 = vsub.f32 1.0, %v1534_v50  ;;  %v6739_v50 = vld [vmem:[#allocation6_spill] sm:$0xff] }
 0x4ef   :  { %v1464_v51 = vadd.f32 %v1446_v36, %v6732_v26  ;;  %v1580_v62 = vsub.f32 1.0, %v1579_v9  ;;  %v1557_v9 = vand.u32 2147483647, %v5089_v34  ;;  %v1589_v36 = vand.u32 2147483648, %v5106_v33 }
 0x4f0   :  { %v1536_v46 = vmul.f32 %v5124_v25, %v1535_v45 }
 0x4f1   :  { %v3565_v1 = vpop.eup %3564  ;;  %3570 = vtanh.f32 %v1464_v51  ;;  %v1581_v34 = vmul.f32 %v5128_v55, %v1580_v62  ;;  %vm1558_vm12 = vcmp.eq.f32.partialorder %v1557_v9, 8.507059e+37 }
 0x4f2   :  { %v5146_v7 = vadd.f32 1.0, %v3565_v1  ;;  %v5171_v1 = vpop.eup %3566  ;;  %v1537_v44 = vadd.f32 %v5124_v25, %v1536_v46 }
 0x4f3   :  { %v5188_v51 = vpop.eup %3568  ;;  %v1609_v14 = vmul.f32 %v5171_v1, %v5121_v63  ;;  %v1582_v62 = vadd.f32 %v5128_v55, %v1581_v34  ;;  %vm1614_vm7 = vweird.f32 %v5171_v1 }
 0x4f4   :  { %3572 = vrcp.f32 %v5146_v7  ;;  %v1594_v47 = vmul.f32 %v5188_v51, %v5126_v48  ;;  %vm1599_vm8 = vweird.f32 %v5188_v51 }
 0x4f6   :  { %v1449_v13 = vpop.f32.mrf.mxu0 }
 0x4f7   :  { %v1465_v26 = vadd.f32 %v1449_v13, %v6739_v50  ;;  %v1530_v13 = vor.u32 1.1754944e-38, %v1529_v8  ;;  %v1572_v50 = vand.u32 2147483647, %v5091_v20  ;;  %v1516_v20 = vsel %vm5154_vm15, %v1515_v38, %v1511_v12  ;;  %v3571_v30 = vpop.eup %3570 }
 0x4f8   :  { %v1556_v8 = vsel %vm5192_vm10, %v5108_v18, %v1552_v19  ;;  %v1610_v12 = vsub.f32 1.0, %v1609_v14  ;;  %vm1584_vm15 = vweird.f32 %v5128_v55  ;;  %v1644_v45 = vmul.f32 %v3571_v30, %v1516_v20 }
 0x4f9   :  { %3574 = vtanh.f32 %v1465_v26  ;;  %v1544_v26 = vand.u32 2147483648, %v5102_v6  ;;  %v1531_v56 = vsel %vm5165_vm3, %v1530_v13, %v1526_v53  ;;  %vm1573_vm13 = vcmp.eq.f32.partialorder %v1572_v50, 8.507059e+37  ;;  %vm5239_vm0 = vmor %vm1583_vm6, %vm1584_vm15 }
 0x4fa   :  { %v5223_v5 = vpop.eup %3572  ;;  %v1561_v18 = vsel %vm1558_vm12, %v1560_v11, %v1556_v8  ;;  %v1576_v38 = vsel %vm1573_vm13, %v1575_v57, %v1571_v60  ;;  %v1595_v60 = vsub.f32 1.0, %v1594_v47  ;;  %v1542_v50 = vand.u32 2147483647, %v5102_v6  ;;  %vm1540_vm3 = vmor %vm1538_vm1, %vm1539_vm14 }
 0x4fb   :  { %v1624_v53 = vmul.f32 %v5223_v5, %v5146_v7  ;;  %v1641_v46 = vmul.f32 %v1561_v18, %v4986_v0  ;;  %v1642_v14 = vmul.f32 %v1576_v38, %v4988_v37  ;;  %v1611_v49 = vmul.f32 %v5171_v1, %v1610_v12  ;;  %vm5282_vm12 = vmor %vm1598_vm11, %vm1599_vm8 }
 0x4fc   :  { %v1586_v0 = vsel %vm5239_vm0, %v5128_v55, %v1582_v62  ;;  %v1590_v37 = vor.u32 1.1754944e-38, %v1589_v36  ;;  %v1541_v33 = vsel %vm1540_vm3, %v5124_v25, %v1537_v44  ;;  %v1596_v6 = vmul.f32 %v5188_v51, %v1595_v60 }
 0x4fd   :  { %v5246_v9 = vadd.f32 %v1644_v45, %v1641_v46  ;;  %v1625_v10 = vsub.f32 1.0, %v1624_v53  ;;  %v1545_v34 = vor.u32 1.1754944e-38, %v1544_v26  ;;  %vm1543_vm5 = vcmp.eq.f32.partialorder %v1542_v50, 8.507059e+37 }
 0x4fe   :  { %v1452_v19 = vpop.f32.mrf.mxu0  ;;  %v1591_v20 = vsel %vm1588_vm4, %v1590_v37, %v1586_v0  ;;  %v1612_v8 = vadd.f32 %v5171_v1, %v1611_v49  ;;  %v1619_v47 = vand.u32 2147483648, %v5121_v63  ;;  %vm1613_vm10 = vweird.f32 %v5121_v63 }
 0x4ff   :  { %v3575_v21 = vpop.eup %3574  ;;  %v1466_v11 = vadd.f32 %v1452_v19, %v6694_v16  ;;  %v1546_v57 = vsel %vm1543_vm5, %v1545_v34, %v1541_v33  ;;  %v1626_v55 = vmul.f32 %v5223_v5, %v1625_v10  ;;  %v1617_v26 = vand.u32 2147483647, %v5121_v63  ;;  %vm5268_vm9 = vmor %vm1613_vm10, %vm1614_vm7 }
 0x500   :  { %v1645_v61 = vmul.f32 %v3575_v21, %v1531_v56  ;;  %v1597_v56 = vadd.f32 %v5188_v51, %v1596_v6  ;;  %v1643_v18 = vmul.f32 %v1591_v20, %v5018_v59  ;;  %v1604_v12 = vand.u32 2147483648, %v5126_v48 }
 0x501   :  { %3576 = vtanh.f32 %v1466_v11  ;;  %v1616_v45 = vsel %vm5268_vm9, %v5171_v1, %v1612_v8  ;;  %v1602_v19 = vand.u32 2147483647, %v5126_v48  ;;  %v1620_v21 = vor.u32 1.1754944e-38, %v1619_v47 }
 0x502   :  { %v5248_v13 = vadd.f32 %v1645_v61, %v1642_v14  ;;  %v1627_v36 = vadd.f32 %v5223_v5, %v1626_v55  ;;  %vm1629_vm13 = vweird.f32 %v5223_v5  ;;  %vm1618_vm14 = vcmp.eq.f32.partialorder %v1617_v26, 8.507059e+37 }
 0x503   :  { %v1601_v1 = vsel %vm5282_vm12, %v5188_v51, %v1597_v56  ;;  %v1634_v53 = vand.u32 2147483648, %v5146_v7  ;;  %v1621_v11 = vsel %vm1618_vm14, %v1620_v21, %v1616_v45  ;;  %v1605_v60 = vor.u32 1.1754944e-38, %v1604_v12 }
 0x504   :  { %3578 = vtanh.f32 %v5248_v13  ;;  %vm1628_vm6 = vweird.f32 %v5146_v7  ;;  %v1632_v46 = vand.u32 2147483647, %v5146_v7  ;;  %vm1603_vm15 = vcmp.eq.f32.partialorder %v1602_v19, 8.507059e+37  ;;  %v1678_v19 = vld [vmem:[%s6614_s3 + $0x4] sm:$0x1] }
 0x505   :  { %3580 = vtanh.f32 %v5246_v9  ;;  %vm1630_vm0 = vmor %vm1628_vm6, %vm1629_vm13  ;;  %v1606_v61 = vsel %vm1603_vm15, %v1605_v60, %v1601_v1  ;;  %v1635_v50 = vor.u32 1.1754944e-38, %v1634_v53 }
 0x506   :  { %v1631_v42 = vsel %vm1630_vm0, %v5223_v5, %v1627_v36  ;;  %vm1633_vm1 = vcmp.eq.f32.partialorder %v1632_v46, 8.507059e+37 }
 0x507   :  { %v3577_v25 = vpop.eup %3576  ;;  %v1636_v37 = vsel %vm1633_vm1, %v1635_v50, %v1631_v42  ;;  %v6752_v50 = vld [vmem:[#allocation3_spill] sm:$0xff] }
 0x508   :  { %v1646_v38 = vmul.f32 %v3577_v25, %v1546_v57 }
 0x50a   :  { %v3579_v63 = vpop.eup %3578  ;;  %v5278_v62 = vadd.f32 %v1646_v38, %v1643_v18 }
 0x50b   :  { %v3581_v48 = vpop.eup %3580  ;;  %v1654_v14 = vmul.f32 %v3579_v63, %v1621_v11  ;;  %v1681_v63 = vld [vmem:[%s6614_s3 + $0x5] sm:$0x1] }
 0x50c   :  { %3582 = vtanh.f32 %v5278_v62  ;;  %v1653_v30 = vmul.f32 %v3581_v48, %v1606_v61 }
 0x50d   :  { %v1657_v51 = vmul.f32 %v1654_v14, %v4266_v31  ;;  %v1668_v49 = vmul.f32 %v1654_v14, %v4235_v2 }
 0x50e   :  { %v1656_v10 = vmul.f32 %v1653_v30, %v4188_v52  ;;  %v1667_v7 = vmul.f32 %v1653_v30, %v4237_v43 }
 0x510   :  { %v1659_v5 = vadd.f32 %v1657_v51, %v1656_v10  ;;  %v1670_v20 = vadd.f32 %v1668_v49, %v1667_v7  ;;  %v6753_v7 = vld [vmem:[#allocation2_spill] sm:$0xff] }
 0x512   :  { %v3583_v0 = vpop.eup %3582 }
 0x513   :  { %v1655_v33 = vmul.f32 %v3583_v0, %v1636_v37 }
 0x515   :  { %v1658_v6 = vmul.f32 %v1655_v33, %v4270_v4  ;;  %v1669_v34 = vmul.f32 %v1655_v33, %v4268_v27  ;;  %1697 = vmatpush.msrb.mxu2 %v1655_v33 }
 0x517   :  { %1698 = vmatpush.msrb.mxu2 %v1654_v14  ;;  %v1660_v8 = vadd.f32 %v1659_v5, %v1658_v6  ;;  %v1671_v57 = vadd.f32 %v1670_v20, %v1669_v34  ;;  %v6754_v34 = vld [vmem:[#allocation4_spill] sm:$0xff] }
 0x519   :  { %v1661_v47 = vrot.slane %v1660_v8, 4  ;;  %v1672_v25 = vrot.slane %v1671_v57, 4  ;;  %1699 = vmatpush.msrb.mxu2 %v1653_v30 }
 0x51a   :  { %3216 = vmatmul.msk.f32.vlgmr.msrb.gmra.mxu2 %vm225_vm2, %v3936_v23 }
 0x51b   :  { %v1662_v55 = vadd.f32 %v1661_v47, %v1660_v8  ;;  %v1673_v26 = vadd.f32 %v1672_v25, %v1671_v57 }
 0x51d   :  { %v1663_v56 = vrot.slane %v1662_v55, 2  ;;  %v1674_v18 = vrot.slane %v1673_v26, 2 }
 0x51f   :  { %v1664_v38 = vadd.f32 %v1663_v56, %v1662_v55  ;;  %v1675_v44 = vadd.f32 %v1674_v18, %v1673_v26 }
 0x521   :  { %v1665_v12 = vrot.slane %v1664_v38, 1  ;;  %v1676_v45 = vrot.slane %v1675_v44, 1 }
 0x522   :  { %3217 = vmatmul.msk.f32.gmra.mxu2 %vm225_vm2, %v3951_v28 }
 0x523   :  { %v1666_v21 = vadd.f32 %v1665_v12, %v1664_v38  ;;  %v1677_v59 = vadd.f32 %v1676_v45, %v1675_v44  ;;  %v6755_v44 = vld [vmem:[#allocation5_spill] sm:$0xff] }
 0x525   :  { %v1679_v36 = vadd.f32 %v1678_v19, %v1666_v21  ;;  %v1682_v1 = vadd.f32 %v1681_v63, %v1677_v59  ;;  %v6756_v19 = vld [vmem:[#allocation7_spill] sm:$0xff] }
 0x527   :  { %1680 = vst [vmem:[%s6614_s3 + $0x4] sm:$0x1] %v1679_v36 }
 0x528   :  { %1683 = vst [vmem:[%s6614_s3 + $0x5] sm:$0x1] %v1682_v1 }
 0x52a   :  { %3218 = vmatmul.msk.f32.gmra.mxu2 %vm225_vm2, %v3938_v24 }
 0x532   :  { %3219 = vmatmul.msk.f32.gmra.mxu2 %vm225_vm2, %v3953_v29 }
 0x53a   :  { %3220 = vmatmul.msk.f32.gmra.mxu2 %vm225_vm2, %v3916_v15 }
 0x542   :  { %3221 = vmatmul.msk.f32.gmra.mxu2 %vm225_vm2, %v3921_v17 }
 0x54a   :  { %3222 = vmatmul.msk.f32.gmra.mxu2 %vm225_vm2, %v3986_v39 }
 0x552   :  { %3223 = vmatmul.msk.f32.gmra.mxu2 %vm225_vm2, %v3963_v32 }
 0x55a   :  { %3224 = vmatmul.msk.f32.gmra.mxu2 %vm225_vm2, %v3992_v40 }
 0x562   :  { %3225 = vmatmul.msk.f32.gmra.mxu2 %vm225_vm2, %v3996_v41 }
 0x56a   :  { %3226 = vmatmul.msk.f32.gmra.mxu2 %vm225_vm2, %v3932_v22 }
 0x572   :  { %3227 = vmatmul.msk.f32.gmra.mxu2 %vm225_vm2, %v3973_v35 }
 0x59d   :  { %v1701_v48 = vpop.f32.mrf.mxu2 }
 0x59e   :  { %v1737_v46 = vadd.f32 %v1701_v48, %v4002_v54 }
 0x5a0   :  { %v3228_v61 = vmul.f32 -1.442695, %v1737_v46 }
 0x5a2   :  { %3584 = vpow2.f32 %v3228_v61 }
 0x5a5   :  { %v1704_v53 = vpop.f32.mrf.mxu2 }
 0x5a6   :  { %v1738_v42 = vadd.f32 %v1704_v53, %v4007_v58 }
 0x5a8   :  { %v3229_v49 = vmul.f32 -1.442695, %v1738_v42  ;;  %v3585_v10 = vpop.eup %3584 }
 0x5a9   :  { %v5344_v20 = vadd.f32 1.0, %v3585_v10 }
 0x5aa   :  { %3586 = vpow2.f32 %v3229_v49 }
 0x5ab   :  { %vm1790_vm4 = vweird.f32 %v5344_v20 }
 0x5ad   :  { %v1707_v11 = vpop.f32.mrf.mxu2 }
 0x5ae   :  { %v1739_v6 = vadd.f32 %v1707_v11, %v6753_v7 }
 0x5b0   :  { %v3230_v57 = vmul.f32 -1.442695, %v1739_v6  ;;  %v3587_v47 = vpop.eup %3586 }
 0x5b1   :  { %v5347_v56 = vadd.f32 1.0, %v3587_v47 }
 0x5b3   :  { %vm1805_vm8 = vweird.f32 %v5347_v56 }
 0x5b5   :  { %v1710_v60 = vpop.f32.mrf.mxu2 }
 0x5b6   :  { %v1740_v30 = vadd.f32 %v1710_v60, %v4014_v3 }
 0x5b8   :  { %v3231_v37 = vmul.f32 -1.442695, %v1740_v30  ;;  %v6757_v30 = vld [vmem:[#allocation10_spill] sm:$0xff] }
 0x5ba   :  { %3588 = vpow2.f32 %v3231_v37 }
 0x5bd   :  { %v1713_v14 = vpop.f32.mrf.mxu2 }
 0x5be   :  { %v1741_v51 = vadd.f32 %v1713_v14, %v6752_v50 }
 0x5c0   :  { %v3232_v33 = vmul.f32 -1.442695, %v1741_v51  ;;  %v3589_v55 = vpop.eup %3588 }
 0x5c1   :  { %v5349_v18 = vadd.f32 1.0, %v3589_v55 }
 0x5c2   :  { %3590 = vpow2.f32 %v3232_v33 }
 0x5c3   :  { %3592 = vrcp.f32 %v5344_v20  ;;  %vm1835_vm13 = vweird.f32 %v5349_v18 }
 0x5c4   :  { %3594 = vpow2.f32 %v3230_v57 }
 0x5c5   :  { %v1716_v0 = vpop.f32.mrf.mxu2 }
 0x5c6   :  { %v1742_v5 = vadd.f32 %v1716_v0, %v6754_v34 }
 0x5c8   :  { %v3233_v25 = vmul.f32 -1.442695, %v1742_v5  ;;  %v3591_v26 = vpop.eup %3590 }
 0x5c9   :  { %v5351_v38 = vadd.f32 1.0, %v3591_v26  ;;  %v5356_v21 = vpop.eup %3592 }
 0x5ca   :  { %3596 = vpow2.f32 %v3233_v25  ;;  %v3595_v59 = vpop.eup %3594  ;;  %v1786_v53 = vmul.f32 %v5356_v21, %v5344_v20  ;;  %vm1791_vm3 = vweird.f32 %v5356_v21 }
 0x5cb   :  { %3598 = vrcp.f32 %v5347_v56  ;;  %v5362_v11 = vadd.f32 1.0, %v3595_v59  ;;  %v1794_v59 = vand.u32 2147483647, %v5344_v20  ;;  %vm5410_vm5 = vmor %vm1790_vm4, %vm1791_vm3  ;;  %vm1850_vm15 = vweird.f32 %v5351_v38 }
 0x5cc   :  { %3600 = vrcp.f32 %v5349_v18  ;;  %v1787_v49 = vsub.f32 1.0, %v1786_v53  ;;  %v1809_v53 = vand.u32 2147483647, %v5347_v56 }
 0x5cd   :  { %v1719_v8 = vpop.f32.mrf.mxu2  ;;  %3602 = vrcp.f32 %v5351_v38  ;;  %vm5414_vm7 = vcmp.eq.f32.partialorder %v1794_v59, 8.507059e+37 }
 0x5ce   :  { %v1743_v12 = vadd.f32 %v1719_v8, %v6755_v44  ;;  %v1788_v47 = vmul.f32 %v5356_v21, %v1787_v49  ;;  %vm5425_vm9 = vcmp.eq.f32.partialorder %v1809_v53, 8.507059e+37  ;;  %v1856_v53 = vand.u32 2147483648, %v5351_v38 }
 0x5d0   :  { %v3234_v36 = vmul.f32 -1.442695, %v1743_v12  ;;  %v3597_v48 = vpop.eup %3596 }
 0x5d1   :  { %v5364_v60 = vpop.eup %3598  ;;  %v5366_v46 = vadd.f32 1.0, %v3597_v48 }
 0x5d2   :  { %v5368_v14 = vpop.eup %3600  ;;  %v1801_v0 = vmul.f32 %v5364_v60, %v5347_v56  ;;  %vm1806_vm10 = vweird.f32 %v5364_v60 }
 0x5d3   :  { %v5370_v42 = vpop.eup %3602  ;;  %v1831_v33 = vmul.f32 %v5368_v14, %v5349_v18  ;;  %vm1836_vm11 = vweird.f32 %v5368_v14  ;;  %vm5444_vm14 = vmor %vm1805_vm8, %vm1806_vm10  ;;  %vm1820_vm10 = vweird.f32 %v5362_v11 }
 0x5d4   :  { %v1846_v6 = vmul.f32 %v5370_v42, %v5351_v38  ;;  %v1802_v8 = vsub.f32 1.0, %v1801_v0  ;;  %v6758_v0 = vld [vmem:[#allocation9_spill] sm:$0xff]  ;;  %vm1851_vm12 = vweird.f32 %v5370_v42  ;;  %vm5452_vm6 = vmor %vm1835_vm13, %vm1836_vm11 }
 0x5d5   :  { %v1722_v45 = vpop.f32.mrf.mxu2  ;;  %v1832_v25 = vsub.f32 1.0, %v1831_v33  ;;  %vm5461_vm0 = vmor %vm1850_vm15, %vm1851_vm12 }
 0x5d6   :  { %v1744_v63 = vadd.f32 %v1722_v45, %v6756_v19  ;;  %v1847_v26 = vsub.f32 1.0, %v1846_v6  ;;  %v1803_v48 = vmul.f32 %v5364_v60, %v1802_v8 }
 0x5d7   :  { %v1833_v49 = vmul.f32 %v5368_v14, %v1832_v25 }
 0x5d8   :  { %v3235_v1 = vmul.f32 -1.442695, %v1744_v63  ;;  %v1848_v33 = vmul.f32 %v5370_v42, %v1847_v26  ;;  %v1804_v26 = vadd.f32 %v5364_v60, %v1803_v48  ;;  %v1841_v48 = vand.u32 2147483648, %v5349_v18 }
 0x5da   :  { %3604 = vpow2.f32 %v3235_v1  ;;  %v1789_v1 = vadd.f32 %v5356_v21, %v1788_v47  ;;  %v1811_v47 = vand.u32 2147483648, %v5347_v56  ;;  %v1808_v19 = vsel %vm5444_vm14, %v5364_v60, %v1804_v26 }
 0x5db   :  { %3606 = vpow2.f32 %v3234_v36  ;;  %v1796_v36 = vand.u32 2147483648, %v5344_v20  ;;  %v1842_v50 = vor.u32 1.1754944e-38, %v1841_v48 }
 0x5dc   :  { %3608 = vrcp.f32 %v5362_v11  ;;  %v1793_v25 = vsel %vm5410_vm5, %v5356_v21, %v1789_v1  ;;  %v1849_v1 = vadd.f32 %v5370_v42, %v1848_v33  ;;  %vm1865_vm5 = vweird.f32 %v5366_v46 }
 0x5dd   :  { %v1725_v61 = vpop.f32.mrf.mxu2  ;;  %3610 = vrcp.f32 %v5366_v46  ;;  %v1797_v20 = vor.u32 1.1754944e-38, %v1796_v36  ;;  %v1834_v36 = vadd.f32 %v5368_v14, %v1833_v49  ;;  %v1857_v49 = vor.u32 1.1754944e-38, %v1856_v53 }
 0x5de   :  { %v1745_v51 = vadd.f32 %v1725_v61, %v6757_v30  ;;  %v1853_v34 = vsel %vm5461_vm0, %v5370_v42, %v1849_v1  ;;  %v1869_v53 = vand.u32 2147483647, %v5366_v46 }
 0x5e0   :  { %v3605_v37 = vpop.eup %3604  ;;  %v3236_v10 = vmul.f32 -1.442695, %v1745_v51  ;;  %vm1870_vm11 = vcmp.eq.f32.partialorder %v1869_v53, 8.507059e+37 }
 0x5e1   :  { %v3607_v5 = vpop.eup %3606  ;;  %v5381_v57 = vadd.f32 1.0, %v3605_v37 }
 0x5e2   :  { %3612 = vpow2.f32 %v3236_v10  ;;  %v5384_v55 = vpop.eup %3608  ;;  %v5386_v12 = vadd.f32 1.0, %v3607_v5 }
 0x5e3   :  { %v5388_v63 = vpop.eup %3610  ;;  %3614 = vrcp.f32 %v5381_v57  ;;  %v1816_v51 = vmul.f32 %v5384_v55, %v5362_v11  ;;  %vm1821_vm4 = vweird.f32 %v5384_v55 }
 0x5e4   :  { %v1861_v10 = vmul.f32 %v5388_v63, %v5366_v46  ;;  %3616 = vrcp.f32 %v5386_v12  ;;  %vm1880_vm0 = vweird.f32 %v5386_v12 }
 0x5e5   :  { %v1728_v45 = vpop.f32.mrf.mxu2  ;;  %v1817_v59 = vsub.f32 1.0, %v1816_v51  ;;  %v6765_v51 = vld [vmem:[#allocation6_spill] sm:$0xff] }
 0x5e6   :  { %v1746_v37 = vadd.f32 %v1728_v45, %v6758_v0  ;;  %v1862_v5 = vsub.f32 1.0, %v1861_v10  ;;  %v1839_v10 = vand.u32 2147483647, %v5349_v18  ;;  %v1871_v45 = vand.u32 2147483648, %v5366_v46 }
 0x5e7   :  { %v1818_v44 = vmul.f32 %v5384_v55, %v1817_v59 }
 0x5e8   :  { %v3613_v61 = vpop.eup %3612  ;;  %3618 = vtanh.f32 %v1746_v37  ;;  %v1863_v18 = vmul.f32 %v5388_v63, %v1862_v5  ;;  %vm1840_vm1 = vcmp.eq.f32.partialorder %v1839_v10, 8.507059e+37 }
 0x5e9   :  { %v5406_v6 = vadd.f32 1.0, %v3613_v61  ;;  %v5431_v61 = vpop.eup %3614  ;;  %v1819_v42 = vadd.f32 %v5384_v55, %v1818_v44 }
 0x5ea   :  { %v5448_v37 = vpop.eup %3616  ;;  %v1891_v30 = vmul.f32 %v5431_v61, %v5381_v57  ;;  %v1864_v5 = vadd.f32 %v5388_v63, %v1863_v18  ;;  %vm1896_vm13 = vweird.f32 %v5431_v61 }
 0x5eb   :  { %3620 = vrcp.f32 %v5406_v6  ;;  %v1876_v60 = vmul.f32 %v5448_v37, %v5386_v12  ;;  %vm1881_vm14 = vweird.f32 %v5448_v37 }
 0x5ed   :  { %v1731_v21 = vpop.f32.mrf.mxu2 }
 0x5ee   :  { %v1747_v0 = vadd.f32 %v1731_v21, %v6765_v51  ;;  %v1812_v21 = vor.u32 1.1754944e-38, %v1811_v47  ;;  %v1854_v51 = vand.u32 2147483647, %v5351_v38  ;;  %v1798_v38 = vsel %vm5414_vm7, %v1797_v20, %v1793_v25  ;;  %v3619_v7 = vpop.eup %3618 }
 0x5ef   :  { %v1838_v47 = vsel %vm5452_vm6, %v5368_v14, %v1834_v36  ;;  %v1892_v25 = vsub.f32 1.0, %v1891_v30  ;;  %vm1866_vm7 = vweird.f32 %v5388_v63  ;;  %v1926_v59 = vmul.f32 %v3619_v7, %v1798_v38 }
 0x5f0   :  { %3622 = vtanh.f32 %v1747_v0  ;;  %v1826_v0 = vand.u32 2147483648, %v5362_v11  ;;  %v1813_v8 = vsel %vm5425_vm9, %v1812_v21, %v1808_v19  ;;  %vm1855_vm3 = vcmp.eq.f32.partialorder %v1854_v51, 8.507059e+37  ;;  %vm5499_vm8 = vmor %vm1865_vm5, %vm1866_vm7 }
 0x5f1   :  { %v5483_v26 = vpop.eup %3620  ;;  %v1843_v14 = vsel %vm1840_vm1, %v1842_v50, %v1838_v47  ;;  %v1858_v20 = vsel %vm1855_vm3, %v1857_v49, %v1853_v34  ;;  %v1877_v34 = vsub.f32 1.0, %v1876_v60  ;;  %v1824_v51 = vand.u32 2147483647, %v5362_v11  ;;  %vm1822_vm9 = vmor %vm1820_vm10, %vm1821_vm4 }
 0x5f2   :  { %v1906_v19 = vmul.f32 %v5483_v26, %v5406_v6  ;;  %v1923_v44 = vmul.f32 %v1843_v14, %v5246_v9  ;;  %v1924_v30 = vmul.f32 %v1858_v20, %v5248_v13  ;;  %v1893_v33 = vmul.f32 %v5431_v61, %v1892_v25  ;;  %vm5542_vm1 = vmor %vm1880_vm0, %vm1881_vm14 }
 0x5f3   :  { %v1868_v9 = vsel %vm5499_vm8, %v5388_v63, %v1864_v5  ;;  %v1872_v13 = vor.u32 1.1754944e-38, %v1871_v45  ;;  %v1823_v56 = vsel %vm1822_vm9, %v5384_v55, %v1819_v42  ;;  %v1878_v11 = vmul.f32 %v5448_v37, %v1877_v34 }
 0x5f4   :  { %v5506_v10 = vadd.f32 %v1926_v59, %v1923_v44  ;;  %v1907_v46 = vsub.f32 1.0, %v1906_v19  ;;  %v1827_v18 = vor.u32 1.1754944e-38, %v1826_v0  ;;  %vm1825_vm12 = vcmp.eq.f32.partialorder %v1824_v51, 8.507059e+37 }
 0x5f5   :  { %v1734_v36 = vpop.f32.mrf.mxu2  ;;  %v1873_v38 = vsel %vm1870_vm11, %v1872_v13, %v1868_v9  ;;  %v1894_v47 = vadd.f32 %v5431_v61, %v1893_v33  ;;  %v1901_v60 = vand.u32 2147483648, %v5381_v57  ;;  %vm1895_vm6 = vweird.f32 %v5381_v57 }
 0x5f6   :  { %v3623_v1 = vpop.eup %3622  ;;  %v1748_v50 = vadd.f32 %v1734_v36, %v6694_v16  ;;  %v1828_v49 = vsel %vm1825_vm12, %v1827_v18, %v1823_v56  ;;  %v1908_v63 = vmul.f32 %v5483_v26, %v1907_v46  ;;  %v1899_v0 = vand.u32 2147483647, %v5381_v57  ;;  %vm5528_vm15 = vmor %vm1895_vm6, %vm1896_vm13 }
 0x5f7   :  { %v1927_v48 = vmul.f32 %v3623_v1, %v1813_v8  ;;  %v1879_v8 = vadd.f32 %v5448_v37, %v1878_v11  ;;  %v1925_v14 = vmul.f32 %v1873_v38, %v5278_v62  ;;  %v1886_v25 = vand.u32 2147483648, %v5386_v12  ;;  %v1963_v62 = vld [vmem:[%s6614_s3 + $0x4] sm:$0x1] }
 0x5f8   :  { %3624 = vtanh.f32 %v1748_v50  ;;  %v1898_v59 = vsel %vm5528_vm15, %v5431_v61, %v1894_v47  ;;  %v1884_v36 = vand.u32 2147483647, %v5386_v12  ;;  %v1902_v1 = vor.u32 1.1754944e-38, %v1901_v60 }
 0x5f9   :  { %v5508_v21 = vadd.f32 %v1927_v48, %v1924_v30  ;;  %v1909_v45 = vadd.f32 %v5483_v26, %v1908_v63  ;;  %vm1911_vm3 = vweird.f32 %v5483_v26  ;;  %vm1900_vm4 = vcmp.eq.f32.partialorder %v1899_v0, 8.507059e+37 }
 0x5fa   :  { %v1883_v61 = vsel %vm5542_vm1, %v5448_v37, %v1879_v8  ;;  %v1916_v19 = vand.u32 2147483648, %v5406_v6  ;;  %v1903_v50 = vsel %vm1900_vm4, %v1902_v1, %v1898_v59  ;;  %v1887_v34 = vor.u32 1.1754944e-38, %v1886_v25  ;;  %v1960_v1 = vld [vmem:[%s6614_s3 + $0x5] sm:$0x1] }
 0x5fb   :  { %3626 = vtanh.f32 %v5508_v21  ;;  %vm1910_vm5 = vweird.f32 %v5406_v6  ;;  %v1914_v44 = vand.u32 2147483647, %v5406_v6  ;;  %vm1885_vm7 = vcmp.eq.f32.partialorder %v1884_v36, 8.507059e+37 }
 0x5fc   :  { %3628 = vtanh.f32 %v5506_v10  ;;  %vm1912_vm8 = vmor %vm1910_vm5, %vm1911_vm3  ;;  %v1888_v48 = vsel %vm1885_vm7, %v1887_v34, %v1883_v61  ;;  %v1917_v51 = vor.u32 1.1754944e-38, %v1916_v19 }
 0x5fd   :  { %v1913_v53 = vsel %vm1912_vm8, %v5483_v26, %v1909_v45  ;;  %vm1915_vm10 = vcmp.eq.f32.partialorder %v1914_v44, 8.507059e+37 }
 0x5fe   :  { %v3625_v55 = vpop.eup %3624  ;;  %v1918_v13 = vsel %vm1915_vm10, %v1917_v51, %v1913_v53  ;;  %v6778_v51 = vld [vmem:[#allocation3_spill] sm:$0xff] }
 0x5ff   :  { %v1928_v20 = vmul.f32 %v3625_v55, %v1828_v49 }
 0x601   :  { %v3627_v57 = vpop.eup %3626  ;;  %v5538_v5 = vadd.f32 %v1928_v20, %v1925_v14 }
 0x602   :  { %v3629_v12 = vpop.eup %3628  ;;  %v1936_v30 = vmul.f32 %v3627_v57, %v1903_v50 }
 0x603   :  { %3630 = vtanh.f32 %v5538_v5  ;;  %v1935_v7 = vmul.f32 %v3629_v12, %v1888_v48 }
 0x604   :  { %v1939_v37 = vmul.f32 %v1936_v30, %v4266_v31  ;;  %v1950_v33 = vmul.f32 %v1936_v30, %v4235_v2 }
 0x605   :  { %v1938_v56 = vmul.f32 %v1935_v7, %v4188_v52  ;;  %v1949_v6 = vmul.f32 %v1935_v7, %v4237_v43 }
 0x607   :  { %v1941_v26 = vadd.f32 %v1939_v37, %v1938_v56  ;;  %v1952_v38 = vadd.f32 %v1950_v33, %v1949_v6  ;;  %v6779_v6 = vld [vmem:[#allocation2_spill] sm:$0xff] }
 0x609   :  { %v3631_v9 = vpop.eup %3630 }
 0x60a   :  { %v1937_v46 = vmul.f32 %v3631_v9, %v1918_v13 }
 0x60c   :  { %v1940_v11 = vmul.f32 %v1937_v46, %v4270_v4  ;;  %v1951_v18 = vmul.f32 %v1937_v46, %v4268_v27  ;;  %1979 = vmatpush.msra.mxu3 %v1937_v46 }
 0x60e   :  { %1980 = vmatpush.msra.mxu3 %v1936_v30  ;;  %v1942_v47 = vadd.f32 %v1941_v26, %v1940_v11  ;;  %v1953_v49 = vadd.f32 %v1952_v38, %v1951_v18  ;;  %v6780_v18 = vld [vmem:[#allocation4_spill] sm:$0xff] }
 0x610   :  { %v1943_v60 = vrot.slane %v1942_v47, 4  ;;  %v1954_v55 = vrot.slane %v1953_v49, 4  ;;  %1981 = vmatpush.msra.mxu3 %v1935_v7 }
 0x611   :  { %3237 = vmatmul.msk.f32.vlgmr.msra.gmra.mxu3 %vm225_vm2, %v3936_v23 }
 0x612   :  { %v1944_v63 = vadd.f32 %v1943_v60, %v1942_v47  ;;  %v1955_v0 = vadd.f32 %v1954_v55, %v1953_v49 }
 0x614   :  { %v1945_v8 = vrot.slane %v1944_v63, 2  ;;  %v1956_v14 = vrot.slane %v1955_v0, 2 }
 0x616   :  { %v1946_v20 = vadd.f32 %v1945_v8, %v1944_v63  ;;  %v1957_v42 = vadd.f32 %v1956_v14, %v1955_v0 }
 0x618   :  { %v1947_v25 = vrot.slane %v1946_v20, 1  ;;  %v1958_v59 = vrot.slane %v1957_v42, 1 }
 0x619   :  { %3238 = vmatmul.msk.f32.gmra.mxu3 %vm225_vm2, %v3951_v28 }
 0x61a   :  { %v1948_v36 = vadd.f32 %v1947_v25, %v1946_v20  ;;  %v1959_v57 = vadd.f32 %v1958_v59, %v1957_v42  ;;  %v6781_v42 = vld [vmem:[#allocation5_spill] sm:$0xff] }
 0x61c   :  { %v1961_v45 = vadd.f32 %v1960_v1, %v1948_v36  ;;  %v1964_v61 = vadd.f32 %v1963_v62, %v1959_v57  ;;  %v6782_v36 = vld [vmem:[#allocation7_spill] sm:$0xff] }
 0x61e   :  { %1962 = vst [vmem:[%s6614_s3 + $0x5] sm:$0x1] %v1961_v45 }
 0x61f   :  { %1965 = vst [vmem:[%s6614_s3 + $0x4] sm:$0x1] %v1964_v61 }
 0x621   :  { %3239 = vmatmul.msk.f32.gmra.mxu3 %vm225_vm2, %v3938_v24 }
 0x629   :  { %3240 = vmatmul.msk.f32.gmra.mxu3 %vm225_vm2, %v3953_v29 }
 0x631   :  { %3241 = vmatmul.msk.f32.gmra.mxu3 %vm225_vm2, %v3916_v15 }
 0x639   :  { %3242 = vmatmul.msk.f32.gmra.mxu3 %vm225_vm2, %v3921_v17 }
 0x641   :  { %3243 = vmatmul.msk.f32.gmra.mxu3 %vm225_vm2, %v3986_v39 }
 0x649   :  { %3244 = vmatmul.msk.f32.gmra.mxu3 %vm225_vm2, %v3963_v32 }
 0x651   :  { %3245 = vmatmul.msk.f32.gmra.mxu3 %vm225_vm2, %v3992_v40 }
 0x659   :  { %3246 = vmatmul.msk.f32.gmra.mxu3 %vm225_vm2, %v3996_v41 }
 0x661   :  { %3247 = vmatmul.msk.f32.gmra.mxu3 %vm225_vm2, %v3932_v22 }
 0x669   :  { %3248 = vmatmul.msk.f32.gmra.mxu3 %vm225_vm2, %v3973_v35 }
 0x694   :  { %v1983_v12 = vpop.f32.mrf.mxu3 }
 0x695   :  { %v2019_v44 = vadd.f32 %v1983_v12, %v4002_v54 }
 0x697   :  { %v3249_v48 = vmul.f32 -1.442695, %v2019_v44 }
 0x699   :  { %3632 = vpow2.f32 %v3249_v48 }
 0x69c   :  { %v1986_v19 = vpop.f32.mrf.mxu3 }
 0x69d   :  { %v2020_v53 = vadd.f32 %v1986_v19, %v4007_v58 }
 0x69f   :  { %v3250_v33 = vmul.f32 -1.442695, %v2020_v53  ;;  %v3633_v56 = vpop.eup %3632 }
 0x6a0   :  { %v5604_v38 = vadd.f32 1.0, %v3633_v56 }
 0x6a1   :  { %3634 = vpow2.f32 %v3250_v33 }
 0x6a2   :  { %vm2072_vm11 = vweird.f32 %v5604_v38 }
 0x6a4   :  { %v1989_v50 = vpop.f32.mrf.mxu3 }
 0x6a5   :  { %v2021_v11 = vadd.f32 %v1989_v50, %v6779_v6 }
 0x6a7   :  { %v3251_v49 = vmul.f32 -1.442695, %v2021_v11  ;;  %v3635_v60 = vpop.eup %3634 }
 0x6a8   :  { %v5607_v8 = vadd.f32 1.0, %v3635_v60 }
 0x6aa   :  { %vm2087_vm14 = vweird.f32 %v5607_v8 }
 0x6ac   :  { %v1992_v34 = vpop.f32.mrf.mxu3 }
 0x6ad   :  { %v2022_v7 = vadd.f32 %v1992_v34, %v4014_v3 }
 0x6af   :  { %v3252_v13 = vmul.f32 -1.442695, %v2022_v7  ;;  %v6783_v7 = vld [vmem:[#allocation10_spill] sm:$0xff] }
 0x6b1   :  { %3636 = vpow2.f32 %v3252_v13 }
 0x6b4   :  { %v1995_v30 = vpop.f32.mrf.mxu3 }
 0x6b5   :  { %v2023_v37 = vadd.f32 %v1995_v30, %v6778_v51 }
 0x6b7   :  { %v3253_v46 = vmul.f32 -1.442695, %v2023_v37  ;;  %v3637_v63 = vpop.eup %3636 }
 0x6b8   :  { %v5609_v14 = vadd.f32 1.0, %v3637_v63 }
 0x6b9   :  { %3638 = vpow2.f32 %v3253_v46 }
 0x6ba   :  { %3640 = vrcp.f32 %v5604_v38  ;;  %vm2117_vm3 = vweird.f32 %v5609_v14 }
 0x6bb   :  { %3642 = vpow2.f32 %v3251_v49 }
 0x6bc   :  { %v1998_v9 = vpop.f32.mrf.mxu3 }
 0x6bd   :  { %v2024_v26 = vadd.f32 %v1998_v9, %v6780_v18 }
 0x6bf   :  { %v3254_v55 = vmul.f32 -1.442695, %v2024_v26  ;;  %v3639_v0 = vpop.eup %3638 }
 0x6c0   :  { %v5611_v20 = vadd.f32 1.0, %v3639_v0  ;;  %v5616_v1 = vpop.eup %3640 }
 0x6c1   :  { %3644 = vpow2.f32 %v3254_v55  ;;  %v3643_v62 = vpop.eup %3642  ;;  %v2068_v19 = vmul.f32 %v5616_v1, %v5604_v38  ;;  %vm2073_vm9 = vweird.f32 %v5616_v1 }
 0x6c2   :  { %3646 = vrcp.f32 %v5607_v8  ;;  %v5622_v50 = vadd.f32 1.0, %v3643_v62  ;;  %v2076_v62 = vand.u32 2147483647, %v5604_v38  ;;  %vm5670_vm12 = vmor %vm2072_vm11, %vm2073_vm9  ;;  %vm2132_vm7 = vweird.f32 %v5611_v20 }
 0x6c3   :  { %3648 = vrcp.f32 %v5609_v14  ;;  %v2069_v33 = vsub.f32 1.0, %v2068_v19  ;;  %v2091_v19 = vand.u32 2147483647, %v5607_v8 }
 0x6c4   :  { %v2001_v47 = vpop.f32.mrf.mxu3  ;;  %3650 = vrcp.f32 %v5611_v20  ;;  %vm5674_vm13 = vcmp.eq.f32.partialorder %v2076_v62, 8.507059e+37 }
 0x6c5   :  { %v2025_v25 = vadd.f32 %v2001_v47, %v6781_v42  ;;  %v2070_v60 = vmul.f32 %v5616_v1, %v2069_v33  ;;  %vm5685_vm15 = vcmp.eq.f32.partialorder %v2091_v19, 8.507059e+37  ;;  %v2138_v19 = vand.u32 2147483648, %v5611_v20 }
 0x6c7   :  { %v3255_v45 = vmul.f32 -1.442695, %v2025_v25  ;;  %v3645_v12 = vpop.eup %3644 }
 0x6c8   :  { %v5624_v34 = vpop.eup %3646  ;;  %v5626_v44 = vadd.f32 1.0, %v3645_v12 }
 0x6c9   :  { %v5628_v30 = vpop.eup %3648  ;;  %v2083_v9 = vmul.f32 %v5624_v34, %v5607_v8  ;;  %vm2088_vm6 = vweird.f32 %v5624_v34 }
 0x6ca   :  { %v5630_v53 = vpop.eup %3650  ;;  %v2113_v46 = vmul.f32 %v5628_v30, %v5609_v14  ;;  %vm2118_vm0 = vweird.f32 %v5628_v30  ;;  %vm5704_vm4 = vmor %vm2087_vm14, %vm2088_vm6  ;;  %vm2102_vm6 = vweird.f32 %v5622_v50 }
 0x6cb   :  { %v2128_v11 = vmul.f32 %v5630_v53, %v5611_v20  ;;  %v2084_v47 = vsub.f32 1.0, %v2083_v9  ;;  %v6784_v9 = vld [vmem:[#allocation9_spill] sm:$0xff]  ;;  %vm2133_vm1 = vweird.f32 %v5630_v53  ;;  %vm5712_vm5 = vmor %vm2117_vm3, %vm2118_vm0 }
 0x6cc   :  { %v2004_v59 = vpop.f32.mrf.mxu3  ;;  %v2114_v55 = vsub.f32 1.0, %v2113_v46  ;;  %vm5721_vm8 = vmor %vm2132_vm7, %vm2133_vm1 }
 0x6cd   :  { %v2026_v57 = vadd.f32 %v2004_v59, %v6782_v36  ;;  %v2129_v0 = vsub.f32 1.0, %v2128_v11  ;;  %v2085_v12 = vmul.f32 %v5624_v34, %v2084_v47 }
 0x6ce   :  { %v2115_v33 = vmul.f32 %v5628_v30, %v2114_v55 }
 0x6cf   :  { %v3256_v61 = vmul.f32 -1.442695, %v2026_v57  ;;  %v2130_v46 = vmul.f32 %v5630_v53, %v2129_v0  ;;  %v2086_v0 = vadd.f32 %v5624_v34, %v2085_v12  ;;  %v2123_v12 = vand.u32 2147483648, %v5609_v14 }
 0x6d1   :  { %3652 = vpow2.f32 %v3256_v61  ;;  %v2071_v61 = vadd.f32 %v5616_v1, %v2070_v60  ;;  %v2093_v60 = vand.u32 2147483648, %v5607_v8  ;;  %v2090_v36 = vsel %vm5704_vm4, %v5624_v34, %v2086_v0 }
 0x6d2   :  { %3654 = vpow2.f32 %v3255_v45  ;;  %v2078_v45 = vand.u32 2147483648, %v5604_v38  ;;  %v2124_v51 = vor.u32 1.1754944e-38, %v2123_v12 }
 0x6d3   :  { %3656 = vrcp.f32 %v5622_v50  ;;  %v2075_v55 = vsel %vm5670_vm12, %v5616_v1, %v2071_v61  ;;  %v2131_v61 = vadd.f32 %v5630_v53, %v2130_v46  ;;  %vm2147_vm12 = vweird.f32 %v5626_v44 }
 0x6d4   :  { %v2007_v48 = vpop.f32.mrf.mxu3  ;;  %3658 = vrcp.f32 %v5626_v44  ;;  %v2079_v38 = vor.u32 1.1754944e-38, %v2078_v45  ;;  %v2116_v45 = vadd.f32 %v5628_v30, %v2115_v33  ;;  %v2139_v33 = vor.u32 1.1754944e-38, %v2138_v19 }
 0x6d5   :  { %v2027_v37 = vadd.f32 %v2007_v48, %v6783_v7  ;;  %v2135_v18 = vsel %vm5721_vm8, %v5630_v53, %v2131_v61  ;;  %v2151_v19 = vand.u32 2147483647, %v5626_v44 }
 0x6d7   :  { %v3653_v13 = vpop.eup %3652  ;;  %v3257_v56 = vmul.f32 -1.442695, %v2027_v37  ;;  %vm2152_vm0 = vcmp.eq.f32.partialorder %v2151_v19, 8.507059e+37 }
 0x6d8   :  { %v3655_v26 = vpop.eup %3654  ;;  %v5641_v49 = vadd.f32 1.0, %v3653_v13 }
 0x6d9   :  { %3660 = vpow2.f32 %v3257_v56  ;;  %v5644_v63 = vpop.eup %3656  ;;  %v5646_v25 = vadd.f32 1.0, %v3655_v26 }
 0x6da   :  { %v5648_v57 = vpop.eup %3658  ;;  %3662 = vrcp.f32 %v5641_v49  ;;  %v2098_v37 = vmul.f32 %v5644_v63, %v5622_v50  ;;  %vm2103_vm11 = vweird.f32 %v5644_v63 }
 0x6db   :  { %v2143_v56 = vmul.f32 %v5648_v57, %v5626_v44  ;;  %3664 = vrcp.f32 %v5646_v25  ;;  %vm2162_vm8 = vweird.f32 %v5646_v25 }
 0x6dc   :  { %v2010_v59 = vpop.f32.mrf.mxu3  ;;  %v2099_v62 = vsub.f32 1.0, %v2098_v37  ;;  %v6791_v37 = vld [vmem:[#allocation6_spill] sm:$0xff] }
 0x6dd   :  { %v2028_v13 = vadd.f32 %v2010_v59, %v6784_v9  ;;  %v2144_v26 = vsub.f32 1.0, %v2143_v56  ;;  %v2121_v56 = vand.u32 2147483647, %v5609_v14  ;;  %v2153_v59 = vand.u32 2147483648, %v5626_v44 }
 0x6de   :  { %v2100_v42 = vmul.f32 %v5644_v63, %v2099_v62 }
 0x6df   :  { %v3661_v48 = vpop.eup %3660  ;;  %3666 = vtanh.f32 %v2028_v13  ;;  %v2145_v14 = vmul.f32 %v5648_v57, %v2144_v26  ;;  %vm2122_vm10 = vcmp.eq.f32.partialorder %v2121_v56, 8.507059e+37 }
 0x6e0   :  { %v5666_v11 = vadd.f32 1.0, %v3661_v48  ;;  %v5691_v48 = vpop.eup %3662  ;;  %v2101_v53 = vadd.f32 %v5644_v63, %v2100_v42 }
 0x6e1   :  { %v5708_v13 = vpop.eup %3664  ;;  %v2173_v7 = vmul.f32 %v5691_v48, %v5641_v49  ;;  %v2146_v26 = vadd.f32 %v5648_v57, %v2145_v14  ;;  %vm2178_vm3 = vweird.f32 %v5691_v48 }
 0x6e2   :  { %3668 = vrcp.f32 %v5666_v11  ;;  %v2158_v34 = vmul.f32 %v5708_v13, %v5646_v25  ;;  %vm2163_vm4 = vweird.f32 %v5708_v13 }
 0x6e4   :  { %v2013_v1 = vpop.f32.mrf.mxu3 }
 0x6e5   :  { %v2029_v9 = vadd.f32 %v2013_v1, %v6791_v37  ;;  %v2094_v1 = vor.u32 1.1754944e-38, %v2093_v60  ;;  %v2136_v37 = vand.u32 2147483647, %v5611_v20  ;;  %v2080_v20 = vsel %vm5674_vm13, %v2079_v38, %v2075_v55  ;;  %v3667_v6 = vpop.eup %3666 }
 0x6e6   :  { %v2120_v60 = vsel %vm5712_vm5, %v5628_v30, %v2116_v45  ;;  %v2174_v55 = vsub.f32 1.0, %v2173_v7  ;;  %vm2148_vm13 = vweird.f32 %v5648_v57  ;;  %v2208_v62 = vmul.f32 %v3667_v6, %v2080_v20 }
 0x6e7   :  { %3670 = vtanh.f32 %v2029_v9  ;;  %v2108_v9 = vand.u32 2147483648, %v5622_v50  ;;  %v2095_v47 = vsel %vm5685_vm15, %v2094_v1, %v2090_v36  ;;  %vm2137_vm9 = vcmp.eq.f32.partialorder %v2136_v37, 8.507059e+37  ;;  %vm5759_vm14 = vmor %vm2147_vm12, %vm2148_vm13 }
 0x6e8   :  { %v5743_v0 = vpop.eup %3668  ;;  %v2125_v30 = vsel %vm2122_vm10, %v2124_v51, %v2120_v60  ;;  %v2140_v38 = vsel %vm2137_vm9, %v2139_v33, %v2135_v18  ;;  %v2159_v18 = vsub.f32 1.0, %v2158_v34  ;;  %v2106_v37 = vand.u32 2147483647, %v5622_v50  ;;  %vm2104_vm15 = vmor %vm2102_vm6, %vm2103_vm11 }
 0x6e9   :  { %v2188_v36 = vmul.f32 %v5743_v0, %v5666_v11  ;;  %v2205_v42 = vmul.f32 %v2125_v30, %v5506_v10  ;;  %v2206_v7 = vmul.f32 %v2140_v38, %v5508_v21  ;;  %v2175_v46 = vmul.f32 %v5691_v48, %v2174_v55  ;;  %vm5802_vm10 = vmor %vm2162_vm8, %vm2163_vm4 }
 0x6ea   :  { %v2150_v10 = vsel %vm5759_vm14, %v5648_v57, %v2146_v26  ;;  %v2154_v21 = vor.u32 1.1754944e-38, %v2153_v59  ;;  %v2105_v8 = vsel %vm2104_vm15, %v5644_v63, %v2101_v53  ;;  %v2160_v50 = vmul.f32 %v5708_v13, %v2159_v18 }
 0x6eb   :  { %v5766_v56 = vadd.f32 %v2208_v62, %v2205_v42  ;;  %v2189_v44 = vsub.f32 1.0, %v2188_v36  ;;  %v2109_v14 = vor.u32 1.1754944e-38, %v2108_v9  ;;  %vm2107_vm1 = vcmp.eq.f32.partialorder %v2106_v37, 8.507059e+37 }
 0x6ec   :  { %v2016_v45 = vpop.f32.mrf.mxu3  ;;  %v2155_v20 = vsel %vm2152_vm0, %v2154_v21, %v2150_v10  ;;  %v2176_v60 = vadd.f32 %v5691_v48, %v2175_v46  ;;  %v2183_v34 = vand.u32 2147483648, %v5641_v49  ;;  %vm2177_vm5 = vweird.f32 %v5641_v49 }
 0x6ed   :  { %v3671_v61 = vpop.eup %3670  ;;  %v2030_v51 = vadd.f32 %v2016_v45, %v6694_v16  ;;  %v2110_v33 = vsel %vm2107_vm1, %v2109_v14, %v2105_v8  ;;  %v2190_v57 = vmul.f32 %v5743_v0, %v2189_v44  ;;  %v2181_v9 = vand.u32 2147483647, %v5641_v49  ;;  %vm5788_vm7 = vmor %vm2177_vm5, %vm2178_vm3 }
 0x6ee   :  { %v2209_v12 = vmul.f32 %v3671_v61, %v2095_v47  ;;  %v2161_v47 = vadd.f32 %v5708_v13, %v2160_v50  ;;  %v2207_v30 = vmul.f32 %v2155_v20, %v5538_v5  ;;  %v2168_v55 = vand.u32 2147483648, %v5646_v25  ;;  %v2245_v5 = vld [vmem:[%s6614_s3 + $0x3] sm:$0x1] }
 0x6ef   :  { %3672 = vtanh.f32 %v2030_v51  ;;  %v2180_v62 = vsel %vm5788_vm7, %v5691_v48, %v2176_v60  ;;  %v2166_v45 = vand.u32 2147483647, %v5646_v25  ;;  %v2184_v61 = vor.u32 1.1754944e-38, %v2183_v34 }
 0x6f0   :  { %v5768_v1 = vadd.f32 %v2209_v12, %v2206_v7  ;;  %v2191_v59 = vadd.f32 %v5743_v0, %v2190_v57  ;;  %vm2193_vm9 = vweird.f32 %v5743_v0  ;;  %vm2182_vm11 = vcmp.eq.f32.partialorder %v2181_v9, 8.507059e+37 }
 0x6f1   :  { %v2165_v48 = vsel %vm5802_vm10, %v5708_v13, %v2161_v47  ;;  %v2198_v36 = vand.u32 2147483648, %v5666_v11  ;;  %v2185_v51 = vsel %vm2182_vm11, %v2184_v61, %v2180_v62  ;;  %v2169_v18 = vor.u32 1.1754944e-38, %v2168_v55  ;;  %v2242_v61 = vld [vmem:[%s6614_s3 + $0x6] sm:$0x1] }
 0x6f2   :  { %3674 = vtanh.f32 %v5768_v1  ;;  %vm2192_vm12 = vweird.f32 %v5666_v11  ;;  %v2196_v42 = vand.u32 2147483647, %v5666_v11  ;;  %vm2167_vm13 = vcmp.eq.f32.partialorder %v2166_v45, 8.507059e+37 }
 0x6f3   :  { %3676 = vtanh.f32 %v5766_v56  ;;  %vm2194_vm14 = vmor %vm2192_vm12, %vm2193_vm9  ;;  %v2170_v12 = vsel %vm2167_vm13, %v2169_v18, %v2165_v48  ;;  %v2199_v37 = vor.u32 1.1754944e-38, %v2198_v36 }
 0x6f4   :  { %v2195_v19 = vsel %vm2194_vm14, %v5743_v0, %v2191_v59  ;;  %vm2197_vm6 = vcmp.eq.f32.partialorder %v2196_v42, 8.507059e+37 }
 0x6f5   :  { %v3673_v63 = vpop.eup %3672  ;;  %v2200_v21 = vsel %vm2197_vm6, %v2199_v37, %v2195_v19  ;;  %v6804_v37 = vld [vmem:[#allocation3_spill] sm:$0xff] }
 0x6f6   :  { %v2210_v38 = vmul.f32 %v3673_v63, %v2110_v33 }
 0x6f8   :  { %v3675_v49 = vpop.eup %3674  ;;  %v5798_v26 = vadd.f32 %v2210_v38, %v2207_v30 }
 0x6f9   :  { %v3677_v25 = vpop.eup %3676  ;;  %v2218_v7 = vmul.f32 %v3675_v49, %v2185_v51 }
 0x6fa   :  { %3678 = vtanh.f32 %v5798_v26  ;;  %v2217_v6 = vmul.f32 %v3677_v25, %v2170_v12 }
 0x6fb   :  { %v2221_v13 = vmul.f32 %v2218_v7, %v4266_v31  ;;  %v2232_v46 = vmul.f32 %v2218_v7, %v4235_v2 }
 0x6fc   :  { %v2220_v8 = vmul.f32 %v2217_v6, %v4188_v52  ;;  %v2231_v11 = vmul.f32 %v2217_v6, %v4237_v43 }
 0x6fe   :  { %v2223_v0 = vadd.f32 %v2221_v13, %v2220_v8  ;;  %v2234_v20 = vadd.f32 %v2232_v46, %v2231_v11  ;;  %v6805_v11 = vld [vmem:[#allocation2_spill] sm:$0xff] }
 0x700   :  { %v3679_v10 = vpop.eup %3678 }
 0x701   :  { %v2219_v44 = vmul.f32 %v3679_v10, %v2200_v21 }
 0x703   :  { %v2222_v50 = vmul.f32 %v2219_v44, %v4270_v4  ;;  %v2233_v14 = vmul.f32 %v2219_v44, %v4268_v27  ;;  %2261 = vmatpush.msra.mxu1 %v2219_v44 }
 0x705   :  { %2262 = vmatpush.msra.mxu1 %v2218_v7  ;;  %v2224_v60 = vadd.f32 %v2223_v0, %v2222_v50  ;;  %v2235_v33 = vadd.f32 %v2234_v20, %v2233_v14  ;;  %v6806_v14 = vld [vmem:[#allocation4_spill] sm:$0xff] }
 0x707   :  { %v2225_v34 = vrot.slane %v2224_v60, 4  ;;  %v2236_v63 = vrot.slane %v2235_v33, 4  ;;  %2263 = vmatpush.msra.mxu1 %v2217_v6 }
 0x708   :  { %3258 = vmatmul.msk.f32.vlgmr.msra.gmra.mxu1 %vm225_vm2, %v3936_v23 }
 0x709   :  { %v2226_v57 = vadd.f32 %v2225_v34, %v2224_v60  ;;  %v2237_v9 = vadd.f32 %v2236_v63, %v2235_v33 }
 0x70b   :  { %v2227_v47 = vrot.slane %v2226_v57, 2  ;;  %v2238_v30 = vrot.slane %v2237_v9, 2 }
 0x70d   :  { %v2228_v38 = vadd.f32 %v2227_v47, %v2226_v57  ;;  %v2239_v53 = vadd.f32 %v2238_v30, %v2237_v9 }
 0x70f   :  { %v2229_v55 = vrot.slane %v2228_v38, 1  ;;  %v2240_v62 = vrot.slane %v2239_v53, 1 }
 0x710   :  { %3259 = vmatmul.msk.f32.gmra.mxu1 %vm225_vm2, %v3951_v28 }
 0x711   :  { %v2230_v45 = vadd.f32 %v2229_v55, %v2228_v38  ;;  %v2241_v49 = vadd.f32 %v2240_v62, %v2239_v53  ;;  %v6807_v53 = vld [vmem:[#allocation5_spill] sm:$0xff] }
 0x713   :  { %v2243_v59 = vadd.f32 %v2242_v61, %v2230_v45  ;;  %v2246_v48 = vadd.f32 %v2245_v5, %v2241_v49  ;;  %v6808_v45 = vld [vmem:[#allocation7_spill] sm:$0xff] }
 0x715   :  { %2244 = vst [vmem:[%s6614_s3 + $0x6] sm:$0x1] %v2243_v59 }
 0x716   :  { %2247 = vst [vmem:[%s6614_s3 + $0x3] sm:$0x1] %v2246_v48 }
 0x718   :  { %3260 = vmatmul.msk.f32.gmra.mxu1 %vm225_vm2, %v3938_v24 }
 0x720   :  { %3261 = vmatmul.msk.f32.gmra.mxu1 %vm225_vm2, %v3953_v29 }
 0x728   :  { %3262 = vmatmul.msk.f32.gmra.mxu1 %vm225_vm2, %v3916_v15 }
 0x730   :  { %3263 = vmatmul.msk.f32.gmra.mxu1 %vm225_vm2, %v3921_v17 }
 0x738   :  { %3264 = vmatmul.msk.f32.gmra.mxu1 %vm225_vm2, %v3986_v39 }
 0x740   :  { %3265 = vmatmul.msk.f32.gmra.mxu1 %vm225_vm2, %v3963_v32 }
 0x748   :  { %3266 = vmatmul.msk.f32.gmra.mxu1 %vm225_vm2, %v3992_v40 }
 0x750   :  { %3267 = vmatmul.msk.f32.gmra.mxu1 %vm225_vm2, %v3996_v41 }
 0x758   :  { %3268 = vmatmul.msk.f32.gmra.mxu1 %vm225_vm2, %v3932_v22 }
 0x760   :  { %3269 = vmatmul.msk.f32.gmra.mxu1 %vm225_vm2, %v3973_v35 }
 0x785   :  { %v2265_v25 = vpop.f32.mrf.mxu1 }
 0x786   :  { %v2301_v42 = vadd.f32 %v2265_v25, %v4002_v54 }
 0x788   :  { %v3270_v12 = vmul.f32 -1.442695, %v2301_v42 }
 0x78a   :  { %3680 = vpow2.f32 %v3270_v12 }
 0x78d   :  { %v2268_v36 = vpop.f32.mrf.mxu1 }
 0x78e   :  { %v2302_v19 = vadd.f32 %v2268_v36, %v4007_v58 }
 0x790   :  { %v3271_v46 = vmul.f32 -1.442695, %v2302_v19  ;;  %v3681_v8 = vpop.eup %3680 }
 0x791   :  { %v5864_v20 = vadd.f32 1.0, %v3681_v8 }
 0x792   :  { %3682 = vpow2.f32 %v3271_v46 }
 0x793   :  { %vm2354_vm0 = vweird.f32 %v5864_v20 }
 0x795   :  { %v2271_v51 = vpop.f32.mrf.mxu1 }
 0x796   :  { %v2303_v50 = vadd.f32 %v2271_v51, %v6805_v11 }
 0x798   :  { %v3272_v33 = vmul.f32 -1.442695, %v2303_v50  ;;  %v3683_v34 = vpop.eup %3682 }
 0x799   :  { %v5867_v47 = vadd.f32 1.0, %v3683_v34 }
 0x79b   :  { %vm2369_vm4 = vweird.f32 %v5867_v47 }
 0x79d   :  { %v2274_v18 = vpop.f32.mrf.mxu1 }
 0x79e   :  { %v2304_v6 = vadd.f32 %v2274_v18, %v4014_v3 }
 0x7a0   :  { %v3273_v21 = vmul.f32 -1.442695, %v2304_v6  ;;  %v6809_v6 = vld [vmem:[#allocation10_spill] sm:$0xff] }
 0x7a2   :  { %3684 = vpow2.f32 %v3273_v21 }
 0x7a5   :  { %v2277_v7 = vpop.f32.mrf.mxu1 }
 0x7a6   :  { %v2305_v13 = vadd.f32 %v2277_v7, %v6804_v37 }
 0x7a8   :  { %v3274_v44 = vmul.f32 -1.442695, %v2305_v13  ;;  %v3685_v57 = vpop.eup %3684 }
 0x7a9   :  { %v5869_v30 = vadd.f32 1.0, %v3685_v57 }
 0x7aa   :  { %3686 = vpow2.f32 %v3274_v44 }
 0x7ab   :  { %3688 = vrcp.f32 %v5864_v20  ;;  %vm2399_vm9 = vweird.f32 %v5869_v30 }
 0x7ac   :  { %3690 = vpow2.f32 %v3272_v33 }
 0x7ad   :  { %v2280_v10 = vpop.f32.mrf.mxu1 }
 0x7ae   :  { %v2306_v0 = vadd.f32 %v2280_v10, %v6806_v14 }
 0x7b0   :  { %v3275_v63 = vmul.f32 -1.442695, %v2306_v0  ;;  %v3687_v9 = vpop.eup %3686 }
 0x7b1   :  { %v5871_v38 = vadd.f32 1.0, %v3687_v9  ;;  %v5876_v61 = vpop.eup %3688 }
 0x7b2   :  { %3692 = vpow2.f32 %v3275_v63  ;;  %v3691_v5 = vpop.eup %3690  ;;  %v2350_v36 = vmul.f32 %v5876_v61, %v5864_v20  ;;  %vm2355_vm15 = vweird.f32 %v5876_v61 }
 0x7b3   :  { %3694 = vrcp.f32 %v5867_v47  ;;  %v5882_v51 = vadd.f32 1.0, %v3691_v5  ;;  %v2358_v5 = vand.u32 2147483647, %v5864_v20  ;;  %vm5930_vm1 = vmor %vm2354_vm0, %vm2355_vm15  ;;  %vm2414_vm13 = vweird.f32 %v5871_v38 }
 0x7b4   :  { %3696 = vrcp.f32 %v5869_v30  ;;  %v2351_v46 = vsub.f32 1.0, %v2350_v36  ;;  %v2373_v36 = vand.u32 2147483647, %v5867_v47 }
 0x7b5   :  { %v2283_v60 = vpop.f32.mrf.mxu1  ;;  %3698 = vrcp.f32 %v5871_v38  ;;  %vm5934_vm3 = vcmp.eq.f32.partialorder %v2358_v5, 8.507059e+37 }
 0x7b6   :  { %v2307_v55 = vadd.f32 %v2283_v60, %v6807_v53  ;;  %v2352_v34 = vmul.f32 %v5876_v61, %v2351_v46  ;;  %vm5945_vm7 = vcmp.eq.f32.partialorder %v2373_v36, 8.507059e+37  ;;  %v2420_v36 = vand.u32 2147483648, %v5871_v38 }
 0x7b8   :  { %v3276_v59 = vmul.f32 -1.442695, %v2307_v55  ;;  %v3693_v25 = vpop.eup %3692 }
 0x7b9   :  { %v5884_v18 = vpop.eup %3694  ;;  %v5886_v42 = vadd.f32 1.0, %v3693_v25 }
 0x7ba   :  { %v5888_v7 = vpop.eup %3696  ;;  %v2365_v10 = vmul.f32 %v5884_v18, %v5867_v47  ;;  %vm2370_vm5 = vweird.f32 %v5884_v18 }
 0x7bb   :  { %v5890_v19 = vpop.eup %3698  ;;  %v2395_v44 = vmul.f32 %v5888_v7, %v5869_v30  ;;  %vm2400_vm8 = vweird.f32 %v5888_v7  ;;  %vm5964_vm11 = vmor %vm2369_vm4, %vm2370_vm5  ;;  %vm2384_vm5 = vweird.f32 %v5882_v51 }
 0x7bc   :  { %v2410_v50 = vmul.f32 %v5890_v19, %v5871_v38  ;;  %v2366_v60 = vsub.f32 1.0, %v2365_v10  ;;  %v6810_v10 = vld [vmem:[#allocation9_spill] sm:$0xff]  ;;  %vm2415_vm10 = vweird.f32 %v5890_v19  ;;  %vm5972_vm12 = vmor %vm2399_vm9, %vm2400_vm8 }
 0x7bd   :  { %v2286_v62 = vpop.f32.mrf.mxu1  ;;  %v2396_v63 = vsub.f32 1.0, %v2395_v44  ;;  %vm5981_vm14 = vmor %vm2414_vm13, %vm2415_vm10 }
 0x7be   :  { %v2308_v49 = vadd.f32 %v2286_v62, %v6808_v45  ;;  %v2411_v9 = vsub.f32 1.0, %v2410_v50  ;;  %v2367_v25 = vmul.f32 %v5884_v18, %v2366_v60 }
 0x7bf   :  { %v2397_v46 = vmul.f32 %v5888_v7, %v2396_v63 }
 0x7c0   :  { %v3277_v48 = vmul.f32 -1.442695, %v2308_v49  ;;  %v2412_v44 = vmul.f32 %v5890_v19, %v2411_v9  ;;  %v2368_v9 = vadd.f32 %v5884_v18, %v2367_v25  ;;  %v2405_v25 = vand.u32 2147483648, %v5869_v30 }
 0x7c2   :  { %3700 = vpow2.f32 %v3277_v48  ;;  %v2353_v48 = vadd.f32 %v5876_v61, %v2352_v34  ;;  %v2375_v34 = vand.u32 2147483648, %v5867_v47  ;;  %v2372_v45 = vsel %vm5964_vm11, %v5884_v18, %v2368_v9 }
 0x7c3   :  { %3702 = vpow2.f32 %v3276_v59  ;;  %v2360_v59 = vand.u32 2147483648, %v5864_v20  ;;  %v2406_v37 = vor.u32 1.1754944e-38, %v2405_v25 }
 0x7c4   :  { %3704 = vrcp.f32 %v5882_v51  ;;  %v2357_v63 = vsel %vm5930_vm1, %v5876_v61, %v2353_v48  ;;  %v2413_v48 = vadd.f32 %v5890_v19, %v2412_v44  ;;  %vm2429_vm1 = vweird.f32 %v5886_v42 }
 0x7c5   :  { %v2289_v12 = vpop.f32.mrf.mxu1  ;;  %3706 = vrcp.f32 %v5886_v42  ;;  %v2361_v20 = vor.u32 1.1754944e-38, %v2360_v59  ;;  %v2398_v59 = vadd.f32 %v5888_v7, %v2397_v46  ;;  %v2421_v46 = vor.u32 1.1754944e-38, %v2420_v36 }
 0x7c6   :  { %v2309_v13 = vadd.f32 %v2289_v12, %v6809_v6  ;;  %v2417_v14 = vsel %vm5981_vm14, %v5890_v19, %v2413_v48  ;;  %v2433_v36 = vand.u32 2147483647, %v5886_v42 }
 0x7c8   :  { %v3701_v21 = vpop.eup %3700  ;;  %v3278_v8 = vmul.f32 -1.442695, %v2309_v13  ;;  %vm2434_vm8 = vcmp.eq.f32.partialorder %v2433_v36, 8.507059e+37 }
 0x7c9   :  { %v3703_v0 = vpop.eup %3702  ;;  %v5901_v33 = vadd.f32 1.0, %v3701_v21 }
 0x7ca   :  { %3708 = vpow2.f32 %v3278_v8  ;;  %v5904_v57 = vpop.eup %3704  ;;  %v5906_v55 = vadd.f32 1.0, %v3703_v0 }
 0x7cb   :  { %v5908_v49 = vpop.eup %3706  ;;  %3710 = vrcp.f32 %v5901_v33  ;;  %v2380_v13 = vmul.f32 %v5904_v57, %v5882_v51  ;;  %vm2385_vm0 = vweird.f32 %v5904_v57 }
 0x7cc   :  { %v2425_v8 = vmul.f32 %v5908_v49, %v5886_v42  ;;  %3712 = vrcp.f32 %v5906_v55  ;;  %vm2444_vm14 = vweird.f32 %v5906_v55 }
 0x7cd   :  { %v2292_v62 = vpop.f32.mrf.mxu1  ;;  %v2381_v5 = vsub.f32 1.0, %v2380_v13  ;;  %v6817_v13 = vld [vmem:[#allocation6_spill] sm:$0xff] }
 0x7ce   :  { %v2310_v21 = vadd.f32 %v2292_v62, %v6810_v10  ;;  %v2426_v0 = vsub.f32 1.0, %v2425_v8  ;;  %v2403_v8 = vand.u32 2147483647, %v5869_v30  ;;  %v2435_v62 = vand.u32 2147483648, %v5886_v42 }
 0x7cf   :  { %v2382_v53 = vmul.f32 %v5904_v57, %v2381_v5 }
 0x7d0   :  { %v3709_v12 = vpop.eup %3708  ;;  %3714 = vtanh.f32 %v2310_v21  ;;  %v2427_v30 = vmul.f32 %v5908_v49, %v2426_v0  ;;  %vm2404_vm6 = vcmp.eq.f32.partialorder %v2403_v8, 8.507059e+37 }
 0x7d1   :  { %v5926_v50 = vadd.f32 1.0, %v3709_v12  ;;  %v5951_v12 = vpop.eup %3710  ;;  %v2383_v19 = vadd.f32 %v5904_v57, %v2382_v53 }
 0x7d2   :  { %v5968_v21 = vpop.eup %3712  ;;  %v2455_v6 = vmul.f32 %v5951_v12, %v5901_v33  ;;  %v2428_v0 = vadd.f32 %v5908_v49, %v2427_v30  ;;  %vm2460_vm9 = vweird.f32 %v5951_v12 }
 0x7d3   :  { %3716 = vrcp.f32 %v5926_v50  ;;  %v2440_v18 = vmul.f32 %v5968_v21, %v5906_v55  ;;  %vm2445_vm11 = vweird.f32 %v5968_v21 }
 0x7d5   :  { %v2295_v61 = vpop.f32.mrf.mxu1 }
 0x7d6   :  { %v2311_v10 = vadd.f32 %v2295_v61, %v6817_v13  ;;  %v2376_v61 = vor.u32 1.1754944e-38, %v2375_v34  ;;  %v2418_v13 = vand.u32 2147483647, %v5871_v38  ;;  %v2362_v38 = vsel %vm5934_vm3, %v2361_v20, %v2357_v63  ;;  %v3715_v11 = vpop.eup %3714 }
 0x7d7   :  { %v2402_v34 = vsel %vm5972_vm12, %v5888_v7, %v2398_v59  ;;  %v2456_v63 = vsub.f32 1.0, %v2455_v6  ;;  %vm2430_vm3 = vweird.f32 %v5908_v49  ;;  %v2490_v5 = vmul.f32 %v3715_v11, %v2362_v38 }
 0x7d8   :  { %3718 = vtanh.f32 %v2311_v10  ;;  %v2390_v10 = vand.u32 2147483648, %v5882_v51  ;;  %v2377_v60 = vsel %vm5945_vm7, %v2376_v61, %v2372_v45  ;;  %vm2419_vm15 = vcmp.eq.f32.partialorder %v2418_v13, 8.507059e+37  ;;  %vm6019_vm4 = vmor %vm2429_vm1, %vm2430_vm3 }
 0x7d9   :  { %v6003_v9 = vpop.eup %3716  ;;  %v2407_v7 = vsel %vm2404_vm6, %v2406_v37, %v2402_v34  ;;  %v2422_v20 = vsel %vm2419_vm15, %v2421_v46, %v2417_v14  ;;  %v2441_v14 = vsub.f32 1.0, %v2440_v18  ;;  %v2388_v13 = vand.u32 2147483647, %v5882_v51  ;;  %vm2386_vm7 = vmor %vm2384_vm5, %vm2385_vm0 }
 0x7da   :  { %v2470_v45 = vmul.f32 %v6003_v9, %v5926_v50  ;;  %v2487_v53 = vmul.f32 %v2407_v7, %v5766_v56  ;;  %v2488_v6 = vmul.f32 %v2422_v20, %v5768_v1  ;;  %v2457_v44 = vmul.f32 %v5951_v12, %v2456_v63  ;;  %vm6062_vm6 = vmor %vm2444_vm14, %vm2445_vm11 }
 0x7db   :  { %v2432_v56 = vsel %vm6019_vm4, %v5908_v49, %v2428_v0  ;;  %v2436_v1 = vor.u32 1.1754944e-38, %v2435_v62  ;;  %v2387_v47 = vsel %vm2386_vm7, %v5904_v57, %v2383_v19  ;;  %v2442_v51 = vmul.f32 %v5968_v21, %v2441_v14 }
 0x7dc   :  { %v6026_v8 = vadd.f32 %v2490_v5, %v2487_v53  ;;  %v2471_v42 = vsub.f32 1.0, %v2470_v45  ;;  %v2391_v30 = vor.u32 1.1754944e-38, %v2390_v10  ;;  %vm2389_vm10 = vcmp.eq.f32.partialorder %v2388_v13, 8.507059e+37 }
 0x7dd   :  { %v2298_v59 = vpop.f32.mrf.mxu1  ;;  %v2437_v38 = vsel %vm2434_vm8, %v2436_v1, %v2432_v56  ;;  %v2458_v34 = vadd.f32 %v5951_v12, %v2457_v44  ;;  %v2465_v18 = vand.u32 2147483648, %v5901_v33  ;;  %vm2459_vm12 = vweird.f32 %v5901_v33 }
 0x7de   :  { %v3719_v48 = vpop.eup %3718  ;;  %v2312_v37 = vadd.f32 %v2298_v59, %v6694_v16  ;;  %v2392_v46 = vsel %vm2389_vm10, %v2391_v30, %v2387_v47  ;;  %v2472_v49 = vmul.f32 %v6003_v9, %v2471_v42  ;;  %v2463_v10 = vand.u32 2147483647, %v5901_v33  ;;  %vm6048_vm13 = vmor %vm2459_vm12, %vm2460_vm9 }
 0x7df   :  { %v2491_v25 = vmul.f32 %v3719_v48, %v2377_v60  ;;  %v2443_v60 = vadd.f32 %v5968_v21, %v2442_v51  ;;  %v2489_v7 = vmul.f32 %v2437_v38, %v5798_v26  ;;  %v2450_v63 = vand.u32 2147483648, %v5906_v55  ;;  %v2527_v26 = vld [vmem:[%s6614_s3 + $0x2] sm:$0x1] }
 0x7e0   :  { %3720 = vtanh.f32 %v2312_v37  ;;  %v2462_v5 = vsel %vm6048_vm13, %v5951_v12, %v2458_v34  ;;  %v2448_v59 = vand.u32 2147483647, %v5906_v55  ;;  %v2466_v48 = vor.u32 1.1754944e-38, %v2465_v18 }
 0x7e1   :  { %v6028_v61 = vadd.f32 %v2491_v25, %v2488_v6  ;;  %v2473_v62 = vadd.f32 %v6003_v9, %v2472_v49  ;;  %vm2475_vm15 = vweird.f32 %v6003_v9  ;;  %vm2464_vm0 = vcmp.eq.f32.partialorder %v2463_v10, 8.507059e+37 }
 0x7e2   :  { %v2447_v12 = vsel %vm6062_vm6, %v5968_v21, %v2443_v60  ;;  %v2480_v45 = vand.u32 2147483648, %v5926_v50  ;;  %v2467_v37 = vsel %vm2464_vm0, %v2466_v48, %v2462_v5  ;;  %v2451_v14 = vor.u32 1.1754944e-38, %v2450_v63  ;;  %v2524_v48 = vld [vmem:[%s6614_s3 + $0x7] sm:$0x1] }
 0x7e3   :  { %3722 = vtanh.f32 %v6028_v61  ;;  %vm2474_vm1 = vweird.f32 %v5926_v50  ;;  %v2478_v53 = vand.u32 2147483647, %v5926_v50  ;;  %vm2449_vm3 = vcmp.eq.f32.partialorder %v2448_v59, 8.507059e+37 }
 0x7e4   :  { %3724 = vtanh.f32 %v6026_v8  ;;  %vm2476_vm4 = vmor %vm2474_vm1, %vm2475_vm15  ;;  %v2452_v25 = vsel %vm2449_vm3, %v2451_v14, %v2447_v12  ;;  %v2481_v13 = vor.u32 1.1754944e-38, %v2480_v45 }
 0x7e5   :  { %v2477_v36 = vsel %vm2476_vm4, %v6003_v9, %v2473_v62  ;;  %vm2479_vm5 = vcmp.eq.f32.partialorder %v2478_v53, 8.507059e+37 }
 0x7e6   :  { %v3721_v57 = vpop.eup %3720  ;;  %v2482_v1 = vsel %vm2479_vm5, %v2481_v13, %v2477_v36  ;;  %v6830_v13 = vld [vmem:[#allocation3_spill] sm:$0xff] }
 0x7e7   :  { %v2492_v20 = vmul.f32 %v3721_v57, %v2392_v46 }
 0x7e9   :  { %v3723_v33 = vpop.eup %3722  ;;  %v6058_v0 = vadd.f32 %v2492_v20, %v2489_v7 }
 0x7ea   :  { %v3725_v55 = vpop.eup %3724  ;;  %v2500_v6 = vmul.f32 %v3723_v33, %v2467_v37 }
 0x7eb   :  { %3726 = vtanh.f32 %v6058_v0  ;;  %v2499_v11 = vmul.f32 %v3725_v55, %v2452_v25 }
 0x7ec   :  { %v2503_v21 = vmul.f32 %v2500_v6, %v4266_v31  ;;  %v2514_v44 = vmul.f32 %v2500_v6, %v4235_v2 }
 0x7ed   :  { %v2502_v47 = vmul.f32 %v2499_v11, %v4188_v52  ;;  %v2513_v50 = vmul.f32 %v2499_v11, %v4237_v43 }
 0x7ef   :  { %v2505_v9 = vadd.f32 %v2503_v21, %v2502_v47  ;;  %v2516_v38 = vadd.f32 %v2514_v44, %v2513_v50  ;;  %v6831_v50 = vld [vmem:[#allocation2_spill] sm:$0xff] }
 0x7f1   :  { %v3727_v56 = vpop.eup %3726 }
 0x7f2   :  { %v2501_v42 = vmul.f32 %v3727_v56, %v2482_v1 }
 0x7f4   :  { %v2504_v51 = vmul.f32 %v2501_v42, %v4270_v4  ;;  %v2515_v30 = vmul.f32 %v2501_v42, %v4268_v27  ;;  %2543 = vmatpush.msra.mxu0 %v2501_v42 }
 0x7f6   :  { %2544 = vmatpush.msra.mxu0 %v2500_v6  ;;  %v2506_v34 = vadd.f32 %v2505_v9, %v2504_v51  ;;  %v2517_v46 = vadd.f32 %v2516_v38, %v2515_v30  ;;  %v6832_v30 = vld [vmem:[#allocation4_spill] sm:$0xff] }
 0x7f8   :  { %v2507_v18 = vrot.slane %v2506_v34, 4  ;;  %v2518_v57 = vrot.slane %v2517_v46, 4  ;;  %2545 = vmatpush.msra.mxu0 %v2499_v11 }
 0x7f9   :  { %3279 = vmatmul.msk.f32.vlgmr.msra.gmra.mxu0 %vm225_vm2, %v3936_v23 }
 0x7fa   :  { %v2508_v49 = vadd.f32 %v2507_v18, %v2506_v34  ;;  %v2519_v10 = vadd.f32 %v2518_v57, %v2517_v46 }
 0x7fc   :  { %v2509_v60 = vrot.slane %v2508_v49, 2  ;;  %v2520_v7 = vrot.slane %v2519_v10, 2 }
 0x7fe   :  { %v2510_v20 = vadd.f32 %v2509_v60, %v2508_v49  ;;  %v2521_v19 = vadd.f32 %v2520_v7, %v2519_v10 }
 0x800   :  { %v2511_v63 = vrot.slane %v2510_v20, 1  ;;  %v2522_v5 = vrot.slane %v2521_v19, 1 }
 0x801   :  { %3280 = vmatmul.msk.f32.gmra.mxu0 %vm225_vm2, %v3951_v28 }
 0x802   :  { %v2512_v59 = vadd.f32 %v2511_v63, %v2510_v20  ;;  %v2523_v33 = vadd.f32 %v2522_v5, %v2521_v19  ;;  %v6833_v19 = vld [vmem:[#allocation5_spill] sm:$0xff] }
 0x804   :  { %v2525_v62 = vadd.f32 %v2524_v48, %v2512_v59  ;;  %v2528_v12 = vadd.f32 %v2527_v26, %v2523_v33  ;;  %v6834_v59 = vld [vmem:[#allocation7_spill] sm:$0xff] }
 0x806   :  { %2526 = vst [vmem:[%s6614_s3 + $0x7] sm:$0x1] %v2525_v62 }
 0x807   :  { %2529 = vst [vmem:[%s6614_s3 + $0x2] sm:$0x1] %v2528_v12 }
 0x809   :  { %3281 = vmatmul.msk.f32.gmra.mxu0 %vm225_vm2, %v3938_v24 }
 0x811   :  { %3282 = vmatmul.msk.f32.gmra.mxu0 %vm225_vm2, %v3953_v29 }
 0x819   :  { %3283 = vmatmul.msk.f32.gmra.mxu0 %vm225_vm2, %v3916_v15 }
 0x821   :  { %3284 = vmatmul.msk.f32.gmra.mxu0 %vm225_vm2, %v3921_v17 }
 0x829   :  { %3285 = vmatmul.msk.f32.gmra.mxu0 %vm225_vm2, %v3986_v39 }
 0x831   :  { %3286 = vmatmul.msk.f32.gmra.mxu0 %vm225_vm2, %v3963_v32 }
 0x839   :  { %3287 = vmatmul.msk.f32.gmra.mxu0 %vm225_vm2, %v3992_v40 }
 0x841   :  { %3288 = vmatmul.msk.f32.gmra.mxu0 %vm225_vm2, %v3996_v41 }
 0x849   :  { %3289 = vmatmul.msk.f32.gmra.mxu0 %vm225_vm2, %v3932_v22 }
 0x851   :  { %3290 = vmatmul.msk.f32.gmra.mxu0 %vm225_vm2, %v3973_v35 }
 0x876   :  { %v2547_v55 = vpop.f32.mrf.mxu0 }
 0x877   :  { %v2583_v53 = vadd.f32 %v2547_v55, %v4002_v54 }
 0x879   :  { %v3291_v25 = vmul.f32 -1.442695, %v2583_v53 }
 0x87b   :  { %3728 = vpow2.f32 %v3291_v25 }
 0x87e   :  { %v2550_v45 = vpop.f32.mrf.mxu0 }
 0x87f   :  { %v2584_v36 = vadd.f32 %v2550_v45, %v4007_v58 }
 0x881   :  { %v3292_v44 = vmul.f32 -1.442695, %v2584_v36  ;;  %v3729_v47 = vpop.eup %3728 }
 0x882   :  { %v6124_v38 = vadd.f32 1.0, %v3729_v47 }
 0x883   :  { %3730 = vpow2.f32 %v3292_v44 }
 0x884   :  { %vm2636_vm8 = vweird.f32 %v6124_v38 }
 0x886   :  { %v2553_v37 = vpop.f32.mrf.mxu0 }
 0x887   :  { %v2585_v51 = vadd.f32 %v2553_v37, %v6831_v50 }
 0x889   :  { %v3293_v46 = vmul.f32 -1.442695, %v2585_v51  ;;  %v3731_v18 = vpop.eup %3730 }
 0x88a   :  { %v6127_v60 = vadd.f32 1.0, %v3731_v18 }
 0x88c   :  { %vm2651_vm11 = vweird.f32 %v6127_v60 }
 0x88e   :  { %v2556_v14 = vpop.f32.mrf.mxu0 }
 0x88f   :  { %v2586_v11 = vadd.f32 %v2556_v14, %v4014_v3 }
 0x891   :  { %v3294_v1 = vmul.f32 -1.442695, %v2586_v11  ;;  %v6835_v11 = vld [vmem:[#allocation10_spill] sm:$0xff] }
 0x893   :  { %3732 = vpow2.f32 %v3294_v1 }
 0x896   :  { %v2559_v6 = vpop.f32.mrf.mxu0 }
 0x897   :  { %v2587_v21 = vadd.f32 %v2559_v6, %v6830_v13 }
 0x899   :  { %v3295_v42 = vmul.f32 -1.442695, %v2587_v21  ;;  %v3733_v49 = vpop.eup %3732 }
 0x89a   :  { %v6129_v7 = vadd.f32 1.0, %v3733_v49 }
 0x89b   :  { %3734 = vpow2.f32 %v3295_v42 }
 0x89c   :  { %3736 = vrcp.f32 %v6124_v38  ;;  %vm2681_vm15 = vweird.f32 %v6129_v7 }
 0x89d   :  { %3738 = vpow2.f32 %v3293_v46 }
 0x89e   :  { %v2562_v56 = vpop.f32.mrf.mxu0 }
 0x89f   :  { %v2588_v9 = vadd.f32 %v2562_v56, %v6832_v30 }
 0x8a1   :  { %v3296_v57 = vmul.f32 -1.442695, %v2588_v9  ;;  %v3735_v10 = vpop.eup %3734 }
 0x8a2   :  { %v6131_v20 = vadd.f32 1.0, %v3735_v10  ;;  %v6136_v48 = vpop.eup %3736 }
 0x8a3   :  { %3740 = vpow2.f32 %v3296_v57  ;;  %v3739_v26 = vpop.eup %3738  ;;  %v2632_v45 = vmul.f32 %v6136_v48, %v6124_v38  ;;  %vm2637_vm7 = vweird.f32 %v6136_v48 }
 0x8a4   :  { %3742 = vrcp.f32 %v6127_v60  ;;  %v6142_v37 = vadd.f32 1.0, %v3739_v26  ;;  %v2640_v26 = vand.u32 2147483647, %v6124_v38  ;;  %vm6190_vm10 = vmor %vm2636_vm8, %vm2637_vm7  ;;  %vm2696_vm3 = vweird.f32 %v6131_v20 }
 0x8a5   :  { %3744 = vrcp.f32 %v6129_v7  ;;  %v2633_v44 = vsub.f32 1.0, %v2632_v45  ;;  %v2655_v45 = vand.u32 2147483647, %v6127_v60 }
 0x8a6   :  { %v2565_v34 = vpop.f32.mrf.mxu0  ;;  %3746 = vrcp.f32 %v6131_v20  ;;  %vm6194_vm9 = vcmp.eq.f32.partialorder %v2640_v26, 8.507059e+37 }
 0x8a7   :  { %v2589_v63 = vadd.f32 %v2565_v34, %v6833_v19  ;;  %v2634_v18 = vmul.f32 %v6136_v48, %v2633_v44  ;;  %vm6205_vm13 = vcmp.eq.f32.partialorder %v2655_v45, 8.507059e+37  ;;  %v2702_v45 = vand.u32 2147483648, %v6131_v20 }
 0x8a9   :  { %v3297_v62 = vmul.f32 -1.442695, %v2589_v63  ;;  %v3741_v55 = vpop.eup %3740 }
 0x8aa   :  { %v6144_v14 = vpop.eup %3742  ;;  %v6146_v53 = vadd.f32 1.0, %v3741_v55 }
 0x8ab   :  { %v6148_v6 = vpop.eup %3744  ;;  %v2647_v56 = vmul.f32 %v6144_v14, %v6127_v60  ;;  %vm2652_vm12 = vweird.f32 %v6144_v14 }
 0x8ac   :  { %v6150_v36 = vpop.eup %3746  ;;  %v2677_v42 = vmul.f32 %v6148_v6, %v6129_v7  ;;  %vm2682_vm14 = vweird.f32 %v6148_v6  ;;  %vm6224_vm0 = vmor %vm2651_vm11, %vm2652_vm12  ;;  %vm2666_vm12 = vweird.f32 %v6142_v37 }
 0x8ad   :  { %v2692_v51 = vmul.f32 %v6150_v36, %v6131_v20  ;;  %v2648_v34 = vsub.f32 1.0, %v2647_v56  ;;  %v6836_v56 = vld [vmem:[#allocation9_spill] sm:$0xff]  ;;  %vm2697_vm6 = vweird.f32 %v6150_v36  ;;  %vm6232_vm1 = vmor %vm2681_vm15, %vm2682_vm14 }
 0x8ae   :  { %v2568_v5 = vpop.f32.mrf.mxu0  ;;  %v2678_v57 = vsub.f32 1.0, %v2677_v42  ;;  %vm6241_vm4 = vmor %vm2696_vm3, %vm2697_vm6 }
 0x8af   :  { %v2590_v33 = vadd.f32 %v2568_v5, %v6834_v59  ;;  %v2693_v10 = vsub.f32 1.0, %v2692_v51  ;;  %v2649_v55 = vmul.f32 %v6144_v14, %v2648_v34 }
 0x8b0   :  { %v2679_v44 = vmul.f32 %v6148_v6, %v2678_v57 }
 0x8b1   :  { %v3298_v12 = vmul.f32 -1.442695, %v2590_v33  ;;  %v2694_v42 = vmul.f32 %v6150_v36, %v2693_v10  ;;  %v2650_v10 = vadd.f32 %v6144_v14, %v2649_v55  ;;  %v2687_v55 = vand.u32 2147483648, %v6129_v7 }
 0x8b3   :  { %3748 = vpow2.f32 %v3298_v12  ;;  %v2635_v12 = vadd.f32 %v6136_v48, %v2634_v18  ;;  %v2657_v18 = vand.u32 2147483648, %v6127_v60  ;;  %v2654_v59 = vsel %vm6224_vm0, %v6144_v14, %v2650_v10 }
 0x8b4   :  { %3750 = vpow2.f32 %v3297_v62  ;;  %v2642_v62 = vand.u32 2147483648, %v6124_v38  ;;  %v2688_v13 = vor.u32 1.1754944e-38, %v2687_v55 }
 0x8b5   :  { %3752 = vrcp.f32 %v6142_v37  ;;  %v2639_v57 = vsel %vm6190_vm10, %v6136_v48, %v2635_v12  ;;  %v2695_v12 = vadd.f32 %v6150_v36, %v2694_v42  ;;  %vm2711_vm10 = vweird.f32 %v6146_v53 }
 0x8b6   :  { %v2571_v25 = vpop.f32.mrf.mxu0  ;;  %3754 = vrcp.f32 %v6146_v53  ;;  %v2643_v38 = vor.u32 1.1754944e-38, %v2642_v62  ;;  %v2680_v62 = vadd.f32 %v6148_v6, %v2679_v44  ;;  %v2703_v44 = vor.u32 1.1754944e-38, %v2702_v45 }
 0x8b7   :  { %v2591_v21 = vadd.f32 %v2571_v25, %v6835_v11  ;;  %v2699_v30 = vsel %vm6241_vm4, %v6150_v36, %v2695_v12  ;;  %v2715_v45 = vand.u32 2147483647, %v6146_v53 }
 0x8b9   :  { %v3749_v1 = vpop.eup %3748  ;;  %v3299_v47 = vmul.f32 -1.442695, %v2591_v21  ;;  %vm2716_vm14 = vcmp.eq.f32.partialorder %v2715_v45, 8.507059e+37 }
 0x8ba   :  { %v3751_v9 = vpop.eup %3750  ;;  %v6161_v46 = vadd.f32 1.0, %v3749_v1 }
 0x8bb   :  { %3756 = vpow2.f32 %v3299_v47  ;;  %v6164_v49 = vpop.eup %3752  ;;  %v6166_v63 = vadd.f32 1.0, %v3751_v9 }
 0x8bc   :  { %v6168_v33 = vpop.eup %3754  ;;  %3758 = vrcp.f32 %v6161_v46  ;;  %v2662_v21 = vmul.f32 %v6164_v49, %v6142_v37  ;;  %vm2667_vm8 = vweird.f32 %v6164_v49 }
 0x8bd   :  { %v2707_v47 = vmul.f32 %v6168_v33, %v6146_v53  ;;  %3760 = vrcp.f32 %v6166_v63  ;;  %vm2726_vm4 = vweird.f32 %v6166_v63 }
 0x8be   :  { %v2574_v5 = vpop.f32.mrf.mxu0  ;;  %v2663_v26 = vsub.f32 1.0, %v2662_v21  ;;  %v6843_v21 = vld [vmem:[#allocation6_spill] sm:$0xff] }
 0x8bf   :  { %v2592_v1 = vadd.f32 %v2574_v5, %v6836_v56  ;;  %v2708_v9 = vsub.f32 1.0, %v2707_v47  ;;  %v2685_v47 = vand.u32 2147483647, %v6129_v7  ;;  %v2717_v5 = vand.u32 2147483648, %v6146_v53 }
 0x8c0   :  { %v2664_v19 = vmul.f32 %v6164_v49, %v2663_v26 }
 0x8c1   :  { %v3757_v25 = vpop.eup %3756  ;;  %3762 = vtanh.f32 %v2592_v1  ;;  %v2709_v7 = vmul.f32 %v6168_v33, %v2708_v9  ;;  %vm2686_vm5 = vcmp.eq.f32.partialorder %v2685_v47, 8.507059e+37 }
 0x8c2   :  { %v6186_v51 = vadd.f32 1.0, %v3757_v25  ;;  %v6211_v25 = vpop.eup %3758  ;;  %v2665_v36 = vadd.f32 %v6164_v49, %v2664_v19 }
 0x8c3   :  { %v6228_v1 = vpop.eup %3760  ;;  %v2737_v11 = vmul.f32 %v6211_v25, %v6161_v46  ;;  %v2710_v9 = vadd.f32 %v6168_v33, %v2709_v7  ;;  %vm2742_vm15 = vweird.f32 %v6211_v25 }
 0x8c4   :  { %3764 = vrcp.f32 %v6186_v51  ;;  %v2722_v14 = vmul.f32 %v6228_v1, %v6166_v63  ;;  %vm2727_vm0 = vweird.f32 %v6228_v1 }
 0x8c6   :  { %v2577_v48 = vpop.f32.mrf.mxu0 }
 0x8c7   :  { %v2593_v56 = vadd.f32 %v2577_v48, %v6843_v21  ;;  %v2658_v48 = vor.u32 1.1754944e-38, %v2657_v18  ;;  %v2700_v21 = vand.u32 2147483647, %v6131_v20  ;;  %v2644_v20 = vsel %vm6194_vm9, %v2643_v38, %v2639_v57  ;;  %v3763_v50 = vpop.eup %3762 }
 0x8c8   :  { %v2684_v18 = vsel %vm6232_vm1, %v6148_v6, %v2680_v62  ;;  %v2738_v57 = vsub.f32 1.0, %v2737_v11  ;;  %vm2712_vm9 = vweird.f32 %v6168_v33  ;;  %v2772_v26 = vmul.f32 %v3763_v50, %v2644_v20 }
 0x8c9   :  { %3766 = vtanh.f32 %v2593_v56  ;;  %v2672_v56 = vand.u32 2147483648, %v6142_v37  ;;  %v2659_v34 = vsel %vm6205_vm13, %v2658_v48, %v2654_v59  ;;  %vm2701_vm7 = vcmp.eq.f32.partialorder %v2700_v21, 8.507059e+37  ;;  %vm6279_vm11 = vmor %vm2711_vm10, %vm2712_vm9 }
 0x8ca   :  { %v6263_v10 = vpop.eup %3764  ;;  %v2689_v6 = vsel %vm2686_vm5, %v2688_v13, %v2684_v18  ;;  %v2704_v38 = vsel %vm2701_vm7, %v2703_v44, %v2699_v30  ;;  %v2723_v30 = vsub.f32 1.0, %v2722_v14  ;;  %v2670_v21 = vand.u32 2147483647, %v6142_v37  ;;  %vm2668_vm13 = vmor %vm2666_vm12, %vm2667_vm8 }
 0x8cb   :  { %v2752_v59 = vmul.f32 %v6263_v10, %v6186_v51  ;;  %v2769_v19 = vmul.f32 %v2689_v6, %v6026_v8  ;;  %v2770_v11 = vmul.f32 %v2704_v38, %v6028_v61  ;;  %v2739_v42 = vmul.f32 %v6211_v25, %v2738_v57  ;;  %vm6322_vm5 = vmor %vm2726_vm4, %vm2727_vm0 }
 0x8cc   :  { %v2714_v8 = vsel %vm6279_vm11, %v6168_v33, %v2710_v9  ;;  %v2718_v61 = vor.u32 1.1754944e-38, %v2717_v5  ;;  %v2669_v60 = vsel %vm2668_vm13, %v6164_v49, %v2665_v36  ;;  %v2724_v37 = vmul.f32 %v6228_v1, %v2723_v30 }
 0x8cd   :  { %v6286_v47 = vadd.f32 %v2772_v26, %v2769_v19  ;;  %v2753_v53 = vsub.f32 1.0, %v2752_v59  ;;  %v2673_v7 = vor.u32 1.1754944e-38, %v2672_v56  ;;  %vm2671_vm6 = vcmp.eq.f32.partialorder %v2670_v21, 8.507059e+37 }
 0x8ce   :  { %v2580_v62 = vpop.f32.mrf.mxu0  ;;  %v2719_v20 = vsel %vm2716_vm14, %v2718_v61, %v2714_v8  ;;  %v2740_v18 = vadd.f32 %v6211_v25, %v2739_v42  ;;  %v2747_v14 = vand.u32 2147483648, %v6161_v46  ;;  %vm2741_vm1 = vweird.f32 %v6161_v46 }
 0x8cf   :  { %v3767_v12 = vpop.eup %3766  ;;  %v2594_v13 = vadd.f32 %v2580_v62, %v6694_v16  ;;  %v2674_v44 = vsel %vm2671_vm6, %v2673_v7, %v2669_v60  ;;  %v2754_v33 = vmul.f32 %v6263_v10, %v2753_v53  ;;  %v2745_v56 = vand.u32 2147483647, %v6161_v46  ;;  %vm6308_vm3 = vmor %vm2741_vm1, %vm2742_vm15 }
 0x8d0   :  { %v2773_v55 = vmul.f32 %v3767_v12, %v2659_v34  ;;  %v2725_v34 = vadd.f32 %v6228_v1, %v2724_v37  ;;  %v2771_v6 = vmul.f32 %v2719_v20, %v6058_v0  ;;  %v2732_v57 = vand.u32 2147483648, %v6166_v63 }
 0x8d1   :  { %3768 = vtanh.f32 %v2594_v13  ;;  %v2744_v26 = vsel %vm6308_vm3, %v6211_v25, %v2740_v18  ;;  %v2730_v62 = vand.u32 2147483647, %v6166_v63  ;;  %v2748_v12 = vor.u32 1.1754944e-38, %v2747_v14 }
 0x8d2   :  { %v6288_v48 = vadd.f32 %v2773_v55, %v2770_v11  ;;  %v2755_v5 = vadd.f32 %v6263_v10, %v2754_v33  ;;  %vm2757_vm7 = vweird.f32 %v6263_v10  ;;  %vm2746_vm8 = vcmp.eq.f32.partialorder %v2745_v56, 8.507059e+37 }
 0x8d3   :  { %v2729_v25 = vsel %vm6322_vm5, %v6228_v1, %v2725_v34  ;;  %v2762_v59 = vand.u32 2147483648, %v6186_v51  ;;  %v2749_v13 = vsel %vm2746_vm8, %v2748_v12, %v2744_v26  ;;  %v2733_v30 = vor.u32 1.1754944e-38, %v2732_v57  ;;  %v2806_v12 = vld [vmem:[%s6614_s3 + $0x8] sm:$0x1] }
 0x8d4   :  { %3770 = vtanh.f32 %v6288_v48  ;;  %vm2756_vm10 = vweird.f32 %v6186_v51  ;;  %v2760_v19 = vand.u32 2147483647, %v6186_v51  ;;  %vm2731_vm9 = vcmp.eq.f32.partialorder %v2730_v62, 8.507059e+37 }
 0x8d5   :  { %3772 = vtanh.f32 %v6286_v47  ;;  %vm2758_vm11 = vmor %vm2756_vm10, %vm2757_vm7  ;;  %v2734_v55 = vsel %vm2731_vm9, %v2733_v30, %v2729_v25  ;;  %v2763_v21 = vor.u32 1.1754944e-38, %v2762_v59 }
 0x8d6   :  { %v2759_v45 = vsel %vm2758_vm11, %v6263_v10, %v2755_v5  ;;  %vm2761_vm12 = vcmp.eq.f32.partialorder %v2760_v19, 8.507059e+37  ;;  %v6857_v19 = vld [vmem:[#allocation2_spill] sm:$0xff] }
 0x8d7   :  { %v3769_v49 = vpop.eup %3768  ;;  %v2764_v61 = vsel %vm2761_vm12, %v2763_v21, %v2759_v45 }
 0x8d8   :  { %v2774_v38 = vmul.f32 %v3769_v49, %v2674_v44 }
 0x8da   :  { %v3771_v46 = vpop.eup %3770  ;;  %v6318_v9 = vadd.f32 %v2774_v38, %v2771_v6 }
 0x8db   :  { %v3773_v63 = vpop.eup %3772  ;;  %v2782_v11 = vmul.f32 %v3771_v46, %v2749_v13 }
 0x8dc   :  { %3774 = vtanh.f32 %v6318_v9  ;;  %v2781_v50 = vmul.f32 %v3773_v63, %v2734_v55  ;;  %v6856_v63 = vld [vmem:[#allocation3_spill] sm:$0xff] }
 0x8dd   :  { %v2785_v1 = vmul.f32 %v2782_v11, %v4266_v31  ;;  %v2796_v42 = vmul.f32 %v2782_v11, %v4235_v2 }
 0x8de   :  { %v2784_v60 = vmul.f32 %v2781_v50, %v4188_v52  ;;  %v2795_v51 = vmul.f32 %v2781_v50, %v4237_v43 }
 0x8e0   :  { %v2787_v10 = vadd.f32 %v2785_v1, %v2784_v60  ;;  %v2798_v20 = vadd.f32 %v2796_v42, %v2795_v51  ;;  %v6859_v60 = vld [vmem:[#allocation5_spill] sm:$0xff] }
 0x8e2   :  { %v3775_v8 = vpop.eup %3774 }
 0x8e3   :  { %v2783_v53 = vmul.f32 %v3775_v8, %v2764_v61 }
 0x8e5   :  { %v2786_v37 = vmul.f32 %v2783_v53, %v4270_v4  ;;  %v2797_v7 = vmul.f32 %v2783_v53, %v4268_v27  ;;  %2825 = vmatpush.msra.mxu2 %v2783_v53 }
 0x8e7   :  { %2826 = vmatpush.msra.mxu2 %v2782_v11  ;;  %v2788_v18 = vadd.f32 %v2787_v10, %v2786_v37  ;;  %v2799_v44 = vadd.f32 %v2798_v20, %v2797_v7  ;;  %v6860_v7 = vld [vmem:[#allocation7_spill] sm:$0xff] }
 0x8e9   :  { %v2789_v14 = vrot.slane %v2788_v18, 4  ;;  %v2800_v49 = vrot.slane %v2799_v44, 4  ;;  %2827 = vmatpush.msra.mxu2 %v2781_v50 }
 0x8ea   :  { %3300 = vmatmul.msk.f32.vlgmr.msra.gmra.mxu2 %vm225_vm2, %v3936_v23  ;;  %v2809_v23 = vld [vmem:[%s6614_s3 + $0x1] sm:$0x1] }
 0x8eb   :  { %v2790_v33 = vadd.f32 %v2789_v14, %v2788_v18  ;;  %v2801_v56 = vadd.f32 %v2800_v49, %v2799_v44 }
 0x8ed   :  { %v2791_v34 = vrot.slane %v2790_v33, 2  ;;  %v2802_v6 = vrot.slane %v2801_v56, 2 }
 0x8ef   :  { %v2792_v38 = vadd.f32 %v2791_v34, %v2790_v33  ;;  %v2803_v36 = vadd.f32 %v2802_v6, %v2801_v56 }
 0x8f1   :  { %v2793_v57 = vrot.slane %v2792_v38, 1  ;;  %v2804_v26 = vrot.slane %v2803_v36, 1 }
 0x8f2   :  { %3301 = vmatmul.msk.f32.gmra.mxu2 %vm225_vm2, %v3951_v28 }
 0x8f3   :  { %v2794_v62 = vadd.f32 %v2793_v57, %v2792_v38  ;;  %v2805_v46 = vadd.f32 %v2804_v26, %v2803_v36  ;;  %v6861_v26 = vld [vmem:[#allocation10_spill] sm:$0xff] }
 0x8f5   :  { %v2807_v0 = vadd.f32 %v2806_v12, %v2794_v62  ;;  %v2810_v5 = vadd.f32 %v2809_v23, %v2805_v46 }
 0x8f7   :  { %2808 = vst [vmem:[%s6614_s3 + $0x8] sm:$0x1] %v2807_v0 }
 0x8f8   :  { %2811 = vst [vmem:[%s6614_s3 + $0x1] sm:$0x1] %v2810_v5 }
 0x8fa   :  { %3302 = vmatmul.msk.f32.gmra.mxu2 %vm225_vm2, %v3938_v24 }
 0x902   :  { %3303 = vmatmul.msk.f32.gmra.mxu2 %vm225_vm2, %v3953_v29 }
 0x90a   :  { %3304 = vmatmul.msk.f32.gmra.mxu2 %vm225_vm2, %v3916_v15 }
 0x912   :  { %3305 = vmatmul.msk.f32.gmra.mxu2 %vm225_vm2, %v3921_v17 }
 0x91a   :  { %3306 = vmatmul.msk.f32.gmra.mxu2 %vm225_vm2, %v3986_v39 }
 0x922   :  { %3307 = vmatmul.msk.f32.gmra.mxu2 %vm225_vm2, %v3963_v32 }
 0x92a   :  { %3308 = vmatmul.msk.f32.gmra.mxu2 %vm225_vm2, %v3992_v40 }
 0x932   :  { %3309 = vmatmul.msk.f32.gmra.mxu2 %vm225_vm2, %v3996_v41 }
 0x93a   :  { %3310 = vmatmul.msk.f32.gmra.mxu2 %vm225_vm2, %v3932_v22 }
 0x942   :  { %3311 = vmatmul.msk.f32.gmra.mxu2 %vm225_vm2, %v3973_v35 }
 0x96d   :  { %v2829_v15 = vpop.f32.mrf.mxu2 }
 0x96e   :  { %v2865_v29 = vadd.f32 %v2829_v15, %v4002_v54  ;;  %v6858_v54 = vld [vmem:[#allocation4_spill] sm:$0xff] }
 0x970   :  { %v3312_v32 = vmul.f32 -1.442695, %v2865_v29 }
 0x972   :  { %3776 = vpow2.f32 %v3312_v32 }
 0x975   :  { %v2832_v17 = vpop.f32.mrf.mxu2 }
 0x976   :  { %v2866_v25 = vadd.f32 %v2832_v17, %v4007_v58 }
 0x978   :  { %v3313_v59 = vmul.f32 -1.442695, %v2866_v25  ;;  %v3777_v35 = vpop.eup %3776 }
 0x979   :  { %v6384_v45 = vadd.f32 1.0, %v3777_v35 }
 0x97a   :  { %3778 = vpow2.f32 %v3313_v59 }
 0x97b   :  { %v2922_v59 = vand.u32 2147483647, %v6384_v45  ;;  %vm2918_vm13 = vweird.f32 %v6384_v45 }
 0x97d   :  { %v2835_v24 = vpop.f32.mrf.mxu2  ;;  %vm6454_vm6 = vcmp.eq.f32.partialorder %v2922_v59, 8.507059e+37 }
 0x97e   :  { %v2867_v11 = vadd.f32 %v2835_v24, %v6857_v19 }
 0x980   :  { %v3314_v50 = vmul.f32 -1.442695, %v2867_v11 }
 0x985   :  { %v2838_v28 = vpop.f32.mrf.mxu2 }
 0x986   :  { %v2868_v40 = vadd.f32 %v2838_v28, %v4014_v3  ;;  %v3779_v3 = vpop.eup %3778 }
 0x987   :  { %v6387_v8 = vadd.f32 1.0, %v3779_v3 }
 0x988   :  { %v3315_v13 = vmul.f32 -1.442695, %v2868_v40 }
 0x989   :  { %v2937_v35 = vand.u32 2147483647, %v6387_v8  ;;  %vm2933_vm15 = vweird.f32 %v6387_v8 }
 0x98a   :  { %3780 = vpow2.f32 %v3315_v13 }
 0x98b   :  { %vm6465_vm1 = vcmp.eq.f32.partialorder %v2937_v35, 8.507059e+37 }
 0x98d   :  { %v2841_v39 = vpop.f32.mrf.mxu2 }
 0x98e   :  { %v2869_v41 = vadd.f32 %v2841_v39, %v6856_v63 }
 0x990   :  { %v3316_v30 = vmul.f32 -1.442695, %v2869_v41  ;;  %v3781_v1 = vpop.eup %3780 }
 0x991   :  { %v6389_v61 = vadd.f32 1.0, %v3781_v1 }
 0x992   :  { %3782 = vpow2.f32 %v3316_v30 }
 0x993   :  { %3784 = vrcp.f32 %v6384_v45  ;;  %vm2963_vm5 = vweird.f32 %v6389_v61 }
 0x994   :  { %3786 = vpow2.f32 %v3314_v50 }
 0x995   :  { %v2844_v22 = vpop.f32.mrf.mxu2 }
 0x996   :  { %v2870_v55 = vadd.f32 %v2844_v22, %v6858_v54  ;;  %v2924_v22 = vand.u32 2147483648, %v6384_v45 }
 0x998   :  { %v3317_v21 = vmul.f32 -1.442695, %v2870_v55  ;;  %v3783_v42 = vpop.eup %3782  ;;  %v6862_v55 = vld [vmem:[#allocation9_spill] sm:$0xff] }
 0x999   :  { %v6391_v53 = vadd.f32 1.0, %v3783_v42  ;;  %v6396_v20 = vpop.eup %3784 }
 0x99a   :  { %3788 = vpow2.f32 %v3317_v21  ;;  %v3787_v18 = vpop.eup %3786  ;;  %v2914_v33 = vmul.f32 %v6396_v20, %v6384_v45  ;;  %vm2919_vm2 = vweird.f32 %v6396_v20  ;;  %v2925_v45 = vor.u32 1.1754944e-38, %v2924_v22 }
 0x99b   :  { %3790 = vrcp.f32 %v6387_v8  ;;  %v6402_v56 = vadd.f32 1.0, %v3787_v18  ;;  %vm6450_vm14 = vmor %vm2918_vm13, %vm2919_vm2  ;;  %vm2978_vm10 = vweird.f32 %v6391_v53 }
 0x99c   :  { %3792 = vrcp.f32 %v6389_v61  ;;  %v2915_v46 = vsub.f32 1.0, %v2914_v33  ;;  %v2969_v33 = vand.u32 2147483648, %v6389_v61 }
 0x99d   :  { %v2847_v58 = vpop.f32.mrf.mxu2  ;;  %3794 = vrcp.f32 %v6391_v53 }
 0x99e   :  { %v2871_v51 = vadd.f32 %v2847_v58, %v6859_v60  ;;  %v2916_v29 = vmul.f32 %v6396_v20, %v2915_v46  ;;  %v2939_v60 = vand.u32 2147483648, %v6387_v8  ;;  %v2970_v59 = vor.u32 1.1754944e-38, %v2969_v33 }
 0x9a0   :  { %v3318_v44 = vmul.f32 -1.442695, %v2871_v51  ;;  %v3789_v49 = vpop.eup %3788  ;;  %v2917_v13 = vadd.f32 %v6396_v20, %v2916_v29 }
 0x9a1   :  { %v6404_v34 = vpop.eup %3790  ;;  %v6406_v6 = vadd.f32 1.0, %v3789_v49 }
 0x9a2   :  { %v6408_v38 = vpop.eup %3792  ;;  %v2929_v12 = vmul.f32 %v6404_v34, %v6387_v8  ;;  %v2921_v51 = vsel %vm6450_vm14, %v6396_v20, %v2917_v13  ;;  %vm2934_vm0 = vweird.f32 %v6404_v34  ;;  %v2954_v13 = vand.u32 2147483648, %v6402_v56 }
 0x9a3   :  { %v6410_v57 = vpop.eup %3794  ;;  %v2959_v0 = vmul.f32 %v6408_v38, %v6389_v61  ;;  %vm2964_vm3 = vweird.f32 %v6408_v38  ;;  %vm6484_vm7 = vmor %vm2933_vm15, %vm2934_vm0  ;;  %vm2993_vm13 = vweird.f32 %v6406_v6  ;;  %vm2948_vm15 = vweird.f32 %v6402_v56 }
 0x9a4   :  { %v2974_v15 = vmul.f32 %v6410_v57, %v6391_v53  ;;  %v2930_v24 = vsub.f32 1.0, %v2929_v12  ;;  %vm2979_vm4 = vweird.f32 %v6410_v57  ;;  %vm6492_vm8 = vmor %vm2963_vm5, %vm2964_vm3 }
 0x9a5   :  { %v2850_v37 = vpop.f32.mrf.mxu2  ;;  %v2960_v39 = vsub.f32 1.0, %v2959_v0  ;;  %v2967_v0 = vand.u32 2147483647, %v6389_v61  ;;  %vm6501_vm9 = vmor %vm2978_vm10, %vm2979_vm4 }
 0x9a6   :  { %v2872_v10 = vadd.f32 %v2850_v37, %v6860_v7  ;;  %v2975_v25 = vsub.f32 1.0, %v2974_v15  ;;  %v2931_v30 = vmul.f32 %v6404_v34, %v2930_v24  ;;  %v2982_v15 = vand.u32 2147483647, %v6391_v53 }
 0x9a7   :  { %v2961_v54 = vmul.f32 %v6408_v38, %v2960_v39  ;;  %vm2968_vm11 = vcmp.eq.f32.partialorder %v2967_v0, 8.507059e+37  ;;  %v2997_v7 = vand.u32 2147483647, %v6406_v6 }
 0x9a8   :  { %v3319_v14 = vmul.f32 -1.442695, %v2872_v10  ;;  %v2976_v50 = vmul.f32 %v6410_v57, %v2975_v25  ;;  %v2932_v37 = vadd.f32 %v6404_v34, %v2931_v30  ;;  %vm2983_vm12 = vcmp.eq.f32.partialorder %v2982_v15, 8.507059e+37 }
 0x9a9   :  { %v2962_v18 = vadd.f32 %v6408_v38, %v2961_v54 }
 0x9aa   :  { %3796 = vpow2.f32 %v3319_v14  ;;  %v2977_v49 = vadd.f32 %v6410_v57, %v2976_v50  ;;  %v2936_v24 = vsel %vm6484_vm7, %v6404_v34, %v2932_v37 }
 0x9ab   :  { %3798 = vpow2.f32 %v3318_v44  ;;  %v2966_v39 = vsel %vm6492_vm8, %v6408_v38, %v2962_v18 }
 0x9ac   :  { %3800 = vrcp.f32 %v6402_v56  ;;  %v2981_v25 = vsel %vm6501_vm9, %v6410_v57, %v2977_v49 }
 0x9ad   :  { %v2853_v36 = vpop.f32.mrf.mxu2  ;;  %3802 = vrcp.f32 %v6406_v6 }
 0x9ae   :  { %v2873_v62 = vadd.f32 %v2853_v36, %v6861_v26  ;;  %v2984_v36 = vand.u32 2147483648, %v6391_v53  ;;  %v6869_v26 = vld [vmem:[#allocation6_spill] sm:$0xff]  ;;  %v2926_v53 = vsel %vm6454_vm6, %v2925_v45, %v2921_v51 }
 0x9b0   :  { %v3797_v23 = vpop.eup %3796  ;;  %v3320_v5 = vmul.f32 -1.442695, %v2873_v62  ;;  %v2985_v22 = vor.u32 1.1754944e-38, %v2984_v36  ;;  %v2955_v36 = vor.u32 1.1754944e-38, %v2954_v13 }
 0x9b1   :  { %v3799_v17 = vpop.eup %3798  ;;  %v6421_v28 = vadd.f32 1.0, %v3797_v23 }
 0x9b2   :  { %3804 = vpow2.f32 %v3320_v5  ;;  %v6424_v32 = vpop.eup %3800  ;;  %v6426_v40 = vadd.f32 1.0, %v3799_v17  ;;  %v2940_v5 = vor.u32 1.1754944e-38, %v2939_v60  ;;  %v2986_v57 = vsel %vm2983_vm12, %v2985_v22, %v2981_v25 }
 0x9b3   :  { %v6428_v41 = vpop.eup %3802  ;;  %3806 = vrcp.f32 %v6421_v28  ;;  %v2944_v11 = vmul.f32 %v6424_v32, %v6402_v56  ;;  %vm2949_vm2 = vweird.f32 %v6424_v32  ;;  %v3052_v51 = vmul.f32 %v2986_v57, %v6288_v48 }
 0x9b4   :  { %v2989_v3 = vmul.f32 %v6428_v41, %v6406_v6  ;;  %3808 = vrcp.f32 %v6426_v40  ;;  %v2941_v35 = vsel %vm6465_vm1, %v2940_v5, %v2936_v24  ;;  %vm2994_vm14 = vweird.f32 %v6428_v41  ;;  %vm6548_vm0 = vmor %vm2948_vm15, %vm2949_vm2 }
 0x9b5   :  { %v2856_v63 = vpop.f32.mrf.mxu2  ;;  %v2945_v10 = vsub.f32 1.0, %v2944_v11  ;;  %vm6539_vm6 = vmor %vm2993_vm13, %vm2994_vm14  ;;  %vm2998_vm1 = vcmp.eq.f32.partialorder %v2997_v7, 8.507059e+37  ;;  %vm3023_vm7 = vweird.f32 %v6421_v28  ;;  %v3014_v15 = vand.u32 2147483648, %v6426_v40 }
 0x9b6   :  { %v2874_v58 = vadd.f32 %v2856_v63, %v6862_v55  ;;  %v2990_v14 = vsub.f32 1.0, %v2989_v3  ;;  %v2999_v3 = vand.u32 2147483648, %v6406_v6  ;;  %vm3008_vm10 = vweird.f32 %v6426_v40 }
 0x9b7   :  { %v2946_v29 = vmul.f32 %v6424_v32, %v2945_v10 }
 0x9b8   :  { %v3805_v19 = vpop.eup %3804  ;;  %3810 = vtanh.f32 %v2874_v58  ;;  %v2991_v61 = vmul.f32 %v6428_v41, %v2990_v14  ;;  %v2952_v14 = vand.u32 2147483647, %v6402_v56  ;;  %v3000_v6 = vor.u32 1.1754944e-38, %v2999_v3 }
 0x9b9   :  { %v6446_v21 = vadd.f32 1.0, %v3805_v19  ;;  %v6471_v44 = vpop.eup %3806  ;;  %v2971_v19 = vsel %vm2968_vm11, %v2970_v59, %v2966_v39  ;;  %v2947_v11 = vadd.f32 %v6424_v32, %v2946_v29  ;;  %v3012_v29 = vand.u32 2147483647, %v6426_v40 }
 0x9ba   :  { %v6488_v12 = vpop.eup %3808  ;;  %v3019_v17 = vmul.f32 %v6471_v44, %v6421_v28  ;;  %v2992_v58 = vadd.f32 %v6428_v41, %v2991_v61  ;;  %v3051_v60 = vmul.f32 %v2971_v19, %v6286_v47  ;;  %vm3024_vm3 = vweird.f32 %v6471_v44 }
 0x9bb   :  { %3812 = vrcp.f32 %v6446_v21  ;;  %v3004_v34 = vmul.f32 %v6488_v12, %v6426_v40  ;;  %v2951_v56 = vsel %vm6548_vm0, %v6424_v32, %v2947_v11  ;;  %vm2953_vm4 = vcmp.eq.f32.partialorder %v2952_v14, 8.507059e+37  ;;  %vm6568_vm8 = vmor %vm3023_vm7, %vm3024_vm3 }
 0x9bc   :  { %v3020_v38 = vsub.f32 1.0, %v3019_v17  ;;  %v2996_v48 = vsel %vm6539_vm6, %v6428_v41, %v2992_v58  ;;  %vm3009_vm5 = vweird.f32 %v6488_v12  ;;  %v3029_v41 = vand.u32 2147483648, %v6421_v28 }
 0x9bd   :  { %v2859_v20 = vpop.f32.mrf.mxu2  ;;  %v3005_v1 = vsub.f32 1.0, %v3004_v34  ;;  %v2956_v46 = vsel %vm2953_vm4, %v2955_v36, %v2951_v56  ;;  %v3027_v32 = vand.u32 2147483647, %v6421_v28  ;;  %vm6580_vm9 = vmor %vm3008_vm10, %vm3009_vm5  ;;  %v3044_v59 = vand.u32 2147483648, %v6446_v21 }
 0x9be   :  { %v2875_v62 = vadd.f32 %v2859_v20, %v6869_v26  ;;  %v3811_v63 = vpop.eup %3810  ;;  %v3021_v18 = vmul.f32 %v6471_v44, %v3020_v38  ;;  %v3030_v39 = vor.u32 1.1754944e-38, %v3029_v41  ;;  %vm3013_vm2 = vcmp.eq.f32.partialorder %v3012_v29, 8.507059e+37 }
 0x9bf   :  { %v3054_v54 = vmul.f32 %v3811_v63, %v2926_v53  ;;  %v3006_v49 = vmul.f32 %v6488_v12, %v3005_v1  ;;  %vm3028_vm11 = vcmp.eq.f32.partialorder %v3027_v32, 8.507059e+37  ;;  %vm3038_vm13 = vweird.f32 %v6446_v21 }
 0x9c0   :  { %3814 = vtanh.f32 %v2875_v62  ;;  %v3022_v26 = vadd.f32 %v6471_v44, %v3021_v18  ;;  %v3001_v62 = vsel %vm2998_vm1, %v3000_v6, %v2996_v48  ;;  %v3042_v34 = vand.u32 2147483647, %v6446_v21 }
 0x9c1   :  { %v6523_v30 = vpop.eup %3812  ;;  %v3057_v20 = vadd.f32 %v3054_v54, %v3051_v60  ;;  %v3007_v0 = vadd.f32 %v6488_v12, %v3006_v49  ;;  %v3053_v17 = vmul.f32 %v3001_v62, %v6318_v9  ;;  %v3045_v19 = vor.u32 1.1754944e-38, %v3044_v59 }
 0x9c2   :  { %v3034_v42 = vmul.f32 %v6523_v30, %v6446_v21  ;;  %v3026_v61 = vsel %vm6568_vm8, %v6471_v44, %v3022_v26  ;;  %vm3039_vm12 = vweird.f32 %v6523_v30  ;;  %v3015_v44 = vor.u32 1.1754944e-38, %v3014_v15 }
 0x9c3   :  { %v3011_v9 = vsel %vm6580_vm9, %v6488_v12, %v3007_v0  ;;  %v3031_v22 = vsel %vm3028_vm11, %v3030_v39, %v3026_v61  ;;  %vm3040_vm14 = vmor %vm3038_vm13, %vm3039_vm12  ;;  %vm3043_vm6 = vcmp.eq.f32.partialorder %v3042_v34, 8.507059e+37 }
 0x9c4   :  { %v3035_v33 = vsub.f32 1.0, %v3034_v42 }
 0x9c5   :  { %v2862_v55 = vpop.f32.mrf.mxu2 }
 0x9c6   :  { %v3815_v50 = vpop.eup %3814  ;;  %v2876_v45 = vadd.f32 %v2862_v55, %v6694_v16  ;;  %v3036_v5 = vmul.f32 %v6523_v30, %v3035_v33 }
 0x9c7   :  { %v3055_v37 = vmul.f32 %v3815_v50, %v2941_v35  ;;  %v3016_v35 = vsel %vm3013_vm2, %v3015_v44, %v3011_v9 }
 0x9c8   :  { %3816 = vtanh.f32 %v2876_v45  ;;  %v3037_v40 = vadd.f32 %v6523_v30, %v3036_v5 }
 0x9c9   :  { %v3058_v16 = vadd.f32 %v3055_v37, %v3052_v51 }
 0x9ca   :  { %v3041_v12 = vsel %vm3040_vm14, %v6523_v30, %v3037_v40 }
 0x9cb   :  { %3818 = vtanh.f32 %v3058_v16  ;;  %v3046_v55 = vsel %vm3043_vm6, %v3045_v19, %v3041_v12 }
 0x9cc   :  { %3820 = vtanh.f32 %v3057_v20 }
 0x9ce   :  { %v3817_v23 = vpop.eup %3816 }
 0x9cf   :  { %v3056_v24 = vmul.f32 %v3817_v23, %v2956_v46 }
 0x9d1   :  { %v3819_v28 = vpop.eup %3818  ;;  %v3059_v25 = vadd.f32 %v3056_v24, %v3053_v17 }
 0x9d2   :  { %v3821_v63 = vpop.eup %3820  ;;  %v3064_v13 = vmul.f32 %v3819_v28, %v3031_v22 }
 0x9d3   :  { %3822 = vtanh.f32 %v3059_v25  ;;  %v3063_v38 = vmul.f32 %v3821_v63, %v3016_v35 }
 0x9d4   :  { %v3067_v57 = vmul.f32 %v3064_v13, %v4266_v31  ;;  %v3078_v11 = vmul.f32 %v3064_v13, %v4235_v2 }
 0x9d5   :  { %v3066_v58 = vmul.f32 %v3063_v38, %v4188_v52  ;;  %v3077_v50 = vmul.f32 %v3063_v38, %v4237_v43 }
 0x9d7   :  { %v3069_v21 = vadd.f32 %v3067_v57, %v3066_v58  ;;  %v3080_v1 = vadd.f32 %v3078_v11, %v3077_v50 }
 0x9d9   :  { %v3823_v54 = vpop.eup %3822 }
 0x9da   :  { %v3065_v3 = vmul.f32 %v3823_v54, %v3046_v55 }
 0x9dc   :  { %v3068_v42 = vmul.f32 %v3065_v3, %v4270_v4  ;;  %v3079_v30 = vmul.f32 %v3065_v3, %v4268_v27  ;;  %v3088_v4 = vld [vmem:[%s6614_s3 + $0x9] sm:$0x1]  ;;  %v3091_v27 = vld [vmem:[%s6614_s3] sm:$0x1] }
 0x9de   :  { %v3070_v45 = vadd.f32 %v3069_v21, %v3068_v42  ;;  %v3081_v60 = vadd.f32 %v3080_v1, %v3079_v30 }
 0x9e0   :  { %v3071_v51 = vrot.slane %v3070_v45, 4  ;;  %v3082_v37 = vrot.slane %v3081_v60, 4 }
 0x9e2   :  { %v3072_v31 = vadd.f32 %v3071_v51, %v3070_v45  ;;  %v3083_v7 = vadd.f32 %v3082_v37, %v3081_v60 }
 0x9e4   :  { %v3073_v2 = vrot.slane %v3072_v31, 2  ;;  %v3084_v10 = vrot.slane %v3083_v7, 2 }
 0x9e6   :  { %v3074_v18 = vadd.f32 %v3073_v2, %v3072_v31  ;;  %v3085_v14 = vadd.f32 %v3084_v10, %v3083_v7 }
 0x9e8   :  { %v3075_v52 = vrot.slane %v3074_v18, 1  ;;  %v3086_v20 = vrot.slane %v3085_v14, 1 }
 0x9ea   :  { %v3076_v43 = vadd.f32 %v3075_v52, %v3074_v18  ;;  %v3087_v16 = vadd.f32 %v3086_v20, %v3085_v14 }
 0x9ec   :  { %v3089_v47 = vadd.f32 %v3088_v4, %v3076_v43  ;;  %v3092_v48 = vadd.f32 %v3091_v27, %v3087_v16 }
 0x9ee   :  { %3090 = vst [vmem:[%s6614_s3 + $0x9] sm:$0x1] %v3089_v47 }
 0x9ef   :  { %3093 = vst [vmem:[%s6614_s3] sm:$0x1] %v3092_v48 }

</bundles_post_ra>
